<compile_context>
chip_gen: v5e
topology: v5e:2x2
jax: 0.10.0
libtpu: 0.0.40
codegen_flags: <defaults>
</compile_context>

<pallas_src>
import functools

import jax
import jax.numpy as jnp
import numpy as np
from jax.experimental import pallas as pl
from jax.experimental.pallas import tpu as pltpu

C_IN = 3          # xyz input channels
C_IN_PAD = 8      # pad tiny-K first layer for lane/MXU friendliness
OUT_DIM = 3       # fc3 output
OUT_PAD = 128     # lane-dense padded fc3 output (sliced back in wrapper)


# ----------------------------------------------------------------------------
# Fused kernel: conv backbone + global max-pool + fc head
# ----------------------------------------------------------------------------
def _tnet_fused_kernel(x_ref, w1, b1, w2, b2, w3, b3,
                       fw1, fb1, fw2, fb2, fw3, fb3,
                       o_ref, gmax_ref):
    s = pl.program_id(1)

    def mm(a, w, b):
        # bf16 MXU matmul with f32 accumulation, f32 bias add
        y = jnp.dot(a.astype(w.dtype), w[...],
                    preferred_element_type=jnp.float32)
        return y + b[...]

    # point-wise "1x1 conv" backbone on this tile of points
    x = x_ref[0]                                            # (tile_s, 8) bf16
    h = jnp.maximum(mm(x, w1, b1), 0.0)                     # (tile_s, 128)
    h = jnp.maximum(mm(h, w2, b2), 0.0)                     # (tile_s, 256)
    h = jnp.maximum(mm(h, w3, b3), 0.0)                     # (tile_s, 512)

    # fused global max-pool: running max accumulator in VMEM scratch
    @pl.when(s == 0)
    def _():
        gmax_ref[...] = jnp.full_like(gmax_ref, -jnp.inf)

    gmax_ref[...] = jnp.maximum(gmax_ref[...],
                                jnp.max(h, axis=0, keepdims=True))

    # fc head, finalized on the last point-tile of this batch element
    @pl.when(s == pl.num_programs(1) - 1)
    def _():
        f = jnp.maximum(mm(gmax_ref[...], fw1, fb1), 0.0)   # (1, 256)
        f = jnp.maximum(mm(f, fw2, fb2), 0.0)               # (1, 128)
        f = mm(f, fw3, fb3)                                 # (1, OUT_PAD)
        o_ref[0] = f.astype(o_ref.dtype)


# ----------------------------------------------------------------------------
# Wrapper
# ----------------------------------------------------------------------------
def tnet_forward(params, x, tile_s=None):
    """TNet forward.  x: (B, 3, S) in PyTorch NCL layout.  Returns (B, 3)."""
    B, C, S = x.shape
    assert C == C_IN
    if tile_s is None:
        tile_s = 512 if (S % 512 == 0) else S
    assert S % tile_s == 0 and tile_s % 8 == 0
    n_s = S // tile_s

    # points-major, channel-padded, bf16 input (single lane-friendly HBM read)
    xp = jnp.transpose(x, (0, 2, 1))                        # (B, S, 3)
    xp = jnp.pad(xp, ((0, 0), (0, 0), (0, C_IN_PAD - C)))
    xp = xp.astype(jnp.bfloat16)                            # (B, S, 8)

    def prep_w(w, pad_rows=0, pad_cols=0):
        if pad_rows or pad_cols:
            w = jnp.pad(w, ((0, pad_rows), (0, pad_cols)))
        return w.astype(jnp.bfloat16)

    def prep_b(b, pad_cols=0):
        if pad_cols:
            b = jnp.pad(b, ((0, pad_cols),))
        return b.reshape(1, -1).astype(jnp.float32)

    w1, b1 = params["conv1"]
    w2, b2 = params["conv2"]
    w3, b3 = params["conv3"]
    fw1, fb1 = params["fc1"]
    fw2, fb2 = params["fc2"]
    fw3, fb3 = params["fc3"]

    weight_ops = (
        prep_w(w1, pad_rows=C_IN_PAD - C_IN), prep_b(b1),
        prep_w(w2), prep_b(b2),
        prep_w(w3), prep_b(b3),
        prep_w(fw1), prep_b(fb1),
        prep_w(fw2), prep_b(fb2),
        prep_w(fw3, pad_cols=OUT_PAD - OUT_DIM), prep_b(fb3, pad_cols=OUT_PAD - OUT_DIM),
    )

    const_map = lambda b, s: (0, 0)
    w_specs = [pl.BlockSpec(op.shape, const_map) for op in weight_ops]

    out = pl.pallas_call(
        _tnet_fused_kernel,
        out_shape=jax.ShapeDtypeStruct((B, 1, OUT_PAD), jnp.float32),
        grid_spec=pltpu.PrefetchScalarGridSpec(
            num_scalar_prefetch=0,
            grid=(B, n_s),
            in_specs=[pl.BlockSpec((1, tile_s, C_IN_PAD),
                                   lambda b, s: (b, s, 0))] + w_specs,
            out_specs=pl.BlockSpec((1, 1, OUT_PAD), lambda b, s: (b, 0, 0)),
            scratch_shapes=[pltpu.VMEM((1, 512), jnp.float32)],
        ),
        compiler_params=pltpu.CompilerParams(
            dimension_semantics=("parallel", "arbitrary")),
    )(xp, *weight_ops)

    return out[:, 0, :OUT_DIM]                              # (B, 3)


# ----------------------------------------------------------------------------
# Parameter init (PyTorch-default-like U(+-1/sqrt(fan_in)); weights stored
# pre-transposed to (Cin, Cout) for the points-major layout)
# ----------------------------------------------------------------------------
def _init_linear(key, cin, cout):
    kw, kb = jax.random.split(key)
    bound = 1.0 / np.sqrt(cin)
    w = jax.random.uniform(kw, (cin, cout), jnp.float32, -bound, bound)
    b = jax.random.uniform(kb, (cout,), jnp.float32, -bound, bound)
    return w, b


def init_tnet_params(key):
    layer_defs = [("conv1", 3, 128), ("conv2", 128, 256), ("conv3", 256, 512),
                  ("fc1", 512, 256), ("fc2", 256, 128), ("fc3", 128, 3)]
    params = {}
    for name, cin, cout in layer_defs:
        key, sub = jax.random.split(key)
        params[name] = _init_linear(sub, cin, cout)
    return params


# ----------------------------------------------------------------------------
# Pure-JAX f32 reference (same math as the PyTorch module) for a sanity check
# ----------------------------------------------------------------------------
def tnet_reference(params, x):
    xp = jnp.transpose(x, (0, 2, 1))                        # (B, S, 3)

    def lin(a, name, act=True):
        w, b = params[name]
        y = a @ w + b
        return jnp.maximum(y, 0.0) if act else y

    h = lin(xp, "conv1")
    h = lin(h, "conv2")
    h = lin(h, "conv3")
    g = jnp.max(h, axis=1)                                  # global max-pool
    f = lin(g, "fc1")
    f = lin(f, "fc2")
    return lin(f, "fc3", act=False)                         # (B, 3)


# ----------------------------------------------------------------------------
if __name__ == "__main__":
    key = jax.random.PRNGKey(0)
    pkey, xkey = jax.random.split(key)
    params = init_tnet_params(pkey)

    # module defaults: num_seg_points = 512 (hard-coded MaxPool1d(512))
    B, S = 2, 512
    x = jax.random.normal(xkey, (B, C_IN, S), jnp.float32)

    fwd = jax.jit(tnet_forward)
    out = fwd(params, x)
    jax.block_until_ready(out)
    assert out.shape == (B, OUT_DIM)

    # bf16 MXU inputs (per perf review) => small deviation vs the f32 reference
    ref = tnet_reference(params, x)
    np.testing.assert_allclose(np.asarray(out), np.asarray(ref),
                               rtol=1e-1, atol=1e-1)

    print("KERNEL_OK")
</pallas_src>

<mosaic_0001>
module attributes {stable_mosaic.version = 11 : i64} {
  func.func @_tnet_fused_kernel(%arg0: i32, %arg1: i32, %arg2: memref<1x512x8xbf16, #tpu.memory_space<vmem>>, %arg3: memref<8x128xbf16, #tpu.memory_space<vmem>>, %arg4: memref<1x128xf32, #tpu.memory_space<vmem>>, %arg5: memref<128x256xbf16, #tpu.memory_space<vmem>>, %arg6: memref<1x256xf32, #tpu.memory_space<vmem>>, %arg7: memref<256x512xbf16, #tpu.memory_space<vmem>>, %arg8: memref<1x512xf32, #tpu.memory_space<vmem>>, %arg9: memref<512x256xbf16, #tpu.memory_space<vmem>>, %arg10: memref<1x256xf32, #tpu.memory_space<vmem>>, %arg11: memref<256x128xbf16, #tpu.memory_space<vmem>>, %arg12: memref<1x128xf32, #tpu.memory_space<vmem>>, %arg13: memref<128x128xbf16, #tpu.memory_space<vmem>>, %arg14: memref<1x128xf32, #tpu.memory_space<vmem>>, %arg15: memref<1x1x128xf32, #tpu.memory_space<vmem>>, %arg16: memref<1x512xf32, #tpu.memory_space<vmem>>) attributes {dimension_semantics = [#tpu.dimension_semantics<parallel>, #tpu.dimension_semantics<arbitrary>], iteration_bounds = array<i64: 2, 1>, scalar_prefetch = 0 : i64, scratch_operands = 1 : i64, tpu.core_type = #tpu.core_type<tc>, window_params = [{transform_indices = @transform_0, window_bounds = array<i64: 1, 512, 8>}, {pipeline_mode = #tpu.pipeline_mode<synchronous>, transform_indices = @transform_1, window_bounds = array<i64: 8, 128>}, {pipeline_mode = #tpu.pipeline_mode<synchronous>, transform_indices = @transform_2, window_bounds = array<i64: 1, 128>}, {pipeline_mode = #tpu.pipeline_mode<synchronous>, transform_indices = @transform_3, window_bounds = array<i64: 128, 256>}, {pipeline_mode = #tpu.pipeline_mode<synchronous>, transform_indices = @transform_4, window_bounds = array<i64: 1, 256>}, {pipeline_mode = #tpu.pipeline_mode<synchronous>, transform_indices = @transform_5, window_bounds = array<i64: 256, 512>}, {pipeline_mode = #tpu.pipeline_mode<synchronous>, transform_indices = @transform_6, window_bounds = array<i64: 1, 512>}, {pipeline_mode = #tpu.pipeline_mode<synchronous>, transform_indices = @transform_7, window_bounds = array<i64: 512, 256>}, {pipeline_mode = #tpu.pipeline_mode<synchronous>, transform_indices = @transform_8, window_bounds = array<i64: 1, 256>}, {pipeline_mode = #tpu.pipeline_mode<synchronous>, transform_indices = @transform_9, window_bounds = array<i64: 256, 128>}, {pipeline_mode = #tpu.pipeline_mode<synchronous>, transform_indices = @transform_10, window_bounds = array<i64: 1, 128>}, {pipeline_mode = #tpu.pipeline_mode<synchronous>, transform_indices = @transform_11, window_bounds = array<i64: 128, 128>}, {pipeline_mode = #tpu.pipeline_mode<synchronous>, transform_indices = @transform_12, window_bounds = array<i64: 1, 128>}, {transform_indices = @transform_13, window_bounds = array<i64: 1, 1, 128>}]} {
    %c0 = arith.constant 0 : index
    %c0_0 = arith.constant 0 : index
    %c0_1 = arith.constant 0 : index
    %0 = vector.load %arg2[%c0, %c0_0, %c0_1] : memref<1x512x8xbf16, #tpu.memory_space<vmem>>, vector<1x512x8xbf16>
    %1 = vector.shape_cast %0 : vector<1x512x8xbf16> to vector<512x8xbf16>
    %c0_2 = arith.constant 0 : index
    %c0_3 = arith.constant 0 : index
    %2 = vector.load %arg3[%c0_2, %c0_3] : memref<8x128xbf16, #tpu.memory_space<vmem>>, vector<8x128xbf16>
    %cst = arith.constant dense<0.000000e+00> : vector<512x128xf32>
    %3 = tpu.matmul %1, %2, %cst {dimension_numbers = #tpu.dot_dimension_numbers<[1], [0], [0], [1], [0, 0, 1, 1], [], []>} : vector<512x8xbf16>, vector<8x128xbf16>, vector<512x128xf32> -> vector<512x128xf32>
    %c0_4 = arith.constant 0 : index
    %c0_5 = arith.constant 0 : index
    %4 = vector.load %arg4[%c0_4, %c0_5] : memref<1x128xf32, #tpu.memory_space<vmem>>, vector<1x128xf32>
    %5 = vector.broadcast %4 : vector<1x128xf32> to vector<512x128xf32>
    %6 = arith.addf %3, %5 : vector<512x128xf32>
    %cst_6 = arith.constant 0.000000e+00 : f32
    %7 = vector.broadcast %cst_6 : f32 to vector<512x128xf32>
    %8 = arith.maximumf %6, %7 : vector<512x128xf32>
    %9 = arith.truncf %8 : vector<512x128xf32> to vector<512x128xbf16>
    %c0_7 = arith.constant 0 : index
    %c0_8 = arith.constant 0 : index
    %10 = vector.load %arg5[%c0_7, %c0_8] : memref<128x256xbf16, #tpu.memory_space<vmem>>, vector<128x256xbf16>
    %cst_9 = arith.constant dense<0.000000e+00> : vector<512x256xf32>
    %11 = tpu.matmul %9, %10, %cst_9 {dimension_numbers = #tpu.dot_dimension_numbers<[1], [0], [0], [1], [0, 0, 1, 1], [], []>} : vector<512x128xbf16>, vector<128x256xbf16>, vector<512x256xf32> -> vector<512x256xf32>
    %c0_10 = arith.constant 0 : index
    %c0_11 = arith.constant 0 : index
    %12 = vector.load %arg6[%c0_10, %c0_11] : memref<1x256xf32, #tpu.memory_space<vmem>>, vector<1x256xf32>
    %13 = vector.broadcast %12 : vector<1x256xf32> to vector<512x256xf32>
    %14 = arith.addf %11, %13 : vector<512x256xf32>
    %cst_12 = arith.constant 0.000000e+00 : f32
    %15 = vector.broadcast %cst_12 : f32 to vector<512x256xf32>
    %16 = arith.maximumf %14, %15 : vector<512x256xf32>
    %17 = arith.truncf %16 : vector<512x256xf32> to vector<512x256xbf16>
    %c0_13 = arith.constant 0 : index
    %c0_14 = arith.constant 0 : index
    %18 = vector.load %arg7[%c0_13, %c0_14] : memref<256x512xbf16, #tpu.memory_space<vmem>>, vector<256x512xbf16>
    %cst_15 = arith.constant dense<0.000000e+00> : vector<512x512xf32>
    %19 = tpu.matmul %17, %18, %cst_15 {dimension_numbers = #tpu.dot_dimension_numbers<[1], [0], [0], [1], [0, 0, 1, 1], [], []>} : vector<512x256xbf16>, vector<256x512xbf16>, vector<512x512xf32> -> vector<512x512xf32>
    %c0_16 = arith.constant 0 : index
    %c0_17 = arith.constant 0 : index
    %20 = vector.load %arg8[%c0_16, %c0_17] : memref<1x512xf32, #tpu.memory_space<vmem>>, vector<1x512xf32>
    %21 = vector.broadcast %20 : vector<1x512xf32> to vector<512x512xf32>
    %22 = arith.addf %19, %21 : vector<512x512xf32>
    %cst_18 = arith.constant 0.000000e+00 : f32
    %23 = vector.broadcast %cst_18 : f32 to vector<512x512xf32>
    %24 = arith.maximumf %22, %23 : vector<512x512xf32>
    %c0_i32 = arith.constant 0 : i32
    %25 = arith.cmpi eq, %arg1, %c0_i32 : i32
    %26 = arith.extui %25 : i1 to i32
    %c0_i32_19 = arith.constant 0 : i32
    %27 = arith.cmpi ne, %26, %c0_i32_19 : i32
    scf.if %27 {
      %cst_27 = arith.constant 0xFF800000 : f32
      %36 = vector.broadcast %cst_27 : f32 to vector<1x512xf32>
      %c0_28 = arith.constant 0 : index
      %c0_29 = arith.constant 0 : index
      %37 = vector.load %arg16[%c0_28, %c0_29] : memref<1x512xf32, #tpu.memory_space<vmem>>, vector<1x512xf32>
      tpu.vector_store %arg16[%c0_28, %c0_29], %36 {strides = array<i32>} : memref<1x512xf32, #tpu.memory_space<vmem>>, vector<1x512xf32>,
    } else {
    }
    %c0_20 = arith.constant 0 : index
    %c0_21 = arith.constant 0 : index
    %28 = vector.load %arg16[%c0_20, %c0_21] : memref<1x512xf32, #tpu.memory_space<vmem>>, vector<1x512xf32>
    %cst_22 = arith.constant dense<0xFF800000> : vector<512xf32>
    %29 = vector.multi_reduction <maximumf>, %24, %cst_22 [0] : vector<512x512xf32> to vector<512xf32>
    %30 = vector.shape_cast %29 : vector<512xf32> to vector<1x512xf32>
    %31 = arith.maximumf %28, %30 : vector<1x512xf32>
    %c0_23 = arith.constant 0 : index
    %c0_24 = arith.constant 0 : index
    %32 = vector.load %arg16[%c0_23, %c0_24] : memref<1x512xf32, #tpu.memory_space<vmem>>, vector<1x512xf32>
    tpu.vector_store %arg16[%c0_23, %c0_24], %31 {strides = array<i32>} : memref<1x512xf32, #tpu.memory_space<vmem>>, vector<1x512xf32>,
    %c0_i32_25 = arith.constant 0 : i32
    %33 = arith.cmpi eq, %arg1, %c0_i32_25 : i32
    %34 = arith.extui %33 : i1 to i32
    %c0_i32_26 = arith.constant 0 : i32
    %35 = arith.cmpi ne, %34, %c0_i32_26 : i32
    scf.if %35 {
      %c0_27 = arith.constant 0 : index
      %c0_28 = arith.constant 0 : index
      %36 = vector.load %arg16[%c0_27, %c0_28] : memref<1x512xf32, #tpu.memory_space<vmem>>, vector<1x512xf32>
      %37 = arith.truncf %36 : vector<1x512xf32> to vector<1x512xbf16>
      %c0_29 = arith.constant 0 : index
      %c0_30 = arith.constant 0 : index
      %38 = vector.load %arg9[%c0_29, %c0_30] : memref<512x256xbf16, #tpu.memory_space<vmem>>, vector<512x256xbf16>
      %cst_31 = arith.constant dense<0.000000e+00> : vector<1x256xf32>
      %39 = tpu.matmul %37, %38, %cst_31 {dimension_numbers = #tpu.dot_dimension_numbers<[1], [0], [0], [1], [0, 0, 1, 1], [], []>} : vector<1x512xbf16>, vector<512x256xbf16>, vector<1x256xf32> -> vector<1x256xf32>
      %c0_32 = arith.constant 0 : index
      %c0_33 = arith.constant 0 : index
      %40 = vector.load %arg10[%c0_32, %c0_33] : memref<1x256xf32, #tpu.memory_space<vmem>>, vector<1x256xf32>
      %41 = arith.addf %39, %40 : vector<1x256xf32>
      %cst_34 = arith.constant 0.000000e+00 : f32
      %42 = vector.broadcast %cst_34 : f32 to vector<1x256xf32>
      %43 = arith.maximumf %41, %42 : vector<1x256xf32>
      %44 = arith.truncf %43 : vector<1x256xf32> to vector<1x256xbf16>
      %c0_35 = arith.constant 0 : index
      %c0_36 = arith.constant 0 : index
      %45 = vector.load %arg11[%c0_35, %c0_36] : memref<256x128xbf16, #tpu.memory_space<vmem>>, vector<256x128xbf16>
      %cst_37 = arith.constant dense<0.000000e+00> : vector<1x128xf32>
      %46 = tpu.matmul %44, %45, %cst_37 {dimension_numbers = #tpu.dot_dimension_numbers<[1], [0], [0], [1], [0, 0, 1, 1], [], []>} : vector<1x256xbf16>, vector<256x128xbf16>, vector<1x128xf32> -> vector<1x128xf32>
      %c0_38 = arith.constant 0 : index
      %c0_39 = arith.constant 0 : index
      %47 = vector.load %arg12[%c0_38, %c0_39] : memref<1x128xf32, #tpu.memory_space<vmem>>, vector<1x128xf32>
      %48 = arith.addf %46, %47 : vector<1x128xf32>
      %cst_40 = arith.constant 0.000000e+00 : f32
      %49 = vector.broadcast %cst_40 : f32 to vector<1x128xf32>
      %50 = arith.maximumf %48, %49 : vector<1x128xf32>
      %51 = arith.truncf %50 : vector<1x128xf32> to vector<1x128xbf16>
      %c0_41 = arith.constant 0 : index
      %c0_42 = arith.constant 0 : index
      %52 = vector.load %arg13[%c0_41, %c0_42] : memref<128x128xbf16, #tpu.memory_space<vmem>>, vector<128x128xbf16>
      %cst_43 = arith.constant dense<0.000000e+00> : vector<1x128xf32>
      %53 = tpu.matmul %51, %52, %cst_43 {dimension_numbers = #tpu.dot_dimension_numbers<[1], [0], [0], [1], [0, 0, 1, 1], [], []>} : vector<1x128xbf16>, vector<128x128xbf16>, vector<1x128xf32> -> vector<1x128xf32>
      %c0_44 = arith.constant 0 : index
      %c0_45 = arith.constant 0 : index
      %54 = vector.load %arg14[%c0_44, %c0_45] : memref<1x128xf32, #tpu.memory_space<vmem>>, vector<1x128xf32>
      %55 = arith.addf %53, %54 : vector<1x128xf32>
      %c0_46 = arith.constant 0 : index
      %c0_47 = arith.constant 0 : index
      %c0_48 = arith.constant 0 : index
      %56 = vector.load %arg15[%c0_46, %c0_47, %c0_48] : memref<1x1x128xf32, #tpu.memory_space<vmem>>, vector<1x1x128xf32>
      %57 = vector.shape_cast %56 : vector<1x1x128xf32> to vector<1x128xf32>
      %58 = vector.shape_cast %55 : vector<1x128xf32> to vector<1x1x128xf32>
      tpu.vector_store %arg15[%c0_46, %c0_47, %c0_48], %58 {strides = array<i32>} : memref<1x1x128xf32, #tpu.memory_space<vmem>>, vector<1x1x128xf32>,
    } else {
    }
    return
  }
  func.func @transform_0(%arg0: i32, %arg1: i32) -> (i32, i32, i32) {
    %c0_i32 = arith.constant 0 : i32
    %c0_i32_0 = arith.constant 0 : i32
    return %arg0, %arg1, %c0_i32 : i32, i32, i32
  }
  func.func @transform_1(%arg0: i32, %arg1: i32) -> (i32, i32) {
    %c0_i32 = arith.constant 0 : i32
    %c0_i32_0 = arith.constant 0 : i32
    %c0_i32_1 = arith.constant 0 : i32
    return %c0_i32, %c0_i32_0 : i32, i32
  }
  func.func @transform_2(%arg0: i32, %arg1: i32) -> (i32, i32) {
    %c0_i32 = arith.constant 0 : i32
    %c0_i32_0 = arith.constant 0 : i32
    %c0_i32_1 = arith.constant 0 : i32
    return %c0_i32, %c0_i32_0 : i32, i32
  }
  func.func @transform_3(%arg0: i32, %arg1: i32) -> (i32, i32) {
    %c0_i32 = arith.constant 0 : i32
    %c0_i32_0 = arith.constant 0 : i32
    %c0_i32_1 = arith.constant 0 : i32
    return %c0_i32, %c0_i32_0 : i32, i32
  }
  func.func @transform_4(%arg0: i32, %arg1: i32) -> (i32, i32) {
    %c0_i32 = arith.constant 0 : i32
    %c0_i32_0 = arith.constant 0 : i32
    %c0_i32_1 = arith.constant 0 : i32
    return %c0_i32, %c0_i32_0 : i32, i32
  }
  func.func @transform_5(%arg0: i32, %arg1: i32) -> (i32, i32) {
    %c0_i32 = arith.constant 0 : i32
    %c0_i32_0 = arith.constant 0 : i32
    %c0_i32_1 = arith.constant 0 : i32
    return %c0_i32, %c0_i32_0 : i32, i32
  }
  func.func @transform_6(%arg0: i32, %arg1: i32) -> (i32, i32) {
    %c0_i32 = arith.constant 0 : i32
    %c0_i32_0 = arith.constant 0 : i32
    %c0_i32_1 = arith.constant 0 : i32
    return %c0_i32, %c0_i32_0 : i32, i32
  }
  func.func @transform_7(%arg0: i32, %arg1: i32) -> (i32, i32) {
    %c0_i32 = arith.constant 0 : i32
    %c0_i32_0 = arith.constant 0 : i32
    %c0_i32_1 = arith.constant 0 : i32
    return %c0_i32, %c0_i32_0 : i32, i32
  }
  func.func @transform_8(%arg0: i32, %arg1: i32) -> (i32, i32) {
    %c0_i32 = arith.constant 0 : i32
    %c0_i32_0 = arith.constant 0 : i32
    %c0_i32_1 = arith.constant 0 : i32
    return %c0_i32, %c0_i32_0 : i32, i32
  }
  func.func @transform_9(%arg0: i32, %arg1: i32) -> (i32, i32) {
    %c0_i32 = arith.constant 0 : i32
    %c0_i32_0 = arith.constant 0 : i32
    %c0_i32_1 = arith.constant 0 : i32
    return %c0_i32, %c0_i32_0 : i32, i32
  }
  func.func @transform_10(%arg0: i32, %arg1: i32) -> (i32, i32) {
    %c0_i32 = arith.constant 0 : i32
    %c0_i32_0 = arith.constant 0 : i32
    %c0_i32_1 = arith.constant 0 : i32
    return %c0_i32, %c0_i32_0 : i32, i32
  }
  func.func @transform_11(%arg0: i32, %arg1: i32) -> (i32, i32) {
    %c0_i32 = arith.constant 0 : i32
    %c0_i32_0 = arith.constant 0 : i32
    %c0_i32_1 = arith.constant 0 : i32
    return %c0_i32, %c0_i32_0 : i32, i32
  }
  func.func @transform_12(%arg0: i32, %arg1: i32) -> (i32, i32) {
    %c0_i32 = arith.constant 0 : i32
    %c0_i32_0 = arith.constant 0 : i32
    %c0_i32_1 = arith.constant 0 : i32
    return %c0_i32, %c0_i32_0 : i32, i32
  }
  func.func @transform_13(%arg0: i32, %arg1: i32) -> (i32, i32, i32) {
    %c0_i32 = arith.constant 0 : i32
    %c0_i32_0 = arith.constant 0 : i32
    %c0_i32_1 = arith.constant 0 : i32
    return %arg0, %c0_i32, %c0_i32_0 : i32, i32, i32
  }
}

</mosaic_0001>

<bundles_post_ra>
// kernel: tnet_forward.1
= control target key start
LH: loop header
LB: loop body
LE: loop exit
PB: predicated region body
PF: predicated region fallthrough
CT: control target
= control target key end

     0   :  { %s8504_s0 = inlined_call_operand.vmem [shape: bf16[2,512,8], index: 0, kind: input, shape index: {}]   ;;  %s8505_s1 = inlined_call_operand.vmem [shape: bf16[8,128], index: 1, kind: input, shape index: {}]   ;;  %s8506_s2 = inlined_call_operand.vmem [shape: f32[1,128], index: 2, kind: input, shape index: {}]   ;;  %s8507_s3 = inlined_call_operand.vmem [shape: bf16[128,256], index: 3, kind: input, shape index: {}]   ;;  %s8508_s4 = inlined_call_operand.vmem [shape: f32[1,256], index: 4, kind: input, shape index: {}]   ;;  %s8509_s5 = inlined_call_operand.vmem [shape: bf16[256,512], index: 5, kind: input, shape index: {}]   ;;  %s8510_s6 = inlined_call_operand.vmem [shape: f32[1,512], index: 6, kind: input, shape index: {}]   ;;  %s8511_s7 = inlined_call_operand.vmem [shape: bf16[512,256], index: 7, kind: input, shape index: {}]   ;;  %s8512_s8 = inlined_call_operand.vmem [shape: f32[1,256], index: 8, kind: input, shape index: {}]   ;;  %s8513_s9 = inlined_call_operand.vmem [shape: bf16[256,128], index: 9, kind: input, shape index: {}]   ;;  %s8514_s10 = inlined_call_operand.vmem [shape: f32[1,128], index: 10, kind: input, shape index: {}]   ;;  %s8515_s11 = inlined_call_operand.vmem [shape: bf16[128,128], index: 11, kind: input, shape index: {}]   ;;  %s8516_s12 = inlined_call_operand.vmem [shape: f32[1,128], index: 12, kind: input, shape index: {}]   ;;  %s8517_s13 = inlined_call_operand.hbm [shape: f32[2,1,128], index: 13, kind: output, shape index: {}]  }
   0x1   :  { %8638 = sst [smem:[#allocation73_spill]] %s8504_s0 }
   0x2   :  { %8639 = sst [smem:[#allocation74_spill]] %s8505_s1 }
   0x3   :  { %8640 = sst [smem:[#allocation75_spill]] %s8506_s2 }
   0x4   :  { %18 = vsyncpa [#allocation4], 0 }
   0x5   :  { %20 = vsyncpa [#allocation4 + $0x1], 0  ;;  %s6103_s25 = smov 0   ;;  %s6105_s26 = smov 0  }
   0x6   :  { %s6107_s27 = smov 0   ;;  %s6109_s28 = smov 0  }
   0x7   :  { %s6111_s29 = smov 0   ;;  %s6113_s30 = smov 0  }
   0x8 LB: > { %8641 = sst [smem:[#allocation6_spill]] %s6026_s29  ;;  %s4835_s14 = sadd.s32 4294967295, %s6030_s30   ;;  %s6030_s30 = sphi %s6113_s30, %s26_s30   ;;  %s6026_s29 = sphi %s6111_s29, %s8798_s29   ;;  %s6022_s28 = sphi %s6109_s28, %s8797_s28   ;;  %s6018_s27 = sphi %s6107_s27, %s8801_s27   ;;  %s6014_s26 = sphi %s6105_s26, %s8800_s26   ;;  %s6010_s25 = sphi %s6103_s25, %s8799_s25  }
   0x9   : > { %s4836_s15 = sadd.s32 4294967294, %s6030_s30   ;;  %s38_s16 = sadd.s32 1, %s6026_s29 }
   0xa   : > { %s325_s17 = sadd.s32 1, %s6018_s27  ;;  %p40_p0 = scmp.ge.s32.totalorder %s38_s16, 2 }
   0xb   : > { %p335_p1 = scmp.ne.s32.totalorder %s6018_s27, %s6014_s26  ;;  %p336_p2 = scmp.eq.s32.totalorder %s4835_s14, 1 }
   0xc   : > { %p341_p3 = scmp.ne.s32.totalorder %s6014_s26, %s6010_s25  ;;  %s8803_s16 = smov (%p40_p0, %s38_s16), 0 }
   0xd   : > { %8642 = sst [smem:[#allocation7_spill]] %s8803_s16  ;;  %p6143_p4 = por %p336_p2, %p335_p1 }
   0xe   : > { %p342_p5 = scmp.eq.s32.totalorder %s4836_s15, 1  ;;  %s322_s19 = ssub.s32 %s6026_s29, %s8803_s16 }
   0xf   : > { %p4839_p6 = scmp.ge.s32.totalorder %s6030_s30, 1  ;;  %p323_p7 = scmp.eq.s32.totalorder %s322_s19, 0 }
  0x10   : > { %p6150_p8 = por %p342_p5, %p341_p3  ;;  %p409_p9 = scmp.lt.s32.totalorder %s6030_s30, 3 }
  0x11   : > { %s6156_s21 = scalar_select %p323_p7, %s6018_s27, %s325_s17  }
  0x12   : > { %p410_p10 = pnand %p4839_p6, %p409_p9 }
  0x14   : > { %413 = sbr.rel (%p410_p10) target bundleno = 2530 (0x9e2), region = 72 }
  0x19   : > { %s8645_s1 = sld [smem:[#allocation74_spill]]  ;;  %vm793_vm0 = vcmask 1043456   ;;  %p457_p11 = scmp.lt.s32.totalorder %s6022_s28, 1  ;;  %vm696_vm1 = vcmask 64512   ;;  %v5060_v7 = vld [vmem:[%s8507_s3 + $0x70] sm:$0xf] }
  0x1a   : > { %s8646_s0 = sld [smem:[#allocation73_spill]]  ;;  %v5724_v8 = vld [vmem:[%s8507_s3 + $0x74] sm:$0xf0]  ;;  %v5723_v9 = vld [vmem:[%s8507_s3 + $0x74] sm:$0xf]  ;;  %vm3989_vm2 = vcmask 1040384  }
  0x1b   : > { %s458_s24 = scalar_select %p457_p11, %s6022_s28, 1  ;;  %v5061_v10 = vor.u32 %v5724_v8, %v5060_v7  ;;  %v5062_v11 = vld [vmem:[%s8507_s3 + $0x78] sm:$0xf0]  ;;  %v5052_v14 = vld [vmem:[%s8507_s3 + $0x60] sm:$0xf]  ;;  %vm3991_vm4 = vcmask 1042434  }
  0x1c   : > { %v6190_v12 = vor.u32 %v5723_v9, %v5062_v11  ;;  %v5722_v15 = vld [vmem:[%s8507_s3 + $0x64] sm:$0xf0]  ;;  %v5721_v16 = vld [vmem:[%s8507_s3 + $0x64] sm:$0xf]  ;;  %v5054_v18 = vld [vmem:[%s8507_s3 + $0x68] sm:$0xf0] }
  0x1d   : > { %s5676_s14 = sshll.u32 %s458_s24, 8  ;;  %1164 = vmatpush.bf16.msra.mxu1 %v5061_v10  ;;  %5877 = vmatpush.bf16.msra.mxu3 %v5061_v10  ;;  %v5053_v17 = vor.u32 %v5722_v15, %v5052_v14  ;;  %v5057_v19 = vor.u32 %v5721_v16, %v5054_v18  ;;  %v5044_v20 = vld [vmem:[%s8507_s3 + $0x50] sm:$0xf]  ;;  %v5720_v21 = vld [vmem:[%s8507_s3 + $0x54] sm:$0xf0]  ;;  %s8647_s2 = sld [smem:[#allocation75_spill]] }
  0x1e   : > { %1333 = vmatpush.bf16.msra.mxu2 %v6190_v12  ;;  %v5719_v22 = vld [vmem:[%s8507_s3 + $0x54] sm:$0xf]  ;;  %v5045_v23 = vor.u32 %v5720_v21, %v5044_v20  ;;  %v5046_v24 = vld [vmem:[%s8507_s3 + $0x58] sm:$0xf0]  ;;  %v5036_v26 = vld [vmem:[%s8507_s3 + $0x40] sm:$0xf] }
  0x1f   : > { %v531_v0 = vld [vmem:[%s8645_s1] sm:$0xf]  ;;  %v5049_v25 = vor.u32 %v5719_v22, %v5046_v24  ;;  %v5718_v27 = vld [vmem:[%s8507_s3 + $0x44] sm:$0xf0]  ;;  %v5717_v28 = vld [vmem:[%s8507_s3 + $0x44] sm:$0xf] }
  0x20   : > { %v795_v1 = vsel %vm793_vm0, %v531_v0, 0  ;;  %s6166_s16 = scalar_lea.vmem %s8646_s0, %s5676_s14  ;;  %v5038_v29 = vld [vmem:[%s8507_s3 + $0x48] sm:$0xf0]  ;;  %v5037_v30 = vor.u32 %v5718_v27, %v5036_v26  ;;  %v5028_v32 = vld [vmem:[%s8507_s3 + $0x30] sm:$0xf]  ;;  %vm3993_vm5 = vcmask 1041408   ;;  %s4762_s0 = scalar_lea.hbm %s8517_s13, %s6022_s28 }
  0x21   : > { %804 = vmatpush.bf16.msra.mxu0 %v795_v1  ;;  %v5677_v2 = vld [vmem:[%s6166_s16] sm:$0xff]  ;;  %v5678_v3 = vld [vmem:[%s6166_s16 + $0x8] sm:$0xff]  ;;  %v5679_v4 = vld [vmem:[%s6166_s16 + $0x10] sm:$0xff]  ;;  %1165 = vmatpush.bf16.msra.mxu1 %v5053_v17  ;;  %v5041_v31 = vor.u32 %v5717_v28, %v5038_v29  ;;  %s454_s14 = sand.u32 1, %s6014_s26   ;;  %s4766_s22 = sshll.u32 %s4762_s0, 4  ;;  %s4767_s22 = int_to_ptr.hbm [resolvable:$true] %s4766_s22 }
  0x22   : > { %v5680_v5 = vld [vmem:[%s6166_s16 + $0x18] sm:$0xff]  ;;  %v5681_v6 = vld [vmem:[%s6166_s16 + $0x20] sm:$0xff]  ;;  %v5682_v13 = vld [vmem:[%s6166_s16 + $0x28] sm:$0xff]  ;;  %5878 = vmatpush.bf16.msra.mxu3 %v5053_v17  ;;  %1334 = vmatpush.bf16.msra.mxu2 %v5057_v19  ;;  %s455_s19 = scalar_lea.vmem [#allocation3], %s454_s14  ;;  %s4754_s23 = scalar_lea.sflag [#allocation4], %s454_s14 }
  0x23   : > { %v5716_v33 = vld [vmem:[%s8507_s3 + $0x34] sm:$0xf0]  ;;  %v5715_v34 = vld [vmem:[%s8507_s3 + $0x34] sm:$0xf]  ;;  %v5030_v36 = vld [vmem:[%s8507_s3 + $0x38] sm:$0xf0] }
  0x24   : > { %4970 = vmatmul.msk.bf16.vlgmr.msra.gmra.mxu0 %vm696_vm1, %v5677_v2  ;;  %v5029_v35 = vor.u32 %v5716_v33, %v5028_v32  ;;  %v5683_v37 = vld [vmem:[%s6166_s16 + $0x30] sm:$0xff]  ;;  %v5033_v38 = vor.u32 %v5715_v34, %v5030_v36  ;;  %v5020_v39 = vld [vmem:[%s8507_s3 + $0x20] sm:$0xf]  ;;  %v5714_v40 = vld [vmem:[%s8507_s3 + $0x24] sm:$0xf0]  ;;  %s4764_s17 = sshll.u32 %s455_s19, 4  ;;  %s4765_s17 = int_to_ptr.vmem [resolvable:$true] %s4764_s17 }
  0x25   : > { %1166 = vmatpush.bf16.msra.mxu1 %v5045_v23  ;;  %v5021_v41 = vor.u32 %v5714_v40, %v5020_v39  ;;  %v5713_v42 = vld [vmem:[%s8507_s3 + $0x24] sm:$0xf]  ;;  %v5022_v43 = vld [vmem:[%s8507_s3 + $0x28] sm:$0xf0]  ;;  %v5012_v45 = vld [vmem:[%s8507_s3 + $0x10] sm:$0xf] }
  0x26   : > { %5879 = vmatpush.bf16.msra.mxu3 %v5045_v23  ;;  %1335 = vmatpush.bf16.msra.mxu2 %v5049_v25  ;;  %v5025_v44 = vor.u32 %v5713_v42, %v5022_v43  ;;  %v5712_v46 = vld [vmem:[%s8507_s3 + $0x14] sm:$0xf0]  ;;  %v5711_v47 = vld [vmem:[%s8507_s3 + $0x14] sm:$0xf]  ;;  %v5014_v49 = vld [vmem:[%s8507_s3 + $0x18] sm:$0xf0] }
  0x27   : > { %v5013_v48 = vor.u32 %v5712_v46, %v5012_v45  ;;  %v5017_v50 = vor.u32 %v5711_v47, %v5014_v49  ;;  %v5004_v51 = vld [vmem:[%s8507_s3] sm:$0xf]  ;;  %v5710_v52 = vld [vmem:[%s8507_s3 + $0x4] sm:$0xf0]  ;;  %v5709_v53 = vld [vmem:[%s8507_s3 + $0x4] sm:$0xf] }
  0x28   : > { %v5005_v54 = vor.u32 %v5710_v52, %v5004_v51  ;;  %v5006_v55 = vld [vmem:[%s8507_s3 + $0x8] sm:$0xf0]  ;;  %v5684_v57 = vld [vmem:[%s6166_s16 + $0x38] sm:$0xff]  ;;  %v5685_v58 = vld [vmem:[%s6166_s16 + $0x40] sm:$0xff]  ;;  %s5966_s24 = sshra.s32 %s4767_s22, 4  ;;  %s5967_s24 = int_to_ptr.hbm [resolvable:$true] %s5966_s24 }
  0x29   : > { %1167 = vmatpush.bf16.msra.mxu1 %v5037_v30  ;;  %v5009_v56 = vor.u32 %v5709_v53, %v5006_v55  ;;  %v6288_v60 = vld [vmem:[%s8647_s2] ss:$0 sm:$0xff]  ;;  %v5687_v11 = vld [vmem:[%s6166_s16 + $0x50] sm:$0xff]  ;;  %p5973_p1 = scmp.lt.s32.totalorder %s5967_s24, %s8517_s13 }
  0x2a   : > { %5880 = vmatpush.bf16.msra.mxu3 %v5037_v30  ;;  %1336 = vmatpush.bf16.msra.mxu2 %v5041_v31  ;;  %v5689_v27 = vld [vmem:[%s6166_s16 + $0x60] sm:$0xff]  ;;  %v5691_v43 = vld [vmem:[%s6166_s16 + $0x70] sm:$0xff] }
  0x2b   : > { %v5308_v45 = vld [vmem:[%s8509_s5 + $0x1e0] sm:$0xf]  ;;  %v5787_v46 = vld [vmem:[%s8509_s5 + $0x1ec] sm:$0xf0] }
  0x2c   : > { %v5309_v47 = vor.u32 %v5787_v46, %v5308_v45 }
  0x2d   : > { %1168 = vmatpush.bf16.msra.mxu1 %v5029_v35 }
  0x2e   : > { %5881 = vmatpush.bf16.msra.mxu3 %v5029_v35  ;;  %1337 = vmatpush.bf16.msra.mxu2 %v5033_v38  ;;  %v5690_v35 = vld [vmem:[%s6166_s16 + $0x68] sm:$0xff] }
  0x2f   : > { %2257 = vmatpush.bf16.msrb.mxu0 %v5309_v47 }
  0x31   : > { %1169 = vmatpush.bf16.msra.mxu1 %v5021_v41 }
  0x32   : > { %5882 = vmatpush.bf16.msra.mxu3 %v5021_v41  ;;  %1338 = vmatpush.bf16.msra.mxu2 %v5025_v44 }
  0x34   : > { %4971 = vmatmul.msk.bf16.gmra.mxu0 %vm696_vm1, %v5678_v3  ;;  %v5686_v3 = vld [vmem:[%s6166_s16 + $0x48] sm:$0xff] }
  0x35   : > { %1170 = vmatpush.bf16.msra.mxu1 %v5013_v48 }
  0x36   : > { %5883 = vmatpush.bf16.msra.mxu3 %v5013_v48  ;;  %1339 = vmatpush.bf16.msra.mxu2 %v5017_v50 }
  0x39   : > { %1171 = vmatpush.bf16.msra.mxu1 %v5005_v54 }
  0x3a   : > { %5884 = vmatpush.bf16.msra.mxu3 %v5005_v54  ;;  %1340 = vmatpush.bf16.msra.mxu2 %v5009_v56  ;;  %v5692_v54 = vld [vmem:[%s6166_s16 + $0x78] sm:$0xff] }
  0x3e   : > { %5885 = vmatpush.bf16.msrb.mxu3 %v6190_v12 }
  0x42   : > { %5886 = vmatpush.bf16.msrb.mxu3 %v5057_v19  ;;  %v5688_v19 = vld [vmem:[%s6166_s16 + $0x58] sm:$0xff] }
  0x44   : > { %4972 = vmatmul.msk.bf16.gmra.mxu0 %vm696_vm1, %v5679_v4 }
  0x46   : > { %5887 = vmatpush.bf16.msrb.mxu3 %v5049_v25 }
  0x4a   : > { %5888 = vmatpush.bf16.msrb.mxu3 %v5041_v31 }
  0x4e   : > { %5889 = vmatpush.bf16.msrb.mxu3 %v5033_v38 }
  0x52   : > { %5890 = vmatpush.bf16.msrb.mxu3 %v5025_v44 }
  0x54   : > { %4973 = vmatmul.msk.bf16.gmra.mxu0 %vm696_vm1, %v5680_v5 }
  0x56   : > { %5891 = vmatpush.bf16.msrb.mxu3 %v5017_v50 }
  0x5a   : > { %5892 = vmatpush.bf16.msrb.mxu3 %v5009_v56 }
  0x64   : > { %4974 = vmatmul.msk.bf16.gmra.mxu0 %vm696_vm1, %v5681_v6 }
  0x74   : > { %4975 = vmatmul.msk.bf16.gmra.mxu0 %vm696_vm1, %v5682_v13 }
  0x84   : > { %4976 = vmatmul.msk.bf16.gmra.mxu0 %vm696_vm1, %v5683_v37 }
  0x94   : > { %4977 = vmatmul.msk.bf16.gmra.mxu0 %vm696_vm1, %v5684_v57 }
  0xa1   : > { %v806_v59 = vpop.f32.mrf.mxu0 }
  0xa2   : > { %v807_v61 = vadd.f32 %v6288_v60, %v806_v59 }
  0xa4   : > { %4978 = vmatmul.msk.bf16.gmra.mxu0 %vm696_vm1, %v5685_v58  ;;  %v966_v0 = vmax.f32 %v807_v61, 0.0 }
  0xa9   : > { %v808_v62 = vpop.f32.mrf.mxu0 }
  0xaa   : > { %v809_v63 = vadd.f32 %v6288_v60, %v808_v62 }
  0xac   : > { %v967_v1 = vmax.f32 %v809_v63, 0.0  ;;  %v5693_v63 = vld [vmem:[%s6166_s16 + $0x80] sm:$0xff] }
  0xae   : > { %v1030_v2 = vpack.c.bf16 %v967_v1, %v966_v0 }
  0xb0   : > { %1172 = vmatmul.bf16.vlgmr.msra.gmra.mxu1 %v1030_v2  ;;  %1341 = vmatmul.bf16.vlgmr.msra.gmra.mxu2 %v1030_v2 }
  0xb1   : > { %v811_v4 = vpop.f32.mrf.mxu0 }
  0xb2   : > { %v812_v5 = vadd.f32 %v6288_v60, %v811_v4 }
  0xb4   : > { %4979 = vmatmul.msk.bf16.gmra.mxu0 %vm696_vm1, %v5686_v3  ;;  %v968_v8 = vmax.f32 %v812_v5, 0.0 }
  0xb9   : > { %v813_v6 = vpop.f32.mrf.mxu0 }
  0xba   : > { %v814_v7 = vadd.f32 %v6288_v60, %v813_v6  ;;  %v1078_v6 = vld [vmem:[%s8508_s4] sm:$0x3] }
  0xbc   : > { %v969_v9 = vmax.f32 %v814_v7, 0.0 }
  0xbe   : > { %v1031_v10 = vpack.c.bf16 %v969_v9, %v968_v8  ;;  %v6334_v9 = vperm.slane %v1078_v6, 0 }
  0xc0   : > { %1177 = vmatmul.bf16.gmra.mxu1 %v1031_v10  ;;  %1346 = vmatmul.bf16.gmra.mxu2 %v1031_v10  ;;  %v5694_v10 = vld [vmem:[%s6166_s16 + $0x88] sm:$0xff] }
  0xc1   : > { %v816_v12 = vpop.f32.mrf.mxu0 }
  0xc2   : > { %v817_v13 = vadd.f32 %v6288_v60, %v816_v12 }
  0xc4   : > { %4980 = vmatmul.msk.bf16.gmra.mxu0 %vm696_vm1, %v5687_v11  ;;  %v970_v16 = vmax.f32 %v817_v13, 0.0 }
  0xc9   : > { %v818_v14 = vpop.f32.mrf.mxu0 }
  0xca   : > { %v819_v15 = vadd.f32 %v6288_v60, %v818_v14  ;;  %v5785_v14 = vld [vmem:[%s8509_s5 + $0x1e4] sm:$0xf] }
  0xcc   : > { %v971_v17 = vmax.f32 %v819_v15, 0.0  ;;  %v5310_v15 = vld [vmem:[%s8509_s5 + $0x1f0] sm:$0xf0] }
  0xce   : > { %v1032_v18 = vpack.c.bf16 %v971_v17, %v970_v16  ;;  %v5313_v17 = vor.u32 %v5785_v14, %v5310_v15 }
  0xd0   : > { %1182 = vmatmul.bf16.gmra.mxu1 %v1032_v18  ;;  %1351 = vmatmul.bf16.gmra.mxu2 %v1032_v18  ;;  %v6345_v18 = vperm.slane %v1078_v6, 1 }
  0xd1   : > { %v821_v20 = vpop.f32.mrf.mxu0  ;;  %2595 = vmatpush.bf16.msrb.mxu2 %v5313_v17 }
  0xd2   : > { %v822_v21 = vadd.f32 %v6288_v60, %v821_v20 }
  0xd4   : > { %4981 = vmatmul.msk.bf16.gmra.mxu0 %vm696_vm1, %v5688_v19  ;;  %v972_v24 = vmax.f32 %v822_v21, 0.0 }
  0xd9   : > { %v823_v22 = vpop.f32.mrf.mxu0 }
  0xda   : > { %v824_v23 = vadd.f32 %v6288_v60, %v823_v22 }
  0xdc   : > { %v973_v25 = vmax.f32 %v824_v23, 0.0 }
  0xde   : > { %v1033_v26 = vpack.c.bf16 %v973_v25, %v972_v24 }
  0xe0   : > { %1187 = vmatmul.bf16.gmra.mxu1 %v1033_v26  ;;  %1356 = vmatmul.bf16.gmra.mxu2 %v1033_v26 }
  0xe1   : > { %v826_v28 = vpop.f32.mrf.mxu0 }
  0xe2   : > { %v827_v29 = vadd.f32 %v6288_v60, %v826_v28  ;;  %v5182_v28 = vld [vmem:[%s8509_s5 + $0xf0] sm:$0xf0] }
  0xe4   : > { %4982 = vmatmul.msk.bf16.gmra.mxu0 %vm696_vm1, %v5689_v27  ;;  %v974_v32 = vmax.f32 %v827_v29, 0.0  ;;  %v5753_v27 = vld [vmem:[%s8509_s5 + $0xe4] sm:$0xf] }
  0xe9   : > { %v828_v30 = vpop.f32.mrf.mxu0 }
  0xea   : > { %v829_v31 = vadd.f32 %v6288_v60, %v828_v30  ;;  %v5185_v30 = vor.u32 %v5753_v27, %v5182_v28 }
  0xec   : > { %v975_v33 = vmax.f32 %v829_v31, 0.0  ;;  %2426 = vmatpush.bf16.msrb.mxu1 %v5185_v30 }
  0xee   : > { %v1034_v34 = vpack.c.bf16 %v975_v33, %v974_v32 }
  0xf0   : > { %1192 = vmatmul.bf16.gmra.mxu1 %v1034_v34  ;;  %1361 = vmatmul.bf16.gmra.mxu2 %v1034_v34 }
  0xf1   : > { %v831_v36 = vpop.f32.mrf.mxu0 }
  0xf2   : > { %v832_v37 = vadd.f32 %v6288_v60, %v831_v36 }
  0xf4   : > { %4983 = vmatmul.msk.bf16.gmra.mxu0 %vm696_vm1, %v5690_v35  ;;  %v976_v40 = vmax.f32 %v832_v37, 0.0 }
  0xf9   : > { %v833_v38 = vpop.f32.mrf.mxu0 }
  0xfa   : > { %v834_v39 = vadd.f32 %v6288_v60, %v833_v38 }
  0xfc   : > { %v977_v41 = vmax.f32 %v834_v39, 0.0  ;;  %v5695_v39 = vld [vmem:[%s6166_s16 + $0x90] sm:$0xff] }
  0xfe   : > { %v1035_v42 = vpack.c.bf16 %v977_v41, %v976_v40 }
 0x100   : > { %1197 = vmatmul.bf16.gmra.mxu1 %v1035_v42  ;;  %1366 = vmatmul.bf16.gmra.mxu2 %v1035_v42 }
 0x101   : > { %v836_v44 = vpop.f32.mrf.mxu0 }
 0x102   : > { %v837_v48 = vadd.f32 %v6288_v60, %v836_v44 }
 0x104   : > { %4984 = vmatmul.msk.bf16.gmra.mxu0 %vm696_vm1, %v5691_v43  ;;  %v978_v51 = vmax.f32 %v837_v48, 0.0 }
 0x109   : > { %v838_v49 = vpop.f32.mrf.mxu0 }
 0x10a   : > { %v839_v50 = vadd.f32 %v6288_v60, %v838_v49 }
 0x10c   : > { %v979_v52 = vmax.f32 %v839_v50, 0.0 }
 0x10e   : > { %v1036_v53 = vpack.c.bf16 %v979_v52, %v978_v51  ;;  %v5292_v52 = vld [vmem:[%s8509_s5 + $0x1c0] sm:$0xf] }
 0x110   : > { %1202 = vmatmul.bf16.gmra.mxu1 %v1036_v53  ;;  %1371 = vmatmul.bf16.gmra.mxu2 %v1036_v53  ;;  %v5783_v53 = vld [vmem:[%s8509_s5 + $0x1cc] sm:$0xf0] }
 0x111   : > { %v841_v55 = vpop.f32.mrf.mxu0 }
 0x112   : > { %v842_v56 = vadd.f32 %v6288_v60, %v841_v55  ;;  %v5293_v55 = vor.u32 %v5783_v53, %v5292_v52  ;;  %v5294_v52 = vld [vmem:[%s8509_s5 + $0x1d0] sm:$0xf0] }
 0x114   : > { %4985 = vmatmul.msk.bf16.gmra.mxu0 %vm696_vm1, %v5692_v54  ;;  %v980_v59 = vmax.f32 %v842_v56, 0.0 }
 0x115   : > { %2258 = vmatpush.bf16.msrb.mxu0 %v5293_v55  ;;  %v5749_v55 = vld [vmem:[%s8509_s5 + $0xc4] sm:$0xf] }
 0x119   : > { %v843_v57 = vpop.f32.mrf.mxu0 }
 0x11a   : > { %v844_v58 = vadd.f32 %v6288_v60, %v843_v57 }
 0x11c   : > { %v981_v61 = vmax.f32 %v844_v58, 0.0 }
 0x11e   : > { %v1037_v62 = vpack.c.bf16 %v981_v61, %v980_v59 }
 0x120   : > { %1207 = vmatmul.bf16.gmra.mxu1 %v1037_v62  ;;  %1376 = vmatmul.bf16.gmra.mxu2 %v1037_v62 }
 0x121   : > { %v846_v0 = vpop.f32.mrf.mxu0 }
 0x122   : > { %v847_v1 = vadd.f32 %v6288_v60, %v846_v0 }
 0x124   : > { %4986 = vmatmul.msk.bf16.gmra.mxu0 %vm696_vm1, %v5693_v63  ;;  %v982_v4 = vmax.f32 %v847_v1, 0.0  ;;  %v5696_v1 = vld [vmem:[%s6166_s16 + $0x98] sm:$0xff] }
 0x129   : > { %v848_v2 = vpop.f32.mrf.mxu0 }
 0x12a   : > { %v849_v3 = vadd.f32 %v6288_v60, %v848_v2 }
 0x12c   : > { %v983_v5 = vmax.f32 %v849_v3, 0.0 }
 0x12d   : > { %v1173_v7 = vpop.f32.mrf.mxu1 }
 0x12e   : > { %v1038_v8 = vpack.c.bf16 %v983_v5, %v982_v4  ;;  %v1174_v13 = vadd.f32 %v1173_v7, %v6334_v9 }
 0x130   : > { %1212 = vmatmul.bf16.gmra.mxu1 %v1038_v8  ;;  %1381 = vmatmul.bf16.gmra.mxu2 %v1038_v8  ;;  %v1502_v20 = vmax.f32 %v1174_v13, 0.0 }
 0x131   : > { %v851_v11 = vpop.f32.mrf.mxu0 }
 0x132   : > { %v852_v21 = vadd.f32 %v6288_v60, %v851_v11 }
 0x133   : > { %v1342_v12 = vpop.f32.mrf.mxu2 }
 0x134   : > { %4987 = vmatmul.msk.bf16.gmra.mxu0 %vm696_vm1, %v5694_v10  ;;  %v1343_v24 = vadd.f32 %v1342_v12, %v6345_v18  ;;  %v984_v31 = vmax.f32 %v852_v21, 0.0 }
 0x135   : > { %v1175_v16 = vpop.f32.mrf.mxu1 }
 0x136   : > { %v1176_v19 = vadd.f32 %v1175_v16, %v6334_v9  ;;  %v1503_v35 = vmax.f32 %v1343_v24, 0.0 }
 0x138   : > { %v1504_v22 = vmax.f32 %v1176_v19, 0.0 }
 0x139   : > { %v853_v23 = vpop.f32.mrf.mxu0 }
 0x13a   : > { %v6350_v25 = vpack.c.bf16 %v1504_v22, %v1502_v20  ;;  %v854_v26 = vadd.f32 %v6288_v60, %v853_v23 }
 0x13b   : > { %v1344_v29 = vpop.f32.mrf.mxu2 }
 0x13c   : > { %8648 = vst [vmem:[#allocation8_spill] sm:$0xff] %v6350_v25  ;;  %v985_v32 = vmax.f32 %v854_v26, 0.0  ;;  %v1345_v33 = vadd.f32 %v1344_v29, %v6345_v18  ;;  %v5697_v26 = vld [vmem:[%s6166_s16 + $0xa0] sm:$0xff] }
 0x13d   : > { %v1178_v34 = vpop.f32.mrf.mxu1 }
 0x13e   : > { %v1505_v36 = vmax.f32 %v1345_v33, 0.0  ;;  %v1039_v37 = vpack.c.bf16 %v985_v32, %v984_v31  ;;  %v1179_v42 = vadd.f32 %v1178_v34, %v6334_v9 }
 0x140   : > { %v6360_v38 = vpack.c.bf16 %v1505_v36, %v1503_v35  ;;  %1217 = vmatmul.bf16.gmra.mxu1 %v1039_v37  ;;  %1386 = vmatmul.bf16.gmra.mxu2 %v1039_v37  ;;  %v1506_v45 = vmax.f32 %v1179_v42, 0.0 }
 0x141   : > { %v856_v40 = vpop.f32.mrf.mxu0 }
 0x142   : > { %8649 = vst [vmem:[#allocation9_spill] sm:$0xff] %v6360_v38  ;;  %v857_v46 = vadd.f32 %v6288_v60, %v856_v40 }
 0x143   : > { %v1347_v41 = vpop.f32.mrf.mxu2 }
 0x144   : > { %4988 = vmatmul.msk.bf16.gmra.mxu0 %vm696_vm1, %v5695_v39  ;;  %v1348_v49 = vadd.f32 %v1347_v41, %v6345_v18  ;;  %v986_v56 = vmax.f32 %v857_v46, 0.0 }
 0x145   : > { %v1180_v43 = vpop.f32.mrf.mxu1 }
 0x146   : > { %v1181_v44 = vadd.f32 %v1180_v43, %v6334_v9  ;;  %v1507_v61 = vmax.f32 %v1348_v49, 0.0  ;;  %v5698_v49 = vld [vmem:[%s6166_s16 + $0xa8] sm:$0xff] }
 0x148   : > { %v1508_v47 = vmax.f32 %v1181_v44, 0.0 }
 0x149   : > { %v858_v48 = vpop.f32.mrf.mxu0 }
 0x14a   : > { %v6368_v50 = vpack.c.bf16 %v1508_v47, %v1506_v45  ;;  %v859_v51 = vadd.f32 %v6288_v60, %v858_v48 }
 0x14b   : > { %v1349_v54 = vpop.f32.mrf.mxu2 }
 0x14c   : > { %8650 = vst [vmem:[#allocation10_spill] sm:$0xff] %v6368_v50  ;;  %v987_v57 = vmax.f32 %v859_v51, 0.0  ;;  %v1350_v58 = vadd.f32 %v1349_v54, %v6345_v18  ;;  %v5781_v51 = vld [vmem:[%s8509_s5 + $0x1c4] sm:$0xf] }
 0x14d   : > { %v1183_v59 = vpop.f32.mrf.mxu1  ;;  %v5297_v54 = vor.u32 %v5781_v51, %v5294_v52 }
 0x14e   : > { %v1509_v62 = vmax.f32 %v1350_v58, 0.0  ;;  %v1040_v63 = vpack.c.bf16 %v987_v57, %v986_v56  ;;  %v1184_v4 = vadd.f32 %v1183_v59, %v6334_v9  ;;  %v5166_v56 = vld [vmem:[%s8509_s5 + $0xd0] sm:$0xf0] }
 0x14f   : > { %v5169_v57 = vor.u32 %v5749_v55, %v5166_v56  ;;  %2596 = vmatpush.bf16.msrb.mxu2 %v5297_v54 }
 0x150   : > { %v6378_v0 = vpack.c.bf16 %v1509_v62, %v1507_v61  ;;  %1222 = vmatmul.bf16.gmra.mxu1 %v1040_v63  ;;  %1391 = vmatmul.bf16.gmra.mxu2 %v1040_v63  ;;  %v1510_v7 = vmax.f32 %v1184_v4, 0.0 }
 0x151   : > { %v861_v2 = vpop.f32.mrf.mxu0  ;;  %2427 = vmatpush.bf16.msrb.mxu1 %v5169_v57 }
 0x152   : > { %8651 = vst [vmem:[#allocation11_spill] sm:$0xff] %v6378_v0  ;;  %v862_v8 = vadd.f32 %v6288_v60, %v861_v2 }
 0x153   : > { %v1352_v3 = vpop.f32.mrf.mxu2 }
 0x154   : > { %4989 = vmatmul.msk.bf16.gmra.mxu0 %vm696_vm1, %v5696_v1  ;;  %v1353_v12 = vadd.f32 %v1352_v3, %v6345_v18  ;;  %v988_v16 = vmax.f32 %v862_v8, 0.0 }
 0x155   : > { %v1185_v5 = vpop.f32.mrf.mxu1 }
 0x156   : > { %v1186_v6 = vadd.f32 %v1185_v5, %v6334_v9  ;;  %v1511_v21 = vmax.f32 %v1353_v12, 0.0 }
 0x158   : > { %v1512_v10 = vmax.f32 %v1186_v6, 0.0 }
 0x159   : > { %v863_v11 = vpop.f32.mrf.mxu0 }
 0x15a   : > { %v6386_v13 = vpack.c.bf16 %v1512_v10, %v1510_v7  ;;  %v864_v14 = vadd.f32 %v6288_v60, %v863_v11 }
 0x15b   : > { %v1354_v15 = vpop.f32.mrf.mxu2 }
 0x15c   : > { %8652 = vst [vmem:[#allocation12_spill] sm:$0xff] %v6386_v13  ;;  %v989_v17 = vmax.f32 %v864_v14, 0.0  ;;  %v1355_v19 = vadd.f32 %v1354_v15, %v6345_v18 }
 0x15d   : > { %v1188_v20 = vpop.f32.mrf.mxu1 }
 0x15e   : > { %v1513_v22 = vmax.f32 %v1355_v19, 0.0  ;;  %v1041_v23 = vpack.c.bf16 %v989_v17, %v988_v16  ;;  %v1189_v29 = vadd.f32 %v1188_v20, %v6334_v9  ;;  %v5699_v19 = vld [vmem:[%s6166_s16 + $0xb0] sm:$0xff] }
 0x160   : > { %v6390_v24 = vpack.c.bf16 %v1513_v22, %v1511_v21  ;;  %1227 = vmatmul.bf16.gmra.mxu1 %v1041_v23  ;;  %1396 = vmatmul.bf16.gmra.mxu2 %v1041_v23  ;;  %v1514_v32 = vmax.f32 %v1189_v29, 0.0 }
 0x161   : > { %v866_v27 = vpop.f32.mrf.mxu0 }
 0x162   : > { %8653 = vst [vmem:[#allocation13_spill] sm:$0xff] %v6390_v24  ;;  %v867_v33 = vadd.f32 %v6288_v60, %v866_v27 }
 0x163   : > { %v1357_v28 = vpop.f32.mrf.mxu2 }
 0x164   : > { %4990 = vmatmul.msk.bf16.gmra.mxu0 %vm696_vm1, %v5697_v26  ;;  %v1358_v36 = vadd.f32 %v1357_v28, %v6345_v18  ;;  %v990_v41 = vmax.f32 %v867_v33, 0.0 }
 0x165   : > { %v1190_v30 = vpop.f32.mrf.mxu1 }
 0x166   : > { %v1191_v31 = vadd.f32 %v1190_v30, %v6334_v9  ;;  %v1515_v45 = vmax.f32 %v1358_v36, 0.0 }
 0x168   : > { %v1516_v34 = vmax.f32 %v1191_v31, 0.0 }
 0x169   : > { %v868_v35 = vpop.f32.mrf.mxu0 }
 0x16a   : > { %v6398_v37 = vpack.c.bf16 %v1516_v34, %v1514_v32  ;;  %v869_v39 = vadd.f32 %v6288_v60, %v868_v35  ;;  %v5276_v34 = vld [vmem:[%s8509_s5 + $0x1a0] sm:$0xf]  ;;  %v5779_v35 = vld [vmem:[%s8509_s5 + $0x1ac] sm:$0xf0] }
 0x16b   : > { %v1359_v40 = vpop.f32.mrf.mxu2 }
 0x16c   : > { %8654 = vst [vmem:[#allocation14_spill] sm:$0xff] %v6398_v37  ;;  %v991_v42 = vmax.f32 %v869_v39, 0.0  ;;  %v1360_v43 = vadd.f32 %v1359_v40, %v6345_v18  ;;  %v5277_v39 = vor.u32 %v5779_v35, %v5276_v34 }
 0x16d   : > { %v1193_v44 = vpop.f32.mrf.mxu1 }
 0x16e   : > { %v1517_v46 = vmax.f32 %v1360_v43, 0.0  ;;  %v1042_v47 = vpack.c.bf16 %v991_v42, %v990_v41  ;;  %v1194_v59 = vadd.f32 %v1193_v44, %v6334_v9  ;;  %2259 = vmatpush.bf16.msrb.mxu0 %v5277_v39 }
 0x170   : > { %v6402_v48 = vpack.c.bf16 %v1517_v46, %v1515_v45  ;;  %1232 = vmatmul.bf16.gmra.mxu1 %v1042_v47  ;;  %1401 = vmatmul.bf16.gmra.mxu2 %v1042_v47  ;;  %v1518_v63 = vmax.f32 %v1194_v59, 0.0 }
 0x171   : > { %v871_v53 = vpop.f32.mrf.mxu0 }
 0x172   : > { %8655 = vst [vmem:[#allocation15_spill] sm:$0xff] %v6402_v48  ;;  %v872_v1 = vadd.f32 %v6288_v60, %v871_v53 }
 0x173   : > { %v1362_v58 = vpop.f32.mrf.mxu2 }
 0x174   : > { %4991 = vmatmul.msk.bf16.gmra.mxu0 %vm696_vm1, %v5698_v49  ;;  %v1363_v4 = vadd.f32 %v1362_v58, %v6345_v18  ;;  %v992_v8 = vmax.f32 %v872_v1, 0.0  ;;  %v5700_v49 = vld [vmem:[%s6166_s16 + $0xb8] sm:$0xff] }
 0x175   : > { %v1195_v61 = vpop.f32.mrf.mxu1 }
 0x176   : > { %v1196_v62 = vadd.f32 %v1195_v61, %v6334_v9  ;;  %v1519_v14 = vmax.f32 %v1363_v4, 0.0 }
 0x178   : > { %v1520_v2 = vmax.f32 %v1196_v62, 0.0 }
 0x179   : > { %v873_v3 = vpop.f32.mrf.mxu0 }
 0x17a   : > { %v6422_v5 = vpack.c.bf16 %v1520_v2, %v1518_v63  ;;  %v874_v6 = vadd.f32 %v6288_v60, %v873_v3 }
 0x17b   : > { %v1364_v7 = vpop.f32.mrf.mxu2 }
 0x17c   : > { %8656 = vst [vmem:[#allocation16_spill] sm:$0xff] %v6422_v5  ;;  %v993_v10 = vmax.f32 %v874_v6, 0.0  ;;  %v1365_v11 = vadd.f32 %v1364_v7, %v6345_v18 }
 0x17d   : > { %v1198_v12 = vpop.f32.mrf.mxu1 }
 0x17e   : > { %v1521_v15 = vmax.f32 %v1365_v11, 0.0  ;;  %v1043_v16 = vpack.c.bf16 %v993_v10, %v992_v8  ;;  %v1199_v22 = vadd.f32 %v1198_v12, %v6334_v9  ;;  %v5701_v12 = vld [vmem:[%s6166_s16 + $0xc0] sm:$0xff] }
 0x180   : > { %v6426_v17 = vpack.c.bf16 %v1521_v15, %v1519_v14  ;;  %1237 = vmatmul.bf16.gmra.mxu1 %v1043_v16  ;;  %1406 = vmatmul.bf16.gmra.mxu2 %v1043_v16  ;;  %v1522_v27 = vmax.f32 %v1199_v22, 0.0 }
 0x181   : > { %v876_v20 = vpop.f32.mrf.mxu0 }
 0x182   : > { %8657 = vst [vmem:[#allocation17_spill] sm:$0xff] %v6426_v17  ;;  %v877_v28 = vadd.f32 %v6288_v60, %v876_v20 }
 0x183   : > { %v1367_v21 = vpop.f32.mrf.mxu2 }
 0x184   : > { %4992 = vmatmul.msk.bf16.gmra.mxu0 %vm696_vm1, %v5699_v19  ;;  %v1368_v31 = vadd.f32 %v1367_v21, %v6345_v18  ;;  %v994_v40 = vmax.f32 %v877_v28, 0.0 }
 0x185   : > { %v1200_v23 = vpop.f32.mrf.mxu1 }
 0x186   : > { %v1201_v26 = vadd.f32 %v1200_v23, %v6334_v9  ;;  %v1523_v44 = vmax.f32 %v1368_v31, 0.0  ;;  %v5278_v31 = vld [vmem:[%s8509_s5 + $0x1b0] sm:$0xf0] }
 0x188   : > { %v1524_v29 = vmax.f32 %v1201_v26, 0.0 }
 0x189   : > { %v878_v30 = vpop.f32.mrf.mxu0 }
 0x18a   : > { %v6434_v32 = vpack.c.bf16 %v1524_v29, %v1522_v27  ;;  %v879_v33 = vadd.f32 %v6288_v60, %v878_v30  ;;  %v5777_v30 = vld [vmem:[%s8509_s5 + $0x1a4] sm:$0xf] }
 0x18b   : > { %v1369_v36 = vpop.f32.mrf.mxu2  ;;  %v5281_v34 = vor.u32 %v5777_v30, %v5278_v31 }
 0x18c   : > { %8658 = vst [vmem:[#allocation18_spill] sm:$0xff] %v6434_v32  ;;  %v995_v41 = vmax.f32 %v879_v33, 0.0  ;;  %v1370_v42 = vadd.f32 %v1369_v36, %v6345_v18 }
 0x18d   : > { %v1203_v43 = vpop.f32.mrf.mxu1  ;;  %2597 = vmatpush.bf16.msrb.mxu2 %v5281_v34 }
 0x18e   : > { %v1525_v45 = vmax.f32 %v1370_v42, 0.0  ;;  %v1044_v46 = vpack.c.bf16 %v995_v41, %v994_v40  ;;  %v1204_v53 = vadd.f32 %v1203_v43, %v6334_v9  ;;  %v5745_v40 = vld [vmem:[%s8509_s5 + $0xa4] sm:$0xf]  ;;  %v5150_v41 = vld [vmem:[%s8509_s5 + $0xb0] sm:$0xf0] }
 0x18f   : > { %v5153_v43 = vor.u32 %v5745_v40, %v5150_v41 }
 0x190   : > { %v6444_v47 = vpack.c.bf16 %v1525_v45, %v1523_v44  ;;  %1242 = vmatmul.bf16.gmra.mxu1 %v1044_v46  ;;  %1411 = vmatmul.bf16.gmra.mxu2 %v1044_v46  ;;  %v1526_v56 = vmax.f32 %v1204_v53, 0.0 }
 0x191   : > { %v881_v51 = vpop.f32.mrf.mxu0  ;;  %2428 = vmatpush.bf16.msrb.mxu1 %v5153_v43 }
 0x192   : > { %8659 = vst [vmem:[#allocation19_spill] sm:$0xff] %v6444_v47  ;;  %v882_v57 = vadd.f32 %v6288_v60, %v881_v51  ;;  %v5702_v51 = vld [vmem:[%s6166_s16 + $0xc8] sm:$0xff] }
 0x193   : > { %v1372_v52 = vpop.f32.mrf.mxu2 }
 0x194   : > { %4993 = vmatmul.msk.bf16.gmra.mxu0 %vm696_vm1, %v5700_v49  ;;  %v1373_v61 = vadd.f32 %v1372_v52, %v6345_v18  ;;  %v996_v2 = vmax.f32 %v882_v57, 0.0 }
 0x195   : > { %v1205_v54 = vpop.f32.mrf.mxu1 }
 0x196   : > { %v1206_v55 = vadd.f32 %v1205_v54, %v6334_v9  ;;  %v1527_v7 = vmax.f32 %v1373_v61, 0.0 }
 0x198   : > { %v1528_v58 = vmax.f32 %v1206_v55, 0.0 }
 0x199   : > { %v883_v59 = vpop.f32.mrf.mxu0 }
 0x19a   : > { %v6452_v62 = vpack.c.bf16 %v1528_v58, %v1526_v56  ;;  %v884_v63 = vadd.f32 %v6288_v60, %v883_v59 }
 0x19b   : > { %v1374_v1 = vpop.f32.mrf.mxu2 }
 0x19c   : > { %8660 = vst [vmem:[#allocation20_spill] sm:$0xff] %v6452_v62  ;;  %v997_v3 = vmax.f32 %v884_v63, 0.0  ;;  %v1375_v4 = vadd.f32 %v1374_v1, %v6345_v18 }
 0x19d   : > { %v1208_v6 = vpop.f32.mrf.mxu1 }
 0x19e   : > { %v1529_v8 = vmax.f32 %v1375_v4, 0.0  ;;  %v1045_v10 = vpack.c.bf16 %v997_v3, %v996_v2  ;;  %v1209_v16 = vadd.f32 %v1208_v6, %v6334_v9 }
 0x1a0   : > { %v6456_v11 = vpack.c.bf16 %v1529_v8, %v1527_v7  ;;  %1247 = vmatmul.bf16.gmra.mxu1 %v1045_v10  ;;  %1416 = vmatmul.bf16.gmra.mxu2 %v1045_v10  ;;  %v1530_v21 = vmax.f32 %v1209_v16, 0.0  ;;  %v5703_v16 = vld [vmem:[%s6166_s16 + $0xd0] sm:$0xff] }
 0x1a1   : > { %v886_v14 = vpop.f32.mrf.mxu0 }
 0x1a2   : > { %8661 = vst [vmem:[#allocation21_spill] sm:$0xff] %v6456_v11  ;;  %v887_v22 = vadd.f32 %v6288_v60, %v886_v14 }
 0x1a3   : > { %v1377_v15 = vpop.f32.mrf.mxu2 }
 0x1a4   : > { %4994 = vmatmul.msk.bf16.gmra.mxu0 %vm696_vm1, %v5701_v12  ;;  %v1378_v27 = vadd.f32 %v1377_v15, %v6345_v18  ;;  %v998_v35 = vmax.f32 %v887_v22, 0.0 }
 0x1a5   : > { %v1210_v19 = vpop.f32.mrf.mxu1 }
 0x1a6   : > { %v1211_v20 = vadd.f32 %v1210_v19, %v6334_v9  ;;  %v1531_v44 = vmax.f32 %v1378_v27, 0.0 }
 0x1a8   : > { %v1532_v23 = vmax.f32 %v1211_v20, 0.0 }
 0x1a9   : > { %v888_v26 = vpop.f32.mrf.mxu0 }
 0x1aa   : > { %v6464_v28 = vpack.c.bf16 %v1532_v23, %v1530_v21  ;;  %v889_v29 = vadd.f32 %v6288_v60, %v888_v26 }
 0x1ab   : > { %v1379_v33 = vpop.f32.mrf.mxu2 }
 0x1ac   : > { %8662 = vst [vmem:[#allocation22_spill] sm:$0xff] %v6464_v28  ;;  %v999_v36 = vmax.f32 %v889_v29, 0.0  ;;  %v1380_v39 = vadd.f32 %v1379_v33, %v6345_v18 }
 0x1ad   : > { %v1213_v42 = vpop.f32.mrf.mxu1 }
 0x1ae   : > { %v1533_v45 = vmax.f32 %v1380_v39, 0.0  ;;  %v1046_v46 = vpack.c.bf16 %v999_v36, %v998_v35  ;;  %v1214_v54 = vadd.f32 %v1213_v42, %v6334_v9  ;;  %v5260_v35 = vld [vmem:[%s8509_s5 + $0x180] sm:$0xf]  ;;  %v5775_v36 = vld [vmem:[%s8509_s5 + $0x18c] sm:$0xf0] }
 0x1af   : > { %v5261_v40 = vor.u32 %v5775_v36, %v5260_v35  ;;  %v5741_v36 = vld [vmem:[%s8509_s5 + $0x84] sm:$0xf] }
 0x1b0   : > { %v6480_v49 = vpack.c.bf16 %v1533_v45, %v1531_v44  ;;  %1252 = vmatmul.bf16.gmra.mxu1 %v1046_v46  ;;  %1421 = vmatmul.bf16.gmra.mxu2 %v1046_v46  ;;  %v1534_v57 = vmax.f32 %v1214_v54, 0.0 }
 0x1b1   : > { %v891_v52 = vpop.f32.mrf.mxu0  ;;  %2260 = vmatpush.bf16.msrb.mxu0 %v5261_v40 }
 0x1b2   : > { %8663 = vst [vmem:[#allocation23_spill] sm:$0xff] %v6480_v49  ;;  %v892_v58 = vadd.f32 %v6288_v60, %v891_v52 }
 0x1b3   : > { %v1382_v53 = vpop.f32.mrf.mxu2 }
 0x1b4   : > { %4995 = vmatmul.msk.bf16.gmra.mxu0 %vm696_vm1, %v5702_v51  ;;  %v1383_v63 = vadd.f32 %v1382_v53, %v6345_v18  ;;  %v1000_v4 = vmax.f32 %v892_v58, 0.0  ;;  %v5704_v53 = vld [vmem:[%s6166_s16 + $0xd8] sm:$0xff] }
 0x1b5   : > { %v1215_v55 = vpop.f32.mrf.mxu1 }
 0x1b6   : > { %v1216_v56 = vadd.f32 %v1215_v55, %v6334_v9  ;;  %v1535_v10 = vmax.f32 %v1383_v63, 0.0 }
 0x1b8   : > { %v1536_v59 = vmax.f32 %v1216_v56, 0.0 }
 0x1b9   : > { %v893_v61 = vpop.f32.mrf.mxu0 }
 0x1ba   : > { %v6488_v1 = vpack.c.bf16 %v1536_v59, %v1534_v57  ;;  %v894_v2 = vadd.f32 %v6288_v60, %v893_v61 }
 0x1bb   : > { %v1384_v3 = vpop.f32.mrf.mxu2 }
 0x1bc   : > { %v1001_v6 = vmax.f32 %v894_v2, 0.0  ;;  %v1385_v7 = vadd.f32 %v1384_v3, %v6345_v18 }
 0x1bd   : > { %v1218_v8 = vpop.f32.mrf.mxu1 }
 0x1be   : > { %v1537_v12 = vmax.f32 %v1385_v7, 0.0  ;;  %v1047_v14 = vpack.c.bf16 %v1001_v6, %v1000_v4  ;;  %v1219_v21 = vadd.f32 %v1218_v8, %v6334_v9 }
 0x1c0   : > { %v6492_v15 = vpack.c.bf16 %v1537_v12, %v1535_v10  ;;  %1257 = vmatmul.bf16.gmra.mxu1 %v1047_v14  ;;  %1426 = vmatmul.bf16.gmra.mxu2 %v1047_v14  ;;  %v1538_v26 = vmax.f32 %v1219_v21, 0.0 }
 0x1c1   : > { %v896_v19 = vpop.f32.mrf.mxu0 }
 0x1c2   : > { %8664 = vst [vmem:[#allocation24_spill] sm:$0xff] %v6492_v15  ;;  %v897_v27 = vadd.f32 %v6288_v60, %v896_v19 }
 0x1c3   : > { %v1387_v20 = vpop.f32.mrf.mxu2 }
 0x1c4   : > { %4996 = vmatmul.msk.bf16.gmra.mxu0 %vm696_vm1, %v5703_v16  ;;  %v1388_v31 = vadd.f32 %v1387_v20, %v6345_v18  ;;  %v1002_v41 = vmax.f32 %v897_v27, 0.0 }
 0x1c5   : > { %v1220_v22 = vpop.f32.mrf.mxu1 }
 0x1c6   : > { %v1221_v23 = vadd.f32 %v1220_v22, %v6334_v9  ;;  %v1539_v45 = vmax.f32 %v1388_v31, 0.0  ;;  %v5705_v22 = vld [vmem:[%s6166_s16 + $0xe0] sm:$0xff] }
 0x1c8   : > { %v1540_v29 = vmax.f32 %v1221_v23, 0.0  ;;  %v5773_v23 = vld [vmem:[%s8509_s5 + $0x184] sm:$0xf] }
 0x1c9   : > { %v898_v30 = vpop.f32.mrf.mxu0 }
 0x1ca   : > { %v6500_v33 = vpack.c.bf16 %v1540_v29, %v1538_v26  ;;  %v899_v34 = vadd.f32 %v6288_v60, %v898_v30  ;;  %v5262_v26 = vld [vmem:[%s8509_s5 + $0x190] sm:$0xf0] }
 0x1cb   : > { %v1389_v39 = vpop.f32.mrf.mxu2  ;;  %v5265_v29 = vor.u32 %v5773_v23, %v5262_v26 }
 0x1cc   : > { %8665 = vst [vmem:[#allocation25_spill] sm:$0xff] %v6500_v33  ;;  %v1003_v42 = vmax.f32 %v899_v34, 0.0  ;;  %v1390_v43 = vadd.f32 %v1389_v39, %v6345_v18  ;;  %v5134_v39 = vld [vmem:[%s8509_s5 + $0x90] sm:$0xf0] }
 0x1cd   : > { %v1223_v44 = vpop.f32.mrf.mxu1  ;;  %2598 = vmatpush.bf16.msrb.mxu2 %v5265_v29  ;;  %v5137_v40 = vor.u32 %v5741_v36, %v5134_v39  ;;  %v5763_v36 = vld [vmem:[%s8509_s5 + $0x12c] sm:$0xf0] }
 0x1ce   : > { %v1541_v46 = vmax.f32 %v1390_v43, 0.0  ;;  %v1048_v51 = vpack.c.bf16 %v1003_v42, %v1002_v41  ;;  %v1224_v56 = vadd.f32 %v1223_v44, %v6334_v9 }
 0x1cf   : > { %2429 = vmatpush.bf16.msrb.mxu1 %v5137_v40 }
 0x1d0   : > { %v6510_v52 = vpack.c.bf16 %v1541_v46, %v1539_v45  ;;  %1262 = vmatmul.bf16.gmra.mxu1 %v1048_v51  ;;  %1431 = vmatmul.bf16.gmra.mxu2 %v1048_v51  ;;  %v1542_v59 = vmax.f32 %v1224_v56, 0.0 }
 0x1d1   : > { %v901_v54 = vpop.f32.mrf.mxu0 }
 0x1d2   : > { %8666 = vst [vmem:[#allocation26_spill] sm:$0xff] %v6510_v52  ;;  %v902_v61 = vadd.f32 %v6288_v60, %v901_v54 }
 0x1d3   : > { %v1392_v55 = vpop.f32.mrf.mxu2 }
 0x1d4   : > { %4997 = vmatmul.msk.bf16.gmra.mxu0 %vm696_vm1, %v5704_v53  ;;  %v1393_v3 = vadd.f32 %v1392_v55, %v6345_v18  ;;  %v1004_v8 = vmax.f32 %v902_v61, 0.0 }
 0x1d5   : > { %v1225_v57 = vpop.f32.mrf.mxu1 }
 0x1d6   : > { %v1226_v58 = vadd.f32 %v1225_v57, %v6334_v9  ;;  %v1543_v16 = vmax.f32 %v1393_v3, 0.0 }
 0x1d8   : > { %v1544_v63 = vmax.f32 %v1226_v58, 0.0 }
 0x1d9   : > { %v903_v2 = vpop.f32.mrf.mxu0 }
 0x1da   : > { %v6518_v4 = vpack.c.bf16 %v1544_v63, %v1542_v59  ;;  %v904_v6 = vadd.f32 %v6288_v60, %v903_v2  ;;  %v5706_v2 = vld [vmem:[%s6166_s16 + $0xe8] sm:$0xff] }
 0x1db   : > { %v1394_v7 = vpop.f32.mrf.mxu2 }
 0x1dc   : > { %v1005_v10 = vmax.f32 %v904_v6, 0.0  ;;  %v1395_v12 = vadd.f32 %v1394_v7, %v6345_v18  ;;  %v5244_v6 = vld [vmem:[%s8509_s5 + $0x160] sm:$0xf]  ;;  %v5771_v7 = vld [vmem:[%s8509_s5 + $0x16c] sm:$0xf0] }
 0x1dd   : > { %v1228_v14 = vpop.f32.mrf.mxu1 }
 0x1de   : > { %v1545_v19 = vmax.f32 %v1395_v12, 0.0  ;;  %v1049_v20 = vpack.c.bf16 %v1005_v10, %v1004_v8  ;;  %v1229_v31 = vadd.f32 %v1228_v14, %v6334_v9  ;;  %v5245_v10 = vor.u32 %v5771_v7, %v5244_v6 }
 0x1e0   : > { %v6522_v21 = vpack.c.bf16 %v1545_v19, %v1543_v16  ;;  %1267 = vmatmul.bf16.gmra.mxu1 %v1049_v20  ;;  %1436 = vmatmul.bf16.gmra.mxu2 %v1049_v20  ;;  %v1546_v41 = vmax.f32 %v1229_v31, 0.0  ;;  %v5228_v19 = vld [vmem:[%s8509_s5 + $0x140] sm:$0xf]  ;;  %v5767_v20 = vld [vmem:[%s8509_s5 + $0x14c] sm:$0xf0] }
 0x1e1   : > { %v906_v27 = vpop.f32.mrf.mxu0  ;;  %2261 = vmatpush.bf16.msrb.mxu0 %v5245_v10 }
 0x1e2   : > { %8667 = vst [vmem:[#allocation27_spill] sm:$0xff] %v6522_v21  ;;  %v907_v42 = vadd.f32 %v6288_v60, %v906_v27 }
 0x1e3   : > { %v1397_v30 = vpop.f32.mrf.mxu2 }
 0x1e4   : > { %4998 = vmatmul.msk.bf16.gmra.mxu0 %vm696_vm1, %v5705_v22  ;;  %v1398_v45 = vadd.f32 %v1397_v30, %v6345_v18  ;;  %v1006_v54 = vmax.f32 %v907_v42, 0.0  ;;  %v5229_v22 = vor.u32 %v5767_v20, %v5228_v19 }
 0x1e5   : > { %v1230_v34 = vpop.f32.mrf.mxu1 }
 0x1e6   : > { %v1231_v35 = vadd.f32 %v1230_v34, %v6334_v9  ;;  %v1547_v58 = vmax.f32 %v1398_v45, 0.0  ;;  %2262 = vmatpush.bf16.msrb.mxu0 %v5229_v22 }
 0x1e8   : > { %v1548_v43 = vmax.f32 %v1231_v35, 0.0  ;;  %v5212_v35 = vld [vmem:[%s8509_s5 + $0x120] sm:$0xf] }
 0x1e9   : > { %v908_v44 = vpop.f32.mrf.mxu0  ;;  %v5213_v40 = vor.u32 %v5763_v36, %v5212_v35  ;;  %v5708_v36 = vld [vmem:[%s6166_s16 + $0xf8] sm:$0xff] }
 0x1ea   : > { %v6542_v46 = vpack.c.bf16 %v1548_v43, %v1546_v41  ;;  %v909_v51 = vadd.f32 %v6288_v60, %v908_v44 }
 0x1eb   : > { %v1399_v53 = vpop.f32.mrf.mxu2  ;;  %2263 = vmatpush.bf16.msrb.mxu0 %v5213_v40 }
 0x1ec   : > { %8668 = vst [vmem:[#allocation28_spill] sm:$0xff] %v6542_v46  ;;  %v1007_v55 = vmax.f32 %v909_v51, 0.0  ;;  %v1400_v56 = vadd.f32 %v1399_v53, %v6345_v18 }
 0x1ed   : > { %v1233_v57 = vpop.f32.mrf.mxu1 }
 0x1ee   : > { %v1549_v59 = vmax.f32 %v1400_v56, 0.0  ;;  %v1050_v61 = vpack.c.bf16 %v1007_v55, %v1006_v54  ;;  %v1234_v12 = vadd.f32 %v1233_v57, %v6334_v9  ;;  %v5196_v54 = vld [vmem:[%s8509_s5 + $0x100] sm:$0xf]  ;;  %v5759_v55 = vld [vmem:[%s8509_s5 + $0x10c] sm:$0xf0] }
 0x1ef   : > { %v5197_v56 = vor.u32 %v5759_v55, %v5196_v54 }
 0x1f0   : > { %v6546_v63 = vpack.c.bf16 %v1549_v59, %v1547_v58  ;;  %1272 = vmatmul.bf16.gmra.mxu1 %v1050_v61  ;;  %1441 = vmatmul.bf16.gmra.mxu2 %v1050_v61  ;;  %v1550_v23 = vmax.f32 %v1234_v12, 0.0  ;;  %v5707_v58 = vld [vmem:[%s6166_s16 + $0xf0] sm:$0xff]  ;;  %s5972_s16 = scalar_lea.hbm %s8517_s13, 2 }
 0x1f1   : > { %v911_v3 = vpop.f32.mrf.mxu0  ;;  %2264 = vmatpush.bf16.msrb.mxu0 %v5197_v56 }
 0x1f2   : > { %8669 = vst [vmem:[#allocation29_spill] sm:$0xff] %v6546_v63  ;;  %v912_v26 = vadd.f32 %v6288_v60, %v911_v3 }
 0x1f3   : > { %v1402_v8 = vpop.f32.mrf.mxu2 }
 0x1f4   : > { %4999 = vmatmul.msk.bf16.gmra.mxu0 %vm696_vm1, %v5706_v2  ;;  %v1403_v30 = vadd.f32 %v1402_v8, %v6345_v18  ;;  %v1008_v41 = vmax.f32 %v912_v26, 0.0 }
 0x1f5   : > { %v1235_v14 = vpop.f32.mrf.mxu1 }
 0x1f6   : > { %v1236_v16 = vadd.f32 %v1235_v14, %v6334_v9  ;;  %v1551_v45 = vmax.f32 %v1403_v30, 0.0 }
 0x1f8   : > { %v1552_v27 = vmax.f32 %v1236_v16, 0.0 }
 0x1f9   : > { %v913_v29 = vpop.f32.mrf.mxu0 }
 0x1fa   : > { %v6566_v31 = vpack.c.bf16 %v1552_v27, %v1550_v23  ;;  %v914_v34 = vadd.f32 %v6288_v60, %v913_v29 }
 0x1fb   : > { %v1404_v39 = vpop.f32.mrf.mxu2 }
 0x1fc   : > { %8670 = vst [vmem:[#allocation30_spill] sm:$0xff] %v6566_v31  ;;  %v1009_v42 = vmax.f32 %v914_v34, 0.0  ;;  %v1405_v43 = vadd.f32 %v1404_v39, %v6345_v18 }
 0x1fd   : > { %v1238_v44 = vpop.f32.mrf.mxu1 }
 0x1fe   : > { %v1553_v51 = vmax.f32 %v1405_v43, 0.0  ;;  %v1051_v53 = vpack.c.bf16 %v1009_v42, %v1008_v41  ;;  %v1239_v2 = vadd.f32 %v1238_v44, %v6334_v9  ;;  %v6603_v44 = vld [vmem:[%s8647_s2] ss:$0 sm:$0xff]  ;;  %s5968_s2 = scalar_lea.hbm %s5967_s24, 1 }
 0x1ff   : > { %p5969_p12 = scmp.ne.s32.totalorder %s5967_s24, %s5968_s2  ;;  %p5974_p2 = scmp.lt.s32.totalorder %s5972_s16, %s5968_s2 }
 0x200   : > { %v6582_v57 = vpack.c.bf16 %v1553_v51, %v1551_v45  ;;  %1277 = vmatmul.bf16.gmra.mxu1 %v1051_v53  ;;  %1446 = vmatmul.bf16.gmra.mxu2 %v1051_v53  ;;  %v1554_v7 = vmax.f32 %v1239_v2, 0.0 }
 0x201   : > { %v916_v59 = vpop.f32.mrf.mxu0  ;;  %p5970_p13 = pnand %p5969_p12, %p6143_p4  ;;  %p5975_p3 = por %p5974_p2, %p5973_p1 }
 0x202   : > { %8671 = vst [vmem:[#allocation31_spill] sm:$0xff] %v6582_v57  ;;  %v917_v8 = vadd.f32 %v6288_v60, %v916_v59 }
 0x203   : > { %v1407_v61 = vpop.f32.mrf.mxu2  ;;  %p5971_p0 = pneg %p5970_p13 }
 0x204   : > { %5000 = vmatmul.msk.bf16.gmra.mxu0 %vm696_vm1, %v5707_v58  ;;  %v1408_v14 = vadd.f32 %v1407_v61, %v6345_v18  ;;  %v1010_v22 = vmax.f32 %v917_v8, 0.0 }
 0x205   : > { %v1240_v3 = vpop.f32.mrf.mxu1  ;;  %p5976_p5 = pnand %p5975_p3, %p5971_p0 }
 0x206   : > { %v1241_v6 = vadd.f32 %v1240_v3, %v6334_v9  ;;  %v1555_v29 = vmax.f32 %v1408_v14, 0.0  ;;  %v5769_v3 = vld [vmem:[%s8509_s5 + $0x164] sm:$0xf] }
 0x208   : > { %v1556_v10 = vmax.f32 %v1241_v6, 0.0  ;;  %v5246_v6 = vld [vmem:[%s8509_s5 + $0x170] sm:$0xf0] }
 0x209   : > { %v918_v12 = vpop.f32.mrf.mxu0  ;;  %v5249_v8 = vor.u32 %v5769_v3, %v5246_v6 }
 0x20a   : > { %v6590_v16 = vpack.c.bf16 %v1556_v10, %v1554_v7  ;;  %v919_v19 = vadd.f32 %v6288_v60, %v918_v12 }
 0x20b   : > { %v1409_v20 = vpop.f32.mrf.mxu2  ;;  %2599 = vmatpush.bf16.msrb.mxu2 %v5249_v8 }
 0x20c   : > { %8672 = vst [vmem:[#allocation32_spill] sm:$0xff] %v6590_v16  ;;  %v1011_v23 = vmax.f32 %v919_v19, 0.0  ;;  %v1410_v26 = vadd.f32 %v1409_v20, %v6345_v18  ;;  %v5737_v20 = vld [vmem:[%s8509_s5 + $0x64] sm:$0xf] }
 0x20d   : > { %v1243_v27 = vpop.f32.mrf.mxu1 }
 0x20e   : > { %v1557_v30 = vmax.f32 %v1410_v26, 0.0  ;;  %v1052_v34 = vpack.c.bf16 %v1011_v23, %v1010_v22  ;;  %v1244_v41 = vadd.f32 %v1243_v27, %v6334_v9  ;;  %v5118_v22 = vld [vmem:[%s8509_s5 + $0x70] sm:$0xf0] }
 0x20f   : > { %v5121_v26 = vor.u32 %v5737_v20, %v5118_v22 }
 0x210   : > { %v6594_v35 = vpack.c.bf16 %v1557_v30, %v1555_v29  ;;  %1282 = vmatmul.bf16.gmra.mxu1 %v1052_v34  ;;  %1451 = vmatmul.bf16.gmra.mxu2 %v1052_v34  ;;  %v1558_v43 = vmax.f32 %v1244_v41, 0.0 }
 0x211   : > { %v921_v39 = vpop.f32.mrf.mxu0  ;;  %2430 = vmatpush.bf16.msrb.mxu1 %v5121_v26 }
 0x212   : > { %8673 = vst [vmem:[#allocation33_spill] sm:$0xff] %v6594_v35  ;;  %v922_v45 = vadd.f32 %v6603_v44, %v921_v39 }
 0x213   : > { %v1412_v40 = vpop.f32.mrf.mxu2 }
 0x214   : > { %5001 = vmatmul.msk.bf16.gmra.mxu0 %vm696_vm1, %v5708_v36  ;;  %v1413_v54 = vadd.f32 %v1412_v40, %v6345_v18  ;;  %v1012_v59 = vmax.f32 %v922_v45, 0.0 }
 0x215   : > { %v1245_v60 = vpop.f32.mrf.mxu1 }
 0x216   : > { %v1246_v42 = vadd.f32 %v1245_v60, %v6334_v9  ;;  %v1559_v10 = vmax.f32 %v1413_v54, 0.0 }
 0x218   : > { %v1560_v51 = vmax.f32 %v1246_v42, 0.0 }
 0x219   : > { %v923_v53 = vpop.f32.mrf.mxu0 }
 0x21a   : > { %v6607_v55 = vpack.c.bf16 %v1560_v51, %v1558_v43  ;;  %v924_v56 = vadd.f32 %v6603_v44, %v923_v53 }
 0x21b   : > { %v1414_v58 = vpop.f32.mrf.mxu2 }
 0x21c   : > { %8674 = vst [vmem:[#allocation34_spill] sm:$0xff] %v6607_v55  ;;  %v1013_v61 = vmax.f32 %v924_v56, 0.0  ;;  %v1415_v2 = vadd.f32 %v1414_v58, %v6345_v18 }
 0x21d   : > { %v1248_v7 = vpop.f32.mrf.mxu1 }
 0x21e   : > { %v1561_v12 = vmax.f32 %v1415_v2, 0.0  ;;  %v1053_v14 = vpack.c.bf16 %v1013_v61, %v1012_v59  ;;  %v1249_v29 = vadd.f32 %v1248_v7, %v6334_v9 }
 0x220   : > { %v6617_v19 = vpack.c.bf16 %v1561_v12, %v1559_v10  ;;  %1287 = vmatmul.bf16.gmra.mxu1 %v1053_v14  ;;  %1456 = vmatmul.bf16.gmra.mxu2 %v1053_v14  ;;  %v1562_v36 = vmax.f32 %v1249_v29, 0.0 }
 0x221   : > { %v926_v23 = vpop.f32.mrf.mxu0 }
 0x222   : > { %v927_v39 = vadd.f32 %v6603_v44, %v926_v23 }
 0x223   : > { %v1417_v27 = vpop.f32.mrf.mxu2 }
 0x224   : > { %2265 = vmatmul.bf16.vlgmr.msrb.gmra.mxu0 %v6360_v38  ;;  %v1418_v60 = vadd.f32 %v1417_v27, %v6345_v18  ;;  %v1014_v51 = vmax.f32 %v927_v39, 0.0 }
 0x225   : > { %v1250_v30 = vpop.f32.mrf.mxu1 }
 0x226   : > { %v1251_v34 = vadd.f32 %v1250_v30, %v6334_v9  ;;  %v1563_v58 = vmax.f32 %v1418_v60, 0.0 }
 0x228   : > { %v1564_v40 = vmax.f32 %v1251_v34, 0.0 }
 0x229   : > { %v928_v41 = vpop.f32.mrf.mxu0 }
 0x22a   : > { %v6630_v42 = vpack.c.bf16 %v1564_v40, %v1562_v36  ;;  %v929_v43 = vadd.f32 %v6603_v44, %v928_v41 }
 0x22b   : > { %v1419_v45 = vpop.f32.mrf.mxu2 }
 0x22c   : > { %8675 = vst [vmem:[#allocation35_spill] sm:$0xff] %v6630_v42  ;;  %v1015_v53 = vmax.f32 %v929_v43, 0.0  ;;  %v1420_v54 = vadd.f32 %v1419_v45, %v6345_v18 }
 0x22d   : > { %v1253_v56 = vpop.f32.mrf.mxu1 }
 0x22e   : > { %v1565_v59 = vmax.f32 %v1420_v54, 0.0  ;;  %v1054_v61 = vpack.c.bf16 %v1015_v53, %v1014_v51  ;;  %v1254_v7 = vadd.f32 %v1253_v56, %v6334_v9 }
 0x230   : > { %v6634_v2 = vpack.c.bf16 %v1565_v59, %v1563_v58  ;;  %1292 = vmatmul.bf16.gmra.mxu1 %v1054_v61  ;;  %1461 = vmatmul.bf16.gmra.mxu2 %v1054_v61  ;;  %v1566_v12 = vmax.f32 %v1254_v7, 0.0 }
 0x231   : > { %v931_v3 = vpop.f32.mrf.mxu0 }
 0x232   : > { %8676 = vst [vmem:[#allocation36_spill] sm:$0xff] %v6634_v2  ;;  %v932_v14 = vadd.f32 %v6603_v44, %v931_v3 }
 0x233   : > { %v1422_v6 = vpop.f32.mrf.mxu2 }
 0x234   : > { %2270 = vmatmul.bf16.gmra.mxu0 %v6378_v0  ;;  %v1423_v23 = vadd.f32 %v1422_v6, %v6345_v18  ;;  %v1016_v30 = vmax.f32 %v932_v14, 0.0 }
 0x235   : > { %v1255_v8 = vpop.f32.mrf.mxu1 }
 0x236   : > { %v1256_v10 = vadd.f32 %v1255_v8, %v6334_v9  ;;  %v1567_v40 = vmax.f32 %v1423_v23, 0.0 }
 0x238   : > { %v1568_v20 = vmax.f32 %v1256_v10, 0.0 }
 0x239   : > { %v933_v22 = vpop.f32.mrf.mxu0 }
 0x23a   : > { %v6641_v26 = vpack.c.bf16 %v1568_v20, %v1566_v12  ;;  %v934_v27 = vadd.f32 %v6603_v44, %v933_v22 }
 0x23b   : > { %v1424_v29 = vpop.f32.mrf.mxu2 }
 0x23c   : > { %8677 = vst [vmem:[#allocation37_spill] sm:$0xff] %v6641_v26  ;;  %v1017_v34 = vmax.f32 %v934_v27, 0.0  ;;  %v1425_v36 = vadd.f32 %v1424_v29, %v6345_v18 }
 0x23d   : > { %v1258_v39 = vpop.f32.mrf.mxu1 }
 0x23e   : > { %v1569_v41 = vmax.f32 %v1425_v36, 0.0  ;;  %v1055_v60 = vpack.c.bf16 %v1017_v34, %v1016_v30  ;;  %v1259_v53 = vadd.f32 %v1258_v39, %v6334_v9  ;;  %v5765_v36 = vld [vmem:[%s8509_s5 + $0x144] sm:$0xf]  ;;  %v5230_v39 = vld [vmem:[%s8509_s5 + $0x150] sm:$0xf0] }
 0x240   : > { %v6645_v43 = vpack.c.bf16 %v1569_v41, %v1567_v40  ;;  %1297 = vmatmul.bf16.gmra.mxu1 %v1055_v60  ;;  %1466 = vmatmul.bf16.gmra.mxu2 %v1055_v60  ;;  %v1570_v58 = vmax.f32 %v1259_v53, 0.0  ;;  %v5733_v40 = vld [vmem:[%s8509_s5 + $0x44] sm:$0xf]  ;;  %v5233_v60 = vor.u32 %v5765_v36, %v5230_v39  ;;  %v5070_v36 = vld [vmem:[%s8509_s5 + $0x10] sm:$0xf0] }
 0x241   : > { %v936_v45 = vpop.f32.mrf.mxu0 }
 0x242   : > { %8678 = vst [vmem:[#allocation38_spill] sm:$0xff] %v6645_v43  ;;  %v937_v59 = vadd.f32 %v6603_v44, %v936_v45  ;;  %v5102_v45 = vld [vmem:[%s8509_s5 + $0x50] sm:$0xf0]  ;;  %2600 = vmatpush.bf16.msrb.mxu2 %v5233_v60 }
 0x243   : > { %v1427_v51 = vpop.f32.mrf.mxu2  ;;  %v5105_v53 = vor.u32 %v5733_v40, %v5102_v45 }
 0x244   : > { %2275 = vmatmul.bf16.gmra.mxu0 %v6390_v24  ;;  %v1428_v6 = vadd.f32 %v1427_v51, %v6345_v18  ;;  %v1018_v12 = vmax.f32 %v937_v59, 0.0  ;;  %v5086_v59 = vld [vmem:[%s8509_s5 + $0x30] sm:$0xf0] }
 0x245   : > { %v1260_v54 = vpop.f32.mrf.mxu1  ;;  %2431 = vmatpush.bf16.msrb.mxu1 %v5105_v53 }
 0x246   : > { %v1261_v56 = vadd.f32 %v1260_v54, %v6334_v9  ;;  %v1571_v23 = vmax.f32 %v1428_v6, 0.0  ;;  %v5214_v6 = vld [vmem:[%s8509_s5 + $0x130] sm:$0xf0] }
 0x248   : > { %v1572_v61 = vmax.f32 %v1261_v56, 0.0 }
 0x249   : > { %v938_v3 = vpop.f32.mrf.mxu0 }
 0x24a   : > { %v6652_v7 = vpack.c.bf16 %v1572_v61, %v1570_v58  ;;  %v939_v8 = vadd.f32 %v6603_v44, %v938_v3  ;;  %v5729_v58 = vld [vmem:[%s8509_s5 + $0x24] sm:$0xf] }
 0x24b   : > { %v1429_v10 = vpop.f32.mrf.mxu2  ;;  %v5089_v61 = vor.u32 %v5729_v58, %v5086_v59  ;;  %v5761_v3 = vld [vmem:[%s8509_s5 + $0x124] sm:$0xf] }
 0x24c   : > { %v1019_v14 = vmax.f32 %v939_v8, 0.0  ;;  %v1430_v20 = vadd.f32 %v1429_v10, %v6345_v18 }
 0x24d   : > { %v1263_v22 = vpop.f32.mrf.mxu1  ;;  %2432 = vmatpush.bf16.msrb.mxu1 %v5089_v61 }
 0x24e   : > { %v1573_v27 = vmax.f32 %v1430_v20, 0.0  ;;  %v1056_v29 = vpack.c.bf16 %v1019_v14, %v1018_v12  ;;  %v1264_v51 = vadd.f32 %v1263_v22, %v6334_v9  ;;  %v5217_v14 = vor.u32 %v5761_v3, %v5214_v6 }
 0x250   : > { %v6656_v30 = vpack.c.bf16 %v1573_v27, %v1571_v23  ;;  %1302 = vmatmul.bf16.gmra.mxu1 %v1056_v29  ;;  %1471 = vmatmul.bf16.gmra.mxu2 %v1056_v29  ;;  %v1574_v8 = vmax.f32 %v1264_v51, 0.0  ;;  %v5725_v29 = vld [vmem:[%s8509_s5 + $0x4] sm:$0xf] }
 0x251   : > { %v941_v34 = vpop.f32.mrf.mxu0  ;;  %2601 = vmatpush.bf16.msrb.mxu2 %v5217_v14  ;;  %v5073_v40 = vor.u32 %v5725_v29, %v5070_v36 }
 0x252   : > { %8679 = vst [vmem:[#allocation39_spill] sm:$0xff] %v6656_v30  ;;  %v942_v10 = vadd.f32 %v6603_v44, %v941_v34  ;;  %v5757_v34 = vld [vmem:[%s8509_s5 + $0x104] sm:$0xf] }
 0x253   : > { %v1432_v41 = vpop.f32.mrf.mxu2  ;;  %2433 = vmatpush.bf16.msrb.mxu1 %v5073_v40 }
 0x254   : > { %2280 = vmatmul.bf16.gmra.mxu0 %v6402_v48  ;;  %v1433_v22 = vadd.f32 %v1432_v41, %v6345_v18  ;;  %v5198_v41 = vld [vmem:[%s8509_s5 + $0x110] sm:$0xf0]  ;;  %v1020_v60 = vmax.f32 %v942_v10, 0.0 }
 0x255   : > { %v1265_v54 = vpop.f32.mrf.mxu1  ;;  %v5201_v53 = vor.u32 %v5757_v34, %v5198_v41 }
 0x256   : > { %v1266_v56 = vadd.f32 %v1265_v54, %v6334_v9 }
 0x257   : > { %2602 = vmatpush.bf16.msrb.mxu2 %v5201_v53 }
 0x258   : > { %v1576_v12 = vmax.f32 %v1266_v56, 0.0  ;;  %v1575_v56 = vmax.f32 %v1433_v22, 0.0 }
 0x259   : > { %v943_v20 = vpop.f32.mrf.mxu0 }
 0x25a   : > { %v6687_v23 = vpack.c.bf16 %v1576_v12, %v1574_v8  ;;  %v944_v27 = vadd.f32 %v6603_v44, %v943_v20 }
 0x25b   : > { %v1434_v39 = vpop.f32.mrf.mxu2 }
 0x25c   : > { %8680 = vst [vmem:[#allocation40_spill] sm:$0xff] %v6687_v23  ;;  %v1021_v45 = vmax.f32 %v944_v27, 0.0  ;;  %v1435_v51 = vadd.f32 %v1434_v39, %v6345_v18 }
 0x25d   : > { %v1268_v54 = vpop.f32.mrf.mxu1 }
 0x25e   : > { %v1577_v58 = vmax.f32 %v1435_v51, 0.0  ;;  %v1057_v59 = vpack.c.bf16 %v1021_v45, %v1020_v60  ;;  %v1269_v8 = vadd.f32 %v1268_v54, %v6334_v9 }
 0x260   : > { %v6703_v61 = vpack.c.bf16 %v1577_v58, %v1575_v56  ;;  %1307 = vmatmul.bf16.gmra.mxu1 %v1057_v59  ;;  %1476 = vmatmul.bf16.gmra.mxu2 %v1057_v59  ;;  %v1578_v14 = vmax.f32 %v1269_v8, 0.0 }
 0x261   : > { %v946_v3 = vpop.f32.mrf.mxu0 }
 0x262   : > { %8681 = vst [vmem:[#allocation41_spill] sm:$0xff] %v6703_v61  ;;  %v947_v20 = vadd.f32 %v6603_v44, %v946_v3 }
 0x263   : > { %v1437_v6 = vpop.f32.mrf.mxu2 }
 0x264   : > { %2285 = vmatmul.bf16.gmra.mxu0 %v6426_v17  ;;  %v1438_v29 = vadd.f32 %v1437_v6, %v6345_v18  ;;  %v1022_v40 = vmax.f32 %v947_v20, 0.0 }
 0x265   : > { %v1270_v10 = vpop.f32.mrf.mxu1 }
 0x266   : > { %v1271_v12 = vadd.f32 %v1270_v10, %v6334_v9  ;;  %v1579_v51 = vmax.f32 %v1438_v29, 0.0 }
 0x268   : > { %v1580_v22 = vmax.f32 %v1271_v12, 0.0 }
 0x269   : > { %v948_v27 = vpop.f32.mrf.mxu0 }
 0x26a   : > { %v6710_v36 = vpack.c.bf16 %v1580_v22, %v1578_v14  ;;  %v949_v34 = vadd.f32 %v6603_v44, %v948_v27 }
 0x26b   : > { %v1439_v39 = vpop.f32.mrf.mxu2 }
 0x26c   : > { %8682 = vst [vmem:[#allocation42_spill] sm:$0xff] %v6710_v36  ;;  %v1023_v41 = vmax.f32 %v949_v34, 0.0  ;;  %v1440_v60 = vadd.f32 %v1439_v39, %v6345_v18 }
 0x26d   : > { %v1273_v45 = vpop.f32.mrf.mxu1 }
 0x26e   : > { %v1581_v53 = vmax.f32 %v1440_v60, 0.0  ;;  %v1058_v54 = vpack.c.bf16 %v1023_v41, %v1022_v40  ;;  %v1274_v3 = vadd.f32 %v1273_v45, %v6334_v9 }
 0x270   : > { %v6714_v56 = vpack.c.bf16 %v1581_v53, %v1579_v51  ;;  %1312 = vmatmul.bf16.gmra.mxu1 %v1058_v54  ;;  %1481 = vmatmul.bf16.gmra.mxu2 %v1058_v54  ;;  %v1582_v10 = vmax.f32 %v1274_v3, 0.0 }
 0x271   : > { %v951_v58 = vpop.f32.mrf.mxu0 }
 0x272   : > { %8683 = vst [vmem:[#allocation43_spill] sm:$0xff] %v6714_v56  ;;  %v952_v12 = vadd.f32 %v6603_v44, %v951_v58 }
 0x273   : > { %v1442_v59 = vpop.f32.mrf.mxu2 }
 0x274   : > { %2290 = vmatmul.bf16.gmra.mxu0 %v6444_v47  ;;  %v1443_v22 = vadd.f32 %v1442_v59, %v6345_v18  ;;  %v1024_v39 = vmax.f32 %v952_v12, 0.0 }
 0x275   : > { %v1275_v6 = vpop.f32.mrf.mxu1 }
 0x276   : > { %v1276_v8 = vadd.f32 %v1275_v6, %v6334_v9  ;;  %v1583_v45 = vmax.f32 %v1443_v22, 0.0 }
 0x278   : > { %v1584_v14 = vmax.f32 %v1276_v8, 0.0 }
 0x279   : > { %v953_v20 = vpop.f32.mrf.mxu0 }
 0x27a   : > { %v6721_v27 = vpack.c.bf16 %v1584_v14, %v1582_v10  ;;  %v954_v29 = vadd.f32 %v6603_v44, %v953_v20 }
 0x27b   : > { %v1444_v34 = vpop.f32.mrf.mxu2 }
 0x27c   : > { %8684 = vst [vmem:[#allocation44_spill] sm:$0xff] %v6721_v27  ;;  %v1025_v40 = vmax.f32 %v954_v29, 0.0  ;;  %v1445_v41 = vadd.f32 %v1444_v34, %v6345_v18 }
 0x27d   : > { %v1278_v60 = vpop.f32.mrf.mxu1 }
 0x27e   : > { %v1585_v51 = vmax.f32 %v1445_v41, 0.0  ;;  %v6725_v53 = vpack.c.bf16 %v1025_v40, %v1024_v39  ;;  %v1279_v3 = vadd.f32 %v1278_v60, %v6334_v9 }
 0x280   : > { %v6727_v54 = vpack.c.bf16 %v1585_v51, %v1583_v45  ;;  %1317 = vmatmul.bf16.vlgmr.msra.gmra.mxu3 %v6725_v53  ;;  %2434 = vmatmul.bf16.vlgmr.msrb.gmra.mxu1 %v6350_v25  ;;  %v1586_v10 = vmax.f32 %v1279_v3, 0.0 }
 0x281   : > { %2603 = vmatmul.bf16.vlgmr.msrb.gmra.mxu2 %v6360_v38  ;;  %v956_v58 = vpop.f32.mrf.mxu0 }
 0x282   : > { %8685 = vst [vmem:[#allocation45_spill] sm:$0xff] %v6727_v54  ;;  %v957_v12 = vadd.f32 %v6603_v44, %v956_v58 }
 0x283   : > { %v1447_v59 = vpop.f32.mrf.mxu2 }
 0x284   : > { %2295 = vmatmul.bf16.gmra.mxu0 %v6456_v11  ;;  %v1448_v22 = vadd.f32 %v1447_v59, %v6345_v18  ;;  %v1026_v40 = vmax.f32 %v957_v12, 0.0 }
 0x285   : > { %v1280_v6 = vpop.f32.mrf.mxu1 }
 0x286   : > { %v1281_v8 = vadd.f32 %v1280_v6, %v6334_v9  ;;  %v1587_v51 = vmax.f32 %v1448_v22, 0.0 }
 0x288   : > { %v1588_v14 = vmax.f32 %v1281_v8, 0.0 }
 0x289   : > { %v958_v20 = vpop.f32.mrf.mxu0 }
 0x28a   : > { %v6737_v29 = vpack.c.bf16 %v1588_v14, %v1586_v10  ;;  %v959_v34 = vadd.f32 %v6603_v44, %v958_v20 }
 0x28b   : > { %v1449_v39 = vpop.f32.mrf.mxu2 }
 0x28c   : > { %8686 = vst [vmem:[#allocation46_spill] sm:$0xff] %v6737_v29  ;;  %v1027_v41 = vmax.f32 %v959_v34, 0.0  ;;  %v1450_v60 = vadd.f32 %v1449_v39, %v6345_v18 }
 0x28d   : > { %v1283_v45 = vpop.f32.mrf.mxu1 }
 0x28e   : > { %v1589_v38 = vmax.f32 %v1450_v60, 0.0  ;;  %v6741_v6 = vpack.c.bf16 %v1027_v41, %v1026_v40  ;;  %v1284_v8 = vadd.f32 %v1283_v45, %v6334_v9 }
 0x290   : > { %v6743_v3 = vpack.c.bf16 %v1589_v38, %v1587_v51  ;;  %1322 = vmatmul.bf16.gmra.mxu3 %v6741_v6  ;;  %2439 = vmatmul.bf16.gmra.mxu1 %v6368_v50  ;;  %v1590_v14 = vmax.f32 %v1284_v8, 0.0 }
 0x291   : > { %2608 = vmatmul.bf16.gmra.mxu2 %v6378_v0  ;;  %v961_v58 = vpop.f32.mrf.mxu0 }
 0x292   : > { %8687 = vst [vmem:[#allocation47_spill] sm:$0xff] %v6743_v3  ;;  %v962_v20 = vadd.f32 %v6603_v44, %v961_v58  ;;  %v5180_v58 = vld [vmem:[%s8509_s5 + $0xe0] sm:$0xf] }
 0x293   : > { %v1452_v59 = vpop.f32.mrf.mxu2 }
 0x294   : > { %2300 = vmatmul.bf16.gmra.mxu0 %v6480_v49  ;;  %v1453_v34 = vadd.f32 %v1452_v59, %v6345_v18  ;;  %v1028_v60 = vmax.f32 %v962_v20, 0.0  ;;  %v5755_v59 = vld [vmem:[%s8509_s5 + $0xec] sm:$0xf0]  ;;  %v5164_v20 = vld [vmem:[%s8509_s5 + $0xc0] sm:$0xf] }
 0x295   : > { %v1285_v10 = vpop.f32.mrf.mxu1 }
 0x296   : > { %v1286_v12 = vadd.f32 %v1285_v10, %v6334_v9  ;;  %v1591_v29 = vmax.f32 %v1453_v34, 0.0 }
 0x298   : > { %v1592_v38 = vmax.f32 %v1286_v12, 0.0 }
 0x299   : > { %v963_v22 = vpop.f32.mrf.mxu0 }
 0x29a   : > { %v6753_v39 = vpack.c.bf16 %v1592_v38, %v1590_v14  ;;  %v964_v40 = vadd.f32 %v6603_v44, %v963_v22  ;;  %v5181_v44 = vor.u32 %v5755_v59, %v5180_v58 }
 0x29b   : > { %v1454_v41 = vpop.f32.mrf.mxu2 }
 0x29c   : > { %8688 = vst [vmem:[#allocation48_spill] sm:$0xff] %v6753_v39  ;;  %v1029_v51 = vmax.f32 %v964_v40, 0.0  ;;  %v1455_v45 = vadd.f32 %v1454_v41, %v6345_v18  ;;  %2088 = vmatpush.bf16.msra.mxu3 %v5181_v44  ;;  %v5148_v40 = vld [vmem:[%s8509_s5 + $0xa0] sm:$0xf]  ;;  %v5747_v41 = vld [vmem:[%s8509_s5 + $0xac] sm:$0xf0] }
 0x29d   : > { %v1288_v0 = vpop.f32.mrf.mxu1 }
 0x29e   : > { %v1593_v27 = vmax.f32 %v1455_v45, 0.0  ;;  %v6757_v10 = vpack.c.bf16 %v1029_v51, %v1028_v60  ;;  %v5149_v45 = vor.u32 %v5747_v41, %v5148_v40  ;;  %v5739_v41 = vld [vmem:[%s8509_s5 + $0x6c] sm:$0xf0] }
 0x2a0   : > { %v6765_v8 = vpack.c.bf16 %v1593_v27, %v1591_v29  ;;  %1327 = vmatmul.bf16.gmra.mxu3 %v6757_v10  ;;  %2444 = vmatmul.bf16.gmra.mxu1 %v6386_v13  ;;  %v5751_v27 = vld [vmem:[%s8509_s5 + $0xcc] sm:$0xf0]  ;;  %v1289_v29 = vadd.f32 %v1288_v0, %v6334_v9 }
 0x2a1   : > { %2613 = vmatmul.bf16.gmra.mxu2 %v6390_v24  ;;  %v6770_v12 = vpop.f32.mrf.mxu0  ;;  %v5165_v38 = vor.u32 %v5751_v27, %v5164_v20  ;;  %v5132_v20 = vld [vmem:[%s8509_s5 + $0x80] sm:$0xf]  ;;  %v5743_v27 = vld [vmem:[%s8509_s5 + $0x8c] sm:$0xf0] }
 0x2a2   : > { %8689 = vst [vmem:[#allocation49_spill] sm:$0xff] %v6765_v8  ;;  %v1594_v60 = vmax.f32 %v1289_v29, 0.0 }
 0x2a3   : > { %v1457_v14 = vpop.f32.mrf.mxu2  ;;  %2089 = vmatpush.bf16.msra.mxu3 %v5165_v38  ;;  %v5133_v38 = vor.u32 %v5743_v27, %v5132_v20  ;;  %v5735_v20 = vld [vmem:[%s8509_s5 + $0x4c] sm:$0xf0] }
 0x2a4   : > { %2305 = vmatmul.bf16.gmra.mxu0 %v6492_v15  ;;  %v1458_v0 = vadd.f32 %v1457_v14, %v6345_v18  ;;  %v5116_v14 = vld [vmem:[%s8509_s5 + $0x60] sm:$0xf] }
 0x2a5   : > { %v1290_v22 = vpop.f32.mrf.mxu1 }
 0x2a6   : > { %v1291_v34 = vadd.f32 %v1290_v22, %v6334_v9 }
 0x2a7   : > { %2090 = vmatpush.bf16.msra.mxu3 %v5149_v45 }
 0x2a8   : > { %v1596_v51 = vmax.f32 %v1291_v34, 0.0  ;;  %v1595_v34 = vmax.f32 %v1458_v0, 0.0 }
 0x2a9   : > { %v6787_v58 = vpop.f32.mrf.mxu0 }
 0x2aa   : > { %v6790_v59 = vpack.c.bf16 %v1596_v51, %v1594_v60  ;;  %v5117_v51 = vor.u32 %v5739_v41, %v5116_v14 }
 0x2ab   : > { %v1459_v44 = vpop.f32.mrf.mxu2  ;;  %2091 = vmatpush.bf16.msra.mxu3 %v5133_v38 }
 0x2ac   : > { %8690 = vst [vmem:[#allocation50_spill] sm:$0xff] %v6790_v59  ;;  %v1460_v29 = vadd.f32 %v1459_v44, %v6345_v18  ;;  %v5100_v44 = vld [vmem:[%s8509_s5 + $0x40] sm:$0xf] }
 0x2ad   : > { %v1293_v22 = vpop.f32.mrf.mxu1 }
 0x2ae   : > { %v1597_v40 = vmax.f32 %v1460_v29, 0.0  ;;  %v1294_v27 = vadd.f32 %v1293_v22, %v6334_v9 }
 0x2af   : > { %2092 = vmatpush.bf16.msra.mxu3 %v5117_v51 }
 0x2b0   : > { %v6805_v60 = vpack.c.bf16 %v1597_v40, %v1595_v34  ;;  %1486 = vmatmul.bf16.vlgmr.msrb.gmra.mxu3 %v6725_v53  ;;  %2449 = vmatmul.bf16.gmra.mxu1 %v6398_v37  ;;  %v5101_v53 = vor.u32 %v5735_v20, %v5100_v44  ;;  %v5084_v34 = vld [vmem:[%s8509_s5 + $0x20] sm:$0xf]  ;;  %v5731_v40 = vld [vmem:[%s8509_s5 + $0x2c] sm:$0xf0]  ;;  %v1598_v14 = vmax.f32 %v1294_v27, 0.0 }
 0x2b1   : > { %2618 = vmatmul.bf16.gmra.mxu2 %v6402_v48  ;;  %v6810_v45 = vpop.f32.mrf.mxu0  ;;  %v5085_v51 = vor.u32 %v5731_v40, %v5084_v34 }
 0x2b3   : > { %v1462_v0 = vpop.f32.mrf.mxu2  ;;  %2093 = vmatpush.bf16.msra.mxu3 %v5101_v53  ;;  %v5068_v53 = vld [vmem:[%s8509_s5] sm:$0xf] }
 0x2b4   : > { %2310 = vmatmul.bf16.gmra.mxu0 %v6510_v52  ;;  %v1463_v22 = vadd.f32 %v1462_v0, %v6345_v18 }
 0x2b5   : > { %v1295_v29 = vpop.f32.mrf.mxu1 }
 0x2b6   : > { %v1296_v38 = vadd.f32 %v1295_v29, %v6334_v9  ;;  %v5727_v29 = vld [vmem:[%s8509_s5 + $0xc] sm:$0xf0]  ;;  %v1599_v40 = vmax.f32 %v1463_v22, 0.0 }
 0x2b7   : > { %2094 = vmatpush.bf16.msra.mxu3 %v5085_v51 }
 0x2b8   : > { %v1600_v41 = vmax.f32 %v1296_v38, 0.0  ;;  %v5069_v38 = vor.u32 %v5727_v29, %v5068_v53 }
 0x2b9   : > { %v6827_v48 = vpop.f32.mrf.mxu0 }
 0x2ba   : > { %v6830_v44 = vpack.c.bf16 %v1600_v41, %v1598_v14 }
 0x2bb   : > { %v1464_v20 = vpop.f32.mrf.mxu2  ;;  %2095 = vmatpush.bf16.msra.mxu3 %v5069_v38 }
 0x2bc   : > { %8691 = vst [vmem:[#allocation51_spill] sm:$0xff] %v6830_v44  ;;  %v1465_v27 = vadd.f32 %v1464_v20, %v6345_v18 }
 0x2bd   : > { %v1298_v34 = vpop.f32.mrf.mxu1 }
 0x2be   : > { %v1601_v24 = vmax.f32 %v1465_v27, 0.0  ;;  %v1299_v51 = vadd.f32 %v1298_v34, %v6334_v9 }
 0x2c0   : > { %v6839_v0 = vpack.c.bf16 %v1601_v24, %v1599_v40  ;;  %1491 = vmatmul.bf16.gmra.mxu3 %v6741_v6  ;;  %2454 = vmatmul.bf16.gmra.mxu1 %v6422_v5  ;;  %v1602_v53 = vmax.f32 %v1299_v51, 0.0 }
 0x2c1   : > { %2623 = vmatmul.bf16.gmra.mxu2 %v6426_v17  ;;  %v6844_v14 = vpop.f32.mrf.mxu0 }
 0x2c2   : > { %8692 = vst [vmem:[#allocation52_spill] sm:$0xff] %v6839_v0 }
 0x2c3   : > { %v1467_v41 = vpop.f32.mrf.mxu2 }
 0x2c4   : > { %2315 = vmatmul.bf16.gmra.mxu0 %v6522_v21  ;;  %v1468_v6 = vadd.f32 %v1467_v41, %v6345_v18 }
 0x2c5   : > { %v1300_v20 = vpop.f32.mrf.mxu1 }
 0x2c6   : > { %v1301_v22 = vadd.f32 %v1300_v20, %v6334_v9  ;;  %v1603_v44 = vmax.f32 %v1468_v6, 0.0 }
 0x2c8   : > { %v1604_v29 = vmax.f32 %v1301_v22, 0.0 }
 0x2c9   : > { %v6849_v24 = vpop.f32.mrf.mxu0 }
 0x2ca   : > { %v6852_v27 = vpack.c.bf16 %v1604_v29, %v1602_v53 }
 0x2cb   : > { %v1469_v38 = vpop.f32.mrf.mxu2 }
 0x2cc   : > { %8693 = vst [vmem:[#allocation53_spill] sm:$0xff] %v6852_v27  ;;  %v1470_v40 = vadd.f32 %v1469_v38, %v6345_v18 }
 0x2cd   : > { %v1303_v17 = vpop.f32.mrf.mxu1 }
 0x2ce   : > { %v1605_v59 = vmax.f32 %v1470_v40, 0.0  ;;  %v1304_v41 = vadd.f32 %v1303_v17, %v6334_v9 }
 0x2d0   : > { %v6855_v34 = vpack.c.bf16 %v1605_v59, %v1603_v44  ;;  %1496 = vmatmul.bf16.gmra.mxu3 %v6757_v10  ;;  %2459 = vmatmul.bf16.gmra.mxu1 %v6434_v32  ;;  %v1606_v29 = vmax.f32 %v1304_v41, 0.0 }
 0x2d1   : > { %2628 = vmatmul.bf16.gmra.mxu2 %v6444_v47  ;;  %v6860_v51 = vpop.f32.mrf.mxu0 }
 0x2d2   : > { %8694 = vst [vmem:[#allocation54_spill] sm:$0xff] %v6855_v34 }
 0x2d3   : > { %v1472_v20 = vpop.f32.mrf.mxu2 }
 0x2d4   : > { %2320 = vmatmul.bf16.gmra.mxu0 %v6546_v63  ;;  %v1473_v10 = vadd.f32 %v1472_v20, %v6345_v18 }
 0x2d5   : > { %v1305_v22 = vpop.f32.mrf.mxu1 }
 0x2d6   : > { %v1306_v53 = vadd.f32 %v1305_v22, %v6334_v9  ;;  %v1607_v27 = vmax.f32 %v1473_v10, 0.0 }
 0x2d8   : > { %v1608_v6 = vmax.f32 %v1306_v53, 0.0 }
 0x2d9   : > { %v6865_v59 = vpop.f32.mrf.mxu0 }
 0x2da   : > { %v6868_v44 = vpack.c.bf16 %v1608_v6, %v1606_v29 }
 0x2db   : > { %v1474_v38 = vpop.f32.mrf.mxu2 }
 0x2dc   : > { %8695 = vst [vmem:[#allocation55_spill] sm:$0xff] %v6868_v44  ;;  %v1475_v40 = vadd.f32 %v1474_v38, %v6345_v18 }
 0x2dd   : > { %v1308_v47 = vpop.f32.mrf.mxu1 }
 0x2de   : > { %v1609_v39 = vmax.f32 %v1475_v40, 0.0  ;;  %v1309_v20 = vadd.f32 %v1308_v47, %v6334_v9 }
 0x2e0   : > { %v6871_v17 = vpack.c.bf16 %v1609_v39, %v1607_v27  ;;  %2096 = vmatmul.bf16.vlgmr.msra.gmra.mxu3 %v6350_v25  ;;  %2464 = vmatmul.bf16.gmra.mxu1 %v6452_v62  ;;  %v1610_v6 = vmax.f32 %v1309_v20, 0.0 }
 0x2e1   : > { %2633 = vmatmul.bf16.gmra.mxu2 %v6456_v11  ;;  %v6876_v41 = vpop.f32.mrf.mxu0 }
 0x2e2   : > { %8696 = vst [vmem:[#allocation56_spill] sm:$0xff] %v6871_v17 }
 0x2e3   : > { %v1477_v22 = vpop.f32.mrf.mxu2 }
 0x2e4   : > { %2325 = vmatmul.bf16.gmra.mxu0 %v6582_v57  ;;  %v1478_v27 = vadd.f32 %v1477_v22, %v6345_v18 }
 0x2e5   : > { %v1310_v53 = vpop.f32.mrf.mxu1 }
 0x2e6   : > { %v1311_v29 = vadd.f32 %v1310_v53, %v6334_v9  ;;  %v1611_v44 = vmax.f32 %v1478_v27, 0.0 }
 0x2e8   : > { %v1612_v10 = vmax.f32 %v1311_v29, 0.0 }
 0x2e9   : > { %v6881_v39 = vpop.f32.mrf.mxu0 }
 0x2ea   : > { %8697 = vst [vmem:[#allocation57_spill] sm:$0xff] %v6881_v39  ;;  %v6884_v38 = vpack.c.bf16 %v1612_v10, %v1610_v6 }
 0x2eb   : > { %v1479_v40 = vpop.f32.mrf.mxu2 }
 0x2ec   : > { %8698 = vst [vmem:[#allocation58_spill] sm:$0xff] %v6884_v38  ;;  %v1480_v11 = vadd.f32 %v1479_v40, %v6345_v18 }
 0x2ed   : > { %v1313_v25 = vpop.f32.mrf.mxu1 }
 0x2ee   : > { %v1613_v17 = vmax.f32 %v1480_v11, 0.0  ;;  %v1314_v22 = vadd.f32 %v1313_v25, %v6334_v9  ;;  %v6906_v25 = vld [vmem:[%s8510_s6] sm:$0xf] }
 0x2f0   : > { %v6887_v47 = vpack.c.bf16 %v1613_v17, %v1611_v44  ;;  %2101 = vmatmul.bf16.gmra.mxu3 %v6368_v50  ;;  %2469 = vmatmul.bf16.gmra.mxu1 %v6464_v28  ;;  %v1614_v10 = vmax.f32 %v1314_v22, 0.0  ;;  %v6909_v22 = vperm.slane %v6906_v25, 1 }
 0x2f1   : > { %2638 = vmatmul.bf16.gmra.mxu2 %v6480_v49  ;;  %v6892_v20 = vpop.f32.mrf.mxu0 }
 0x2f2   : > { %8699 = vst [vmem:[#allocation59_spill] sm:$0xff] %v6887_v47 }
 0x2f3   : > { %8700 = vst [vmem:[#allocation60_spill] sm:$0xff] %v6892_v20  ;;  %v1482_v53 = vpop.f32.mrf.mxu2 }
 0x2f4   : > { %2330 = vmatmul.bf16.gmra.mxu0 %v6594_v35  ;;  %v1483_v17 = vadd.f32 %v1482_v53, %v6345_v18 }
 0x2f5   : > { %v1315_v29 = vpop.f32.mrf.mxu1 }
 0x2f6   : > { %v1316_v6 = vadd.f32 %v1315_v29, %v6334_v9  ;;  %v1615_v38 = vmax.f32 %v1483_v17, 0.0 }
 0x2f8   : > { %v1616_v11 = vmax.f32 %v1316_v6, 0.0  ;;  %v5188_v6 = vld [vmem:[%s8509_s5 + $0xe8] sm:$0xf] }
 0x2f9   : > { %v6897_v44 = vpop.f32.mrf.mxu0 }
 0x2fa   : > { %8701 = vst [vmem:[#allocation61_spill] sm:$0xff] %v6897_v44  ;;  %v6900_v27 = vpack.c.bf16 %v1616_v11, %v1614_v10  ;;  %v5318_v10 = vld [vmem:[%s8509_s5 + $0x1f8] sm:$0xf0] }
 0x2fb   : > { %v1484_v40 = vpop.f32.mrf.mxu2 }
 0x2fc   : > { %8702 = vst [vmem:[#allocation62_spill] sm:$0xff] %v6900_v27  ;;  %v1485_v49 = vadd.f32 %v1484_v40, %v6345_v18 }
 0x2fd   : > { %v2435_v50 = vpop.f32.mrf.mxu1 }
 0x2fe   : > { %v1617_v47 = vmax.f32 %v1485_v49, 0.0  ;;  %v5756_v49 = vld [vmem:[%s8509_s5 + $0xf4] sm:$0xf0]  ;;  %v2436_v11 = vadd.f32 %v2435_v50, %v6909_v22  ;;  %v5316_v50 = vld [vmem:[%s8509_s5 + $0x1e8] sm:$0xf] }
 0x300   : > { %v6911_v29 = vpack.c.bf16 %v1617_v47, %v1615_v38  ;;  %2106 = vmatmul.bf16.gmra.mxu3 %v6386_v13  ;;  %2474 = vmatmul.bf16.gmra.mxu1 %v6488_v1  ;;  %v5786_v38 = vld [vmem:[%s8509_s5 + $0x1ec] sm:$0xf]  ;;  %v5189_v47 = vor.u32 %v5756_v49, %v5188_v6  ;;  %v5190_v49 = vld [vmem:[%s8509_s5 + $0xf8] sm:$0xf0] }
 0x301   : > { %2643 = vmatmul.bf16.gmra.mxu2 %v6492_v15  ;;  %v6916_v53 = vpop.f32.mrf.mxu0  ;;  %v5321_v40 = vor.u32 %v5786_v38, %v5318_v10  ;;  %v5754_v6 = vld [vmem:[%s8509_s5 + $0xec] sm:$0xf] }
 0x302   : > { %8703 = vst [vmem:[#allocation63_spill] sm:$0xff] %v6911_v29  ;;  %2764 = vmatpush.bf16.msrb.mxu3 %v5189_v47  ;;  %v5193_v47 = vor.u32 %v5754_v6, %v5190_v49 }
 0x303   : > { %8704 = vst [vmem:[#allocation64_spill] sm:$0xff] %v6916_v53  ;;  %v1318_v17 = vpop.f32.mrf.mxu3  ;;  %3271 = vmatpush.bf16.msra.mxu2 %v5321_v40 }
 0x304   : > { %v2604_v15 = vpop.f32.mrf.mxu2  ;;  %2335 = vmatmul.bf16.gmra.mxu0 %v6617_v19  ;;  %v1319_v38 = vadd.f32 %v1318_v17, %v6334_v9  ;;  %3102 = vmatpush.bf16.msra.mxu1 %v5193_v47 }
 0x305   : > { %v2605_v13 = vadd.f32 %v2604_v15, %v2436_v11  ;;  %v2437_v27 = vpop.f32.mrf.mxu1  ;;  %v5788_v15 = vld [vmem:[%s8509_s5 + $0x1f4] sm:$0xf0] }
 0x306   : > { %v2438_v10 = vadd.f32 %v2437_v27, %v6909_v22  ;;  %v5317_v40 = vor.u32 %v5788_v15, %v5316_v50  ;;  %v1618_v34 = vmax.f32 %v1319_v38, 0.0 }
 0x307   : > { %v3441_v39 = vmax.f32 %v2605_v13, 0.0 }
 0x308   : > { %2933 = vmatpush.bf16.msra.mxu0 %v5317_v40 }
 0x309   : > { %v6932_v29 = vpop.f32.mrf.mxu0 }
 0x30a   : > { %8705 = vst [vmem:[#allocation65_spill] sm:$0xff] %v6932_v29 }
 0x30b   : > { %v1320_v11 = vpop.f32.mrf.mxu3 }
 0x30c   : > { %v1321_v29 = vadd.f32 %v1320_v11, %v6334_v9  ;;  %v2606_v53 = vpop.f32.mrf.mxu2 }
 0x30d   : > { %v2607_v44 = vadd.f32 %v2606_v53, %v2438_v10  ;;  %v2440_v20 = vpop.f32.mrf.mxu1 }
 0x30e   : > { %v1620_v36 = vmax.f32 %v1321_v29, 0.0  ;;  %v2441_v50 = vadd.f32 %v2440_v20, %v6909_v22 }
 0x30f   : > { %v3445_v17 = vmax.f32 %v2607_v44, 0.0 }
 0x310   : > { %v6949_v6 = vpack.c.bf16 %v1620_v36, %v1618_v34  ;;  %2111 = vmatmul.bf16.gmra.mxu3 %v6398_v37  ;;  %2479 = vmatmul.bf16.gmra.mxu1 %v6500_v33 }
 0x311   : > { %v3775_v27 = vmax.f32 %v3441_v39, %v3445_v17  ;;  %2648 = vmatmul.bf16.gmra.mxu2 %v6510_v52  ;;  %v6954_v49 = vpop.f32.mrf.mxu0 }
 0x312   : > { %8706 = vst [vmem:[#allocation66_spill] sm:$0xff] %v6949_v6 }
 0x313   : > { %v1323_v53 = vpop.f32.mrf.mxu3 }
 0x314   : > { %v2609_v47 = vpop.f32.mrf.mxu2  ;;  %2340 = vmatmul.bf16.gmra.mxu0 %v6634_v2  ;;  %v1324_v38 = vadd.f32 %v1323_v53, %v6334_v9 }
 0x315   : > { %v2610_v29 = vadd.f32 %v2609_v47, %v2441_v50  ;;  %v2442_v13 = vpop.f32.mrf.mxu1 }
 0x316   : > { %v2443_v39 = vadd.f32 %v2442_v13, %v6909_v22  ;;  %v1622_v17 = vmax.f32 %v1324_v38, 0.0 }
 0x317   : > { %v3449_v44 = vmax.f32 %v2610_v29, 0.0 }
 0x319   : > { %v3776_v36 = vmax.f32 %v3775_v27, %v3449_v44  ;;  %v6958_v34 = vpop.f32.mrf.mxu0 }
 0x31b   : > { %v1325_v15 = vpop.f32.mrf.mxu3 }
 0x31c   : > { %v1326_v10 = vadd.f32 %v1325_v15, %v6334_v9  ;;  %v2611_v11 = vpop.f32.mrf.mxu2 }
 0x31d   : > { %v2612_v40 = vadd.f32 %v2611_v11, %v2443_v39  ;;  %v2445_v20 = vpop.f32.mrf.mxu1 }
 0x31e   : > { %v1624_v52 = vmax.f32 %v1326_v10, 0.0  ;;  %v2446_v53 = vadd.f32 %v2445_v20, %v6909_v22 }
 0x31f   : > { %v3453_v37 = vmax.f32 %v2612_v40, 0.0 }
 0x320   : > { %v6963_v6 = vpack.c.bf16 %v1624_v52, %v1622_v17  ;;  %2116 = vmatmul.bf16.gmra.mxu3 %v6422_v5  ;;  %2484 = vmatmul.bf16.gmra.mxu1 %v6518_v4 }
 0x321   : > { %v3777_v27 = vmax.f32 %v3776_v36, %v3453_v37  ;;  %2653 = vmatmul.bf16.gmra.mxu2 %v6522_v21  ;;  %v6968_v50 = vpop.f32.mrf.mxu0 }
 0x322   : > { %8707 = vst [vmem:[#allocation67_spill] sm:$0xff] %v6963_v6 }
 0x323   : > { %v1328_v47 = vpop.f32.mrf.mxu3 }
 0x324   : > { %v2614_v29 = vpop.f32.mrf.mxu2  ;;  %2345 = vmatmul.bf16.gmra.mxu0 %v6645_v43  ;;  %v1329_v15 = vadd.f32 %v1328_v47, %v6334_v9 }
 0x325   : > { %v2615_v13 = vadd.f32 %v2614_v29, %v2446_v53  ;;  %v2447_v44 = vpop.f32.mrf.mxu1 }
 0x326   : > { %v2448_v37 = vadd.f32 %v2447_v44, %v6909_v22  ;;  %v1626_v17 = vmax.f32 %v1329_v15, 0.0 }
 0x327   : > { %v3457_v38 = vmax.f32 %v2615_v13, 0.0 }
 0x329   : > { %v3778_v52 = vmax.f32 %v3777_v27, %v3457_v38  ;;  %v6972_v39 = vpop.f32.mrf.mxu0 }
 0x32b   : > { %v1330_v36 = vpop.f32.mrf.mxu3 }
 0x32c   : > { %v1331_v10 = vadd.f32 %v1330_v36, %v6334_v9  ;;  %v2616_v11 = vpop.f32.mrf.mxu2 }
 0x32d   : > { %v2617_v40 = vadd.f32 %v2616_v11, %v2448_v37  ;;  %v2450_v20 = vpop.f32.mrf.mxu1 }
 0x32e   : > { %v1628_v21 = vmax.f32 %v1331_v10, 0.0  ;;  %v2451_v47 = vadd.f32 %v2450_v20, %v6909_v22 }
 0x32f   : > { %v3461_v5 = vmax.f32 %v2617_v40, 0.0 }
 0x330   : > { %v6977_v6 = vpack.c.bf16 %v1628_v21, %v1626_v17  ;;  %2121 = vmatmul.bf16.gmra.mxu3 %v6434_v32  ;;  %2489 = vmatmul.bf16.gmra.mxu1 %v6542_v46 }
 0x331   : > { %v3779_v27 = vmax.f32 %v3778_v52, %v3461_v5  ;;  %2658 = vmatmul.bf16.gmra.mxu2 %v6546_v63  ;;  %v6982_v53 = vpop.f32.mrf.mxu0 }
 0x332   : > { %8708 = vst [vmem:[#allocation68_spill] sm:$0xff] %v6977_v6 }
 0x333   : > { %v1487_v9 = vpop.f32.mrf.mxu3 }
 0x334   : > { %v2619_v29 = vpop.f32.mrf.mxu2  ;;  %2350 = vmatmul.bf16.gmra.mxu0 %v6656_v30  ;;  %v1488_v37 = vadd.f32 %v1487_v9, %v6345_v18  ;;  %v5172_v9 = vld [vmem:[%s8509_s5 + $0xc8] sm:$0xf] }
 0x335   : > { %v2620_v13 = vadd.f32 %v2619_v29, %v2451_v47  ;;  %v2452_v44 = vpop.f32.mrf.mxu1  ;;  %v5752_v29 = vld [vmem:[%s8509_s5 + $0xd4] sm:$0xf0] }
 0x336   : > { %v2453_v5 = vadd.f32 %v2452_v44, %v6909_v22  ;;  %v1619_v20 = vmax.f32 %v1488_v37, 0.0  ;;  %v5173_v44 = vor.u32 %v5752_v29, %v5172_v9  ;;  %v5300_v9 = vld [vmem:[%s8509_s5 + $0x1c8] sm:$0xf] }
 0x337   : > { %v3465_v38 = vmax.f32 %v2620_v13, 0.0  ;;  %v5782_v13 = vld [vmem:[%s8509_s5 + $0x1cc] sm:$0xf] }
 0x338   : > { %2765 = vmatpush.bf16.msrb.mxu3 %v5173_v44 }
 0x339   : > { %v3780_v21 = vmax.f32 %v3779_v27, %v3465_v38  ;;  %v6986_v15 = vpop.f32.mrf.mxu0 }
 0x33b   : > { %v1489_v52 = vpop.f32.mrf.mxu3 }
 0x33c   : > { %v1490_v36 = vadd.f32 %v1489_v52, %v6345_v18  ;;  %v2621_v10 = vpop.f32.mrf.mxu2 }
 0x33d   : > { %v2622_v11 = vadd.f32 %v2621_v10, %v2453_v5  ;;  %v2455_v40 = vpop.f32.mrf.mxu1 }
 0x33e   : > { %v1621_v17 = vmax.f32 %v1490_v36, 0.0  ;;  %v2456_v38 = vadd.f32 %v2455_v40, %v6909_v22  ;;  %v5174_v40 = vld [vmem:[%s8509_s5 + $0xd8] sm:$0xf0] }
 0x33f   : > { %v3469_v63 = vmax.f32 %v2622_v11, 0.0 }
 0x340   : > { %v6991_v32 = vpack.c.bf16 %v1621_v17, %v1619_v20  ;;  %2126 = vmatmul.bf16.gmra.mxu3 %v6452_v62  ;;  %2494 = vmatmul.bf16.gmra.mxu1 %v6566_v31  ;;  %v5750_v17 = vld [vmem:[%s8509_s5 + $0xcc] sm:$0xf] }
 0x341   : > { %v3781_v27 = vmax.f32 %v3780_v21, %v3469_v63  ;;  %2663 = vmatmul.bf16.gmra.mxu2 %v6582_v57  ;;  %v6996_v47 = vpop.f32.mrf.mxu0  ;;  %v5302_v63 = vld [vmem:[%s8509_s5 + $0x1d8] sm:$0xf0] }
 0x342   : > { %8709 = vst [vmem:[#allocation69_spill] sm:$0xff] %v6991_v32  ;;  %v5305_v37 = vor.u32 %v5782_v13, %v5302_v63  ;;  %v5177_v13 = vor.u32 %v5750_v17, %v5174_v40 }
 0x343   : > { %v1492_v21 = vpop.f32.mrf.mxu3 }
 0x344   : > { %v2624_v5 = vpop.f32.mrf.mxu2  ;;  %2355 = vmatmul.bf16.gmra.mxu0 %v6703_v61  ;;  %3272 = vmatpush.bf16.msra.mxu2 %v5305_v37  ;;  %v1493_v29 = vadd.f32 %v1492_v21, %v6345_v18 }
 0x345   : > { %v2625_v52 = vadd.f32 %v2624_v5, %v2456_v38  ;;  %v2457_v36 = vpop.f32.mrf.mxu1  ;;  %3103 = vmatpush.bf16.msra.mxu1 %v5177_v13 }
 0x346   : > { %v2458_v44 = vadd.f32 %v2457_v36, %v6909_v22  ;;  %v1623_v57 = vmax.f32 %v1493_v29, 0.0 }
 0x347   : > { %v3473_v10 = vmax.f32 %v2625_v52, 0.0 }
 0x349   : > { %v3782_v11 = vmax.f32 %v3781_v27, %v3473_v10  ;;  %v7012_v20 = vpop.f32.mrf.mxu0  ;;  %v5784_v27 = vld [vmem:[%s8509_s5 + $0x1d4] sm:$0xf0] }
 0x34a   : > { %v5301_v38 = vor.u32 %v5784_v27, %v5300_v9 }
 0x34b   : > { %v1494_v63 = vpop.f32.mrf.mxu3 }
 0x34c   : > { %v1495_v37 = vadd.f32 %v1494_v63, %v6345_v18  ;;  %v2626_v5 = vpop.f32.mrf.mxu2  ;;  %2934 = vmatpush.bf16.msra.mxu0 %v5301_v38 }
 0x34d   : > { %v2627_v52 = vadd.f32 %v2626_v5, %v2458_v44  ;;  %v2460_v10 = vpop.f32.mrf.mxu1 }
 0x34e   : > { %v1625_v62 = vmax.f32 %v1495_v37, 0.0  ;;  %v2461_v40 = vadd.f32 %v2460_v10, %v6909_v22 }
 0x34f   : > { %v3477_v6 = vmax.f32 %v2627_v52, 0.0 }
 0x350   : > { %v7029_v21 = vpack.c.bf16 %v1625_v62, %v1623_v57  ;;  %2131 = vmatmul.bf16.gmra.mxu3 %v6464_v28  ;;  %2499 = vmatmul.bf16.gmra.mxu1 %v6590_v16 }
 0x351   : > { %v3783_v17 = vmax.f32 %v3782_v11, %v3477_v6  ;;  %2668 = vmatmul.bf16.gmra.mxu2 %v6594_v35  ;;  %v7034_v36 = vpop.f32.mrf.mxu0 }
 0x352   : > { %8710 = vst [vmem:[#allocation70_spill] sm:$0xff] %v7029_v21 }
 0x353   : > { %8711 = vst [vmem:[#allocation71_spill] sm:$0xff] %v7034_v36  ;;  %v1497_v9 = vpop.f32.mrf.mxu3 }
 0x354   : > { %v2629_v13 = vpop.f32.mrf.mxu2  ;;  %2360 = vmatmul.bf16.gmra.mxu0 %v6714_v56  ;;  %v1498_v63 = vadd.f32 %v1497_v9, %v6345_v18 }
 0x355   : > { %v2630_v29 = vadd.f32 %v2629_v13, %v2461_v40  ;;  %v2462_v27 = vpop.f32.mrf.mxu1  ;;  %v7052_v13 = vperm.slane %v6906_v25, 0 }
 0x356   : > { %v2463_v6 = vadd.f32 %v2462_v27, %v6909_v22  ;;  %v1627_v10 = vmax.f32 %v1498_v63, 0.0 }
 0x357   : > { %v3481_v44 = vmax.f32 %v2630_v29, 0.0 }
 0x359   : > { %v3784_v62 = vmax.f32 %v3783_v17, %v3481_v44  ;;  %v7038_v57 = vpop.f32.mrf.mxu0 }
 0x35b   : > { %v1499_v11 = vpop.f32.mrf.mxu3 }
 0x35c   : > { %v1500_v38 = vadd.f32 %v1499_v11, %v6345_v18  ;;  %v2631_v37 = vpop.f32.mrf.mxu2 }
 0x35d   : > { %v2632_v5 = vadd.f32 %v2631_v37, %v2463_v6  ;;  %v2465_v52 = vpop.f32.mrf.mxu1 }
 0x35e   : > { %v1629_v35 = vmax.f32 %v1500_v38, 0.0  ;;  %v2466_v9 = vadd.f32 %v2465_v52, %v6909_v22 }
 0x35f   : > { %v3485_v28 = vmax.f32 %v2632_v5, 0.0 }
 0x360   : > { %v7043_v36 = vpack.c.bf16 %v1629_v35, %v1627_v10  ;;  %2136 = vmatmul.bf16.gmra.mxu3 %v6488_v1  ;;  %2504 = vmatmul.bf16.gmra.mxu1 %v6607_v55 }
 0x361   : > { %v3785_v17 = vmax.f32 %v3784_v62, %v3485_v28  ;;  %2673 = vmatmul.bf16.gmra.mxu2 %v6617_v19  ;;  %v7048_v40 = vpop.f32.mrf.mxu0 }
 0x362   : > { %8712 = vst [vmem:[#allocation72_spill] sm:$0xff] %v7043_v36 }
 0x363   : > { %v2097_v18 = vpop.f32.mrf.mxu3 }
 0x364   : > { %v2634_v29 = vpop.f32.mrf.mxu2  ;;  %2365 = vmatmul.bf16.gmra.mxu0 %v6727_v54  ;;  %v2098_v63 = vadd.f32 %v2097_v18, %v7052_v13 }
 0x365   : > { %v2635_v35 = vadd.f32 %v2634_v29, %v2466_v9  ;;  %v2467_v27 = vpop.f32.mrf.mxu1 }
 0x366   : > { %v2468_v62 = vadd.f32 %v2467_v27, %v6909_v22  ;;  %v2267_v38 = vadd.f32 %v6770_v12, %v2098_v63 }
 0x367   : > { %v3489_v44 = vmax.f32 %v2635_v35, 0.0 }
 0x368   : > { %v3440_v29 = vmax.f32 %v2267_v38, 0.0 }
 0x369   : > { %v3786_v6 = vmax.f32 %v3785_v17, %v3489_v44  ;;  %v7056_v28 = vpop.f32.mrf.mxu0 }
 0x36b   : > { %v2099_v11 = vpop.f32.mrf.mxu3 }
 0x36c   : > { %v2100_v37 = vadd.f32 %v2099_v11, %v7052_v13  ;;  %v2636_v25 = vpop.f32.mrf.mxu2 }
 0x36d   : > { %v2637_v5 = vadd.f32 %v2636_v25, %v2468_v62  ;;  %v2470_v52 = vpop.f32.mrf.mxu1 }
 0x36e   : > { %v2269_v10 = vadd.f32 %v6787_v58, %v2100_v37  ;;  %v2471_v27 = vadd.f32 %v2470_v52, %v6909_v22 }
 0x36f   : > { %v3493_v9 = vmax.f32 %v2637_v5, 0.0 }
 0x370   : > { %v3444_v35 = vmax.f32 %v2269_v10, 0.0  ;;  %2141 = vmatmul.bf16.gmra.mxu3 %v6500_v33  ;;  %2509 = vmatmul.bf16.gmra.mxu1 %v6630_v42 }
 0x371   : > { %v3787_v17 = vmax.f32 %v3786_v6, %v3493_v9  ;;  %2678 = vmatmul.bf16.gmra.mxu2 %v6634_v2  ;;  %v7065_v18 = vpop.f32.mrf.mxu0 }
 0x372   : > { %v3706_v12 = vmax.f32 %v3440_v29, %v3444_v35 }
 0x373   : > { %v2102_v44 = vpop.f32.mrf.mxu3 }
 0x374   : > { %v2103_v63 = vadd.f32 %v2102_v44, %v7052_v13  ;;  %v2639_v62 = vpop.f32.mrf.mxu2  ;;  %2370 = vmatmul.bf16.gmra.mxu0 %v6743_v3 }
 0x375   : > { %v2640_v58 = vadd.f32 %v2639_v62, %v2471_v27  ;;  %v2472_v11 = vpop.f32.mrf.mxu1 }
 0x376   : > { %v2272_v38 = vadd.f32 %v6810_v45, %v2103_v63  ;;  %v2473_v9 = vadd.f32 %v2472_v11, %v6909_v22  ;;  %v5156_v63 = vld [vmem:[%s8509_s5 + $0xa8] sm:$0xf] }
 0x377   : > { %v3497_v37 = vmax.f32 %v2640_v58, 0.0 }
 0x378   : > { %v3448_v25 = vmax.f32 %v2272_v38, 0.0 }
 0x379   : > { %v3788_v6 = vmax.f32 %v3787_v17, %v3497_v37  ;;  %v7071_v5 = vpop.f32.mrf.mxu0  ;;  %v5286_v37 = vld [vmem:[%s8509_s5 + $0x1b8] sm:$0xf0] }
 0x37a   : > { %v3707_v10 = vmax.f32 %v3706_v12, %v3448_v25 }
 0x37b   : > { %v2104_v29 = vpop.f32.mrf.mxu3 }
 0x37c   : > { %v2105_v52 = vadd.f32 %v2104_v29, %v7052_v13  ;;  %v2641_v35 = vpop.f32.mrf.mxu2 }
 0x37d   : > { %v2642_v44 = vadd.f32 %v2641_v35, %v2473_v9  ;;  %v2475_v2 = vpop.f32.mrf.mxu1 }
 0x37e   : > { %v2274_v33 = vadd.f32 %v6827_v48, %v2105_v52  ;;  %v5748_v48 = vld [vmem:[%s8509_s5 + $0xb4] sm:$0xf0]  ;;  %v2476_v58 = vadd.f32 %v2475_v2, %v6909_v22 }
 0x37f   : > { %v3501_v27 = vmax.f32 %v2642_v44, 0.0  ;;  %v5157_v38 = vor.u32 %v5748_v48, %v5156_v63  ;;  %v5746_v63 = vld [vmem:[%s8509_s5 + $0xac] sm:$0xf]  ;;  %v5158_v48 = vld [vmem:[%s8509_s5 + $0xb8] sm:$0xf0] }
 0x380   : > { %v3452_v62 = vmax.f32 %v2274_v33, 0.0  ;;  %2146 = vmatmul.bf16.gmra.mxu3 %v6518_v4  ;;  %2514 = vmatmul.bf16.gmra.mxu1 %v6641_v26  ;;  %v5778_v33 = vld [vmem:[%s8509_s5 + $0x1ac] sm:$0xf] }
 0x381   : > { %v3789_v45 = vmax.f32 %v3788_v6, %v3501_v27  ;;  %2683 = vmatmul.bf16.gmra.mxu2 %v6645_v43  ;;  %v7079_v17 = vpop.f32.mrf.mxu0  ;;  %2766 = vmatpush.bf16.msrb.mxu3 %v5157_v38 }
 0x382   : > { %v3708_v12 = vmax.f32 %v3707_v10, %v3452_v62  ;;  %v5289_v10 = vor.u32 %v5778_v33, %v5286_v37  ;;  %v5284_v33 = vld [vmem:[%s8509_s5 + $0x1a8] sm:$0xf] }
 0x383   : > { %v2107_v11 = vpop.f32.mrf.mxu3 }
 0x384   : > { %v2108_v25 = vadd.f32 %v2107_v11, %v7052_v13  ;;  %v2644_v6 = vpop.f32.mrf.mxu2  ;;  %2375 = vmatmul.bf16.gmra.mxu0 %v6765_v8  ;;  %3273 = vmatpush.bf16.msra.mxu2 %v5289_v10  ;;  %v5161_v11 = vor.u32 %v5746_v63, %v5158_v48 }
 0x385   : > { %v2645_v9 = vadd.f32 %v2644_v6, %v2476_v58  ;;  %v2477_v29 = vpop.f32.mrf.mxu1 }
 0x386   : > { %v2277_v52 = vadd.f32 %v6844_v14, %v2108_v25  ;;  %v2478_v14 = vadd.f32 %v2477_v29, %v6909_v22  ;;  %3104 = vmatpush.bf16.msra.mxu1 %v5161_v11 }
 0x387   : > { %v3505_v35 = vmax.f32 %v2645_v9, 0.0 }
 0x388   : > { %v3456_v2 = vmax.f32 %v2277_v52, 0.0 }
 0x389   : > { %v3790_v44 = vmax.f32 %v3789_v45, %v3505_v35  ;;  %v7097_v27 = vpop.f32.mrf.mxu0  ;;  %v5780_v45 = vld [vmem:[%s8509_s5 + $0x1b4] sm:$0xf0] }
 0x38a   : > { %v3709_v62 = vmax.f32 %v3708_v12, %v3456_v2  ;;  %v5285_v37 = vor.u32 %v5780_v45, %v5284_v33 }
 0x38b   : > { %v2109_v58 = vpop.f32.mrf.mxu3 }
 0x38c   : > { %v2110_v12 = vadd.f32 %v2109_v58, %v7052_v13  ;;  %v2646_v38 = vpop.f32.mrf.mxu2  ;;  %2935 = vmatpush.bf16.msra.mxu0 %v5285_v37 }
 0x38d   : > { %v2647_v25 = vadd.f32 %v2646_v38, %v2478_v14  ;;  %v2480_v6 = vpop.f32.mrf.mxu1 }
 0x38e   : > { %v2279_v10 = vadd.f32 %v6849_v24, %v2110_v12  ;;  %v2481_v63 = vadd.f32 %v2480_v6, %v6909_v22 }
 0x38f   : > { %v3509_v9 = vmax.f32 %v2647_v25, 0.0 }
 0x390   : > { %v3460_v52 = vmax.f32 %v2279_v10, 0.0  ;;  %2151 = vmatmul.bf16.gmra.mxu3 %v6542_v46  ;;  %2519 = vmatmul.bf16.gmra.mxu1 %v6652_v7 }
 0x391   : > { %v3791_v29 = vmax.f32 %v3790_v44, %v3509_v9  ;;  %2688 = vmatmul.bf16.gmra.mxu2 %v6656_v30  ;;  %v7117_v35 = vpop.f32.mrf.mxu0 }
 0x392   : > { %v3710_v2 = vmax.f32 %v3709_v62, %v3460_v52 }
 0x393   : > { %v2112_v48 = vpop.f32.mrf.mxu3 }
 0x394   : > { %v2113_v33 = vadd.f32 %v2112_v48, %v7052_v13  ;;  %v2649_v14 = vpop.f32.mrf.mxu2  ;;  %2380 = vmatmul.bf16.gmra.mxu0 %v6805_v60 }
 0x395   : > { %v2650_v24 = vadd.f32 %v2649_v14, %v2481_v63  ;;  %v2482_v58 = vpop.f32.mrf.mxu1 }
 0x396   : > { %v2282_v11 = vadd.f32 %v6860_v51, %v2113_v33  ;;  %v2483_v62 = vadd.f32 %v2482_v58, %v6909_v22 }
 0x397   : > { %v3513_v45 = vmax.f32 %v2650_v24, 0.0 }
 0x398   : > { %v3464_v12 = vmax.f32 %v2282_v11, 0.0 }
 0x399   : > { %v3792_v44 = vmax.f32 %v3791_v29, %v3513_v45  ;;  %v7123_v38 = vpop.f32.mrf.mxu0 }
 0x39a   : > { %v3711_v37 = vmax.f32 %v3710_v2, %v3464_v12 }
 0x39b   : > { %v2114_v25 = vpop.f32.mrf.mxu3 }
 0x39c   : > { %v2115_v6 = vadd.f32 %v2114_v25, %v7052_v13  ;;  %v2651_v10 = vpop.f32.mrf.mxu2 }
 0x39d   : > { %v2652_v9 = vadd.f32 %v2651_v10, %v2483_v62  ;;  %v2485_v52 = vpop.f32.mrf.mxu1 }
 0x39e   : > { %v2284_v48 = vadd.f32 %v6865_v59, %v2115_v6  ;;  %v2486_v33 = vadd.f32 %v2485_v52, %v6909_v22 }
 0x39f   : > { %v3517_v63 = vmax.f32 %v2652_v9, 0.0 }
 0x3a0   : > { %v3468_v14 = vmax.f32 %v2284_v48, 0.0  ;;  %2156 = vmatmul.bf16.gmra.mxu3 %v6566_v31  ;;  %2524 = vmatmul.bf16.gmra.mxu1 %v6687_v23  ;;  %v8717_v31 = vld [vmem:[#allocation61_spill] sm:$0xff] }
 0x3a1   : > { %v3793_v51 = vmax.f32 %v3792_v44, %v3517_v63  ;;  %2693 = vmatmul.bf16.gmra.mxu2 %v6703_v61  ;;  %v7131_v29 = vpop.f32.mrf.mxu0 }
 0x3a2   : > { %v3712_v2 = vmax.f32 %v3711_v37, %v3468_v14 }
 0x3a3   : > { %v2117_v24 = vpop.f32.mrf.mxu3 }
 0x3a4   : > { %v2118_v58 = vadd.f32 %v2117_v24, %v7052_v13  ;;  %v2654_v11 = vpop.f32.mrf.mxu2  ;;  %2385 = vmatmul.bf16.gmra.mxu0 %v6839_v0  ;;  %v8713_v24 = vld [vmem:[#allocation57_spill] sm:$0xff] }
 0x3a5   : > { %v2655_v59 = vadd.f32 %v2654_v11, %v2486_v33  ;;  %v2487_v45 = vpop.f32.mrf.mxu1 }
 0x3a6   : > { %v2287_v12 = vadd.f32 %v6876_v41, %v2118_v58  ;;  %v2488_v37 = vadd.f32 %v2487_v45, %v6909_v22  ;;  %v8714_v41 = vld [vmem:[#allocation42_spill] sm:$0xff] }
 0x3a7   : > { %v3521_v62 = vmax.f32 %v2655_v59, 0.0 }
 0x3a8   : > { %v3472_v25 = vmax.f32 %v2287_v12, 0.0 }
 0x3a9   : > { %v3794_v44 = vmax.f32 %v3793_v51, %v3521_v62  ;;  %v7137_v6 = vpop.f32.mrf.mxu0 }
 0x3aa   : > { %v3713_v10 = vmax.f32 %v3712_v2, %v3472_v25  ;;  %v8715_v25 = vld [vmem:[#allocation54_spill] sm:$0xff] }
 0x3ab   : > { %v2119_v9 = vpop.f32.mrf.mxu3 }
 0x3ac   : > { %v2120_v52 = vadd.f32 %v2119_v9, %v7052_v13  ;;  %v2656_v48 = vpop.f32.mrf.mxu2  ;;  %v8716_v9 = vld [vmem:[#allocation60_spill] sm:$0xff] }
 0x3ad   : > { %v2657_v63 = vadd.f32 %v2656_v48, %v2488_v37  ;;  %v2490_v14 = vpop.f32.mrf.mxu1 }
 0x3ae   : > { %v2289_v61 = vadd.f32 %v8713_v24, %v2120_v52  ;;  %v2491_v59 = vadd.f32 %v2490_v14, %v6909_v22 }
 0x3af   : > { %v3525_v33 = vmax.f32 %v2657_v63, 0.0 }
 0x3b0   : > { %v3476_v11 = vmax.f32 %v2289_v61, 0.0  ;;  %2161 = vmatmul.bf16.gmra.mxu3 %v6590_v16  ;;  %2529 = vmatmul.bf16.gmra.mxu1 %v8714_v41 }
 0x3b1   : > { %v3795_v51 = vmax.f32 %v3794_v44, %v3525_v33  ;;  %2698 = vmatmul.bf16.gmra.mxu2 %v6714_v56  ;;  %v7145_v2 = vpop.f32.mrf.mxu0 }
 0x3b2   : > { %v3714_v58 = vmax.f32 %v3713_v10, %v3476_v11 }
 0x3b3   : > { %v2122_v45 = vpop.f32.mrf.mxu3 }
 0x3b4   : > { %v2123_v12 = vadd.f32 %v2122_v45, %v7052_v13  ;;  %v2659_v62 = vpop.f32.mrf.mxu2  ;;  %2390 = vmatmul.bf16.gmra.mxu0 %v8715_v25 }
 0x3b5   : > { %v2660_v37 = vadd.f32 %v2659_v62, %v2491_v59  ;;  %v2492_v61 = vpop.f32.mrf.mxu1 }
 0x3b6   : > { %v2292_v52 = vadd.f32 %v8716_v9, %v2123_v12  ;;  %v2493_v10 = vadd.f32 %v2492_v61, %v6909_v22  ;;  %v8718_v12 = vld [vmem:[#allocation44_spill] sm:$0xff] }
 0x3b7   : > { %v3529_v48 = vmax.f32 %v2660_v37, 0.0  ;;  %v5140_v61 = vld [vmem:[%s8509_s5 + $0x88] sm:$0xf] }
 0x3b8   : > { %v3480_v63 = vmax.f32 %v2292_v52, 0.0 }
 0x3b9   : > { %v3796_v44 = vmax.f32 %v3795_v51, %v3529_v48  ;;  %v7151_v24 = vpop.f32.mrf.mxu0  ;;  %v5270_v48 = vld [vmem:[%s8509_s5 + $0x198] sm:$0xf0] }
 0x3ba   : > { %v3715_v33 = vmax.f32 %v3714_v58, %v3480_v63 }
 0x3bb   : > { %v2124_v11 = vpop.f32.mrf.mxu3 }
 0x3bc   : > { %v2125_v14 = vadd.f32 %v2124_v11, %v7052_v13  ;;  %v2661_v56 = vpop.f32.mrf.mxu2 }
 0x3bd   : > { %v2662_v45 = vadd.f32 %v2661_v56, %v2493_v10  ;;  %v2495_v16 = vpop.f32.mrf.mxu1 }
 0x3be   : > { %v2294_v30 = vadd.f32 %v8717_v31, %v2125_v14  ;;  %v5744_v31 = vld [vmem:[%s8509_s5 + $0x94] sm:$0xf0]  ;;  %v2496_v56 = vadd.f32 %v2495_v16, %v6909_v22 }
 0x3bf   : > { %v3533_v59 = vmax.f32 %v2662_v45, 0.0  ;;  %v5141_v52 = vor.u32 %v5744_v31, %v5140_v61  ;;  %v8720_v45 = vld [vmem:[#allocation64_spill] sm:$0xff] }
 0x3c0   : > { %v3484_v62 = vmax.f32 %v2294_v30, 0.0  ;;  %2166 = vmatmul.bf16.gmra.mxu3 %v6607_v55  ;;  %2534 = vmatmul.bf16.gmra.mxu1 %v8718_v12  ;;  %v5774_v30 = vld [vmem:[%s8509_s5 + $0x18c] sm:$0xf] }
 0x3c1   : > { %v3797_v51 = vmax.f32 %v3796_v44, %v3533_v59  ;;  %2703 = vmatmul.bf16.gmra.mxu2 %v6727_v54  ;;  %v7159_v58 = vpop.f32.mrf.mxu0  ;;  %v5273_v10 = vor.u32 %v5774_v30, %v5270_v48  ;;  %2767 = vmatpush.bf16.msrb.mxu3 %v5141_v52  ;;  %v5142_v30 = vld [vmem:[%s8509_s5 + $0x98] sm:$0xf0] }
 0x3c2   : > { %v3716_v37 = vmax.f32 %v3715_v33, %v3484_v62  ;;  %v8719_v33 = vld [vmem:[#allocation56_spill] sm:$0xff] }
 0x3c3   : > { %v2127_v9 = vpop.f32.mrf.mxu3  ;;  %3274 = vmatpush.bf16.msra.mxu2 %v5273_v10 }
 0x3c4   : > { %v2128_v63 = vadd.f32 %v2127_v9, %v7052_v13  ;;  %v2664_v44 = vpop.f32.mrf.mxu2  ;;  %2395 = vmatmul.bf16.gmra.mxu0 %v8719_v33  ;;  %v5742_v9 = vld [vmem:[%s8509_s5 + $0x8c] sm:$0xf] }
 0x3c5   : > { %v2665_v11 = vadd.f32 %v2664_v44, %v2496_v56  ;;  %v2497_v14 = vpop.f32.mrf.mxu1  ;;  %v5268_v56 = vld [vmem:[%s8509_s5 + $0x188] sm:$0xf] }
 0x3c6   : > { %v2297_v59 = vadd.f32 %v8720_v45, %v2128_v63  ;;  %v2498_v52 = vadd.f32 %v2497_v14, %v6909_v22  ;;  %v5145_v63 = vor.u32 %v5742_v9, %v5142_v30  ;;  %v8722_v14 = vld [vmem:[#allocation46_spill] sm:$0xff] }
 0x3c7   : > { %v3537_v62 = vmax.f32 %v2665_v11, 0.0 }
 0x3c8   : > { %v3488_v16 = vmax.f32 %v2297_v59, 0.0  ;;  %3105 = vmatpush.bf16.msra.mxu1 %v5145_v63  ;;  %v8721_v59 = vld [vmem:[#allocation65_spill] sm:$0xff] }
 0x3c9   : > { %v3798_v54 = vmax.f32 %v3797_v51, %v3537_v62  ;;  %v7177_v61 = vpop.f32.mrf.mxu0  ;;  %v5776_v51 = vld [vmem:[%s8509_s5 + $0x194] sm:$0xf0] }
 0x3ca   : > { %v3717_v31 = vmax.f32 %v3716_v37, %v3488_v16  ;;  %v5269_v10 = vor.u32 %v5776_v51, %v5268_v56 }
 0x3cb   : > { %v2129_v48 = vpop.f32.mrf.mxu3 }
 0x3cc   : > { %v2130_v37 = vadd.f32 %v2129_v48, %v7052_v13  ;;  %v2666_v44 = vpop.f32.mrf.mxu2  ;;  %2936 = vmatpush.bf16.msra.mxu0 %v5269_v10 }
 0x3cd   : > { %v2667_v11 = vadd.f32 %v2666_v44, %v2498_v52  ;;  %v2500_v45 = vpop.f32.mrf.mxu1 }
 0x3ce   : > { %v2299_v62 = vadd.f32 %v8721_v59, %v2130_v37  ;;  %v2501_v56 = vadd.f32 %v2500_v45, %v6909_v22  ;;  %v8723_v37 = vld [vmem:[#allocation59_spill] sm:$0xff] }
 0x3cf   : > { %v3541_v16 = vmax.f32 %v2667_v11, 0.0 }
 0x3d0   : > { %v3492_v55 = vmax.f32 %v2299_v62, 0.0  ;;  %2171 = vmatmul.bf16.gmra.mxu3 %v6630_v42  ;;  %2539 = vmatmul.bf16.gmra.mxu1 %v8722_v14 }
 0x3d1   : > { %v3799_v9 = vmax.f32 %v3798_v54, %v3541_v16  ;;  %2708 = vmatmul.bf16.gmra.mxu2 %v6743_v3  ;;  %v7197_v30 = vpop.f32.mrf.mxu0 }
 0x3d2   : > { %v3718_v48 = vmax.f32 %v3717_v31, %v3492_v55 }
 0x3d3   : > { %v2132_v52 = vpop.f32.mrf.mxu3 }
 0x3d4   : > { %v2133_v63 = vadd.f32 %v2132_v52, %v7052_v13  ;;  %v2669_v51 = vpop.f32.mrf.mxu2  ;;  %2400 = vmatmul.bf16.gmra.mxu0 %v8723_v37 }
 0x3d5   : > { %v2670_v44 = vadd.f32 %v2669_v51, %v2501_v56  ;;  %v2502_v10 = vpop.f32.mrf.mxu1 }
 0x3d6   : > { %v2302_v11 = vadd.f32 %v6954_v49, %v2133_v63  ;;  %v2503_v55 = vadd.f32 %v2502_v10, %v6909_v22  ;;  %v8724_v49 = vld [vmem:[#allocation48_spill] sm:$0xff] }
 0x3d7   : > { %v3545_v59 = vmax.f32 %v2670_v44, 0.0 }
 0x3d8   : > { %v3496_v62 = vmax.f32 %v2302_v11, 0.0 }
 0x3d9   : > { %v3800_v54 = vmax.f32 %v3799_v9, %v3545_v59  ;;  %v7203_v16 = vpop.f32.mrf.mxu0  ;;  %v8725_v59 = vld [vmem:[#allocation63_spill] sm:$0xff] }
 0x3da   : > { %v3719_v3 = vmax.f32 %v3718_v48, %v3496_v62 }
 0x3db   : > { %v2134_v31 = vpop.f32.mrf.mxu3 }
 0x3dc   : > { %v2135_v45 = vadd.f32 %v2134_v31, %v7052_v13  ;;  %v2671_v42 = vpop.f32.mrf.mxu2 }
 0x3dd   : > { %v2672_v52 = vadd.f32 %v2671_v42, %v2503_v55  ;;  %v2505_v46 = vpop.f32.mrf.mxu1 }
 0x3de   : > { %v2304_v43 = vadd.f32 %v6958_v34, %v2135_v45  ;;  %v2506_v44 = vadd.f32 %v2505_v46, %v6909_v22 }
 0x3df   : > { %v3549_v56 = vmax.f32 %v2672_v52, 0.0 }
 0x3e0   : > { %v3500_v51 = vmax.f32 %v2304_v43, 0.0  ;;  %2176 = vmatmul.bf16.gmra.mxu3 %v6641_v26  ;;  %2544 = vmatmul.bf16.gmra.mxu1 %v8724_v49 }
 0x3e1   : > { %v3801_v9 = vmax.f32 %v3800_v54, %v3549_v56  ;;  %2713 = vmatmul.bf16.gmra.mxu2 %v6765_v8  ;;  %v7211_v48 = vpop.f32.mrf.mxu0 }
 0x3e2   : > { %v3720_v63 = vmax.f32 %v3719_v3, %v3500_v51 }
 0x3e3   : > { %v2137_v10 = vpop.f32.mrf.mxu3 }
 0x3e4   : > { %v2138_v42 = vadd.f32 %v2137_v10, %v7052_v13  ;;  %v2674_v11 = vpop.f32.mrf.mxu2  ;;  %2405 = vmatmul.bf16.gmra.mxu0 %v8725_v59 }
 0x3e5   : > { %v2675_v34 = vadd.f32 %v2674_v11, %v2506_v44  ;;  %v2507_v43 = vpop.f32.mrf.mxu1 }
 0x3e6   : > { %v2307_v62 = vadd.f32 %v6968_v50, %v2138_v42  ;;  %v2508_v3 = vadd.f32 %v2507_v43, %v6909_v22  ;;  %v8726_v50 = vld [vmem:[#allocation50_spill] sm:$0xff] }
 0x3e7   : > { %v3553_v55 = vmax.f32 %v2675_v34, 0.0 }
 0x3e8   : > { %v3504_v31 = vmax.f32 %v2307_v62, 0.0  ;;  %v5252_v62 = vld [vmem:[%s8509_s5 + $0x168] sm:$0xf] }
 0x3e9   : > { %v3802_v54 = vmax.f32 %v3801_v9, %v3553_v55  ;;  %v7217_v45 = vpop.f32.mrf.mxu0 }
 0x3ea   : > { %v3721_v52 = vmax.f32 %v3720_v63, %v3504_v31 }
 0x3eb   : > { %v2139_v56 = vpop.f32.mrf.mxu3 }
 0x3ec   : > { %v2140_v46 = vadd.f32 %v2139_v56, %v7052_v13  ;;  %v2676_v51 = vpop.f32.mrf.mxu2  ;;  %v5236_v56 = vld [vmem:[%s8509_s5 + $0x148] sm:$0xf] }
 0x3ed   : > { %v2677_v10 = vadd.f32 %v2676_v51, %v2508_v3  ;;  %v2510_v8 = vpop.f32.mrf.mxu1 }
 0x3ee   : > { %v2309_v26 = vadd.f32 %v6972_v39, %v2140_v46  ;;  %v2511_v34 = vadd.f32 %v2510_v8, %v6909_v22  ;;  %v5768_v46 = vld [vmem:[%s8509_s5 + $0x154] sm:$0xf0] }
 0x3ef   : > { %v3557_v44 = vmax.f32 %v2677_v10, 0.0  ;;  %v5237_v10 = vor.u32 %v5768_v46, %v5236_v56  ;;  %v8727_v46 = vld [vmem:[#allocation51_spill] sm:$0xff] }
 0x3f0   : > { %v3508_v11 = vmax.f32 %v2309_v26, 0.0  ;;  %2181 = vmatmul.bf16.gmra.mxu3 %v6652_v7  ;;  %2549 = vmatmul.bf16.gmra.mxu1 %v8726_v50  ;;  %v5772_v26 = vld [vmem:[%s8509_s5 + $0x174] sm:$0xf0] }
 0x3f1   : > { %v3803_v9 = vmax.f32 %v3802_v54, %v3557_v44  ;;  %2718 = vmatmul.bf16.gmra.mxu2 %v6805_v60  ;;  %v7225_v63 = vpop.f32.mrf.mxu0  ;;  %v5253_v31 = vor.u32 %v5772_v26, %v5252_v62  ;;  %v5220_v62 = vld [vmem:[%s8509_s5 + $0x128] sm:$0xf]  ;;  %v5764_v26 = vld [vmem:[%s8509_s5 + $0x134] sm:$0xf0] }
 0x3f2   : > { %v3722_v42 = vmax.f32 %v3721_v52, %v3508_v11 }
 0x3f3   : > { %v2142_v43 = vpop.f32.mrf.mxu3  ;;  %2937 = vmatpush.bf16.msra.mxu0 %v5253_v31  ;;  %v5221_v31 = vor.u32 %v5764_v26, %v5220_v62  ;;  %v5740_v62 = vld [vmem:[%s8509_s5 + $0x74] sm:$0xf0]  ;;  %v5770_v26 = vld [vmem:[%s8509_s5 + $0x16c] sm:$0xf] }
 0x3f4   : > { %v2143_v39 = vadd.f32 %v2142_v43, %v7052_v13  ;;  %v2679_v55 = vpop.f32.mrf.mxu2  ;;  %2410 = vmatmul.bf16.gmra.mxu0 %v6991_v32 }
 0x3f5   : > { %v2680_v54 = vadd.f32 %v2679_v55, %v2511_v34  ;;  %v2512_v3 = vpop.f32.mrf.mxu1 }
 0x3f6   : > { %v2312_v52 = vadd.f32 %v6982_v53, %v2143_v39  ;;  %v2513_v34 = vadd.f32 %v2512_v3, %v6909_v22  ;;  %v5204_v3 = vld [vmem:[%s8509_s5 + $0x108] sm:$0xf] }
 0x3f7   : > { %v3561_v8 = vmax.f32 %v2680_v54, 0.0  ;;  %2938 = vmatpush.bf16.msra.mxu0 %v5237_v10 }
 0x3f8   : > { %v3512_v51 = vmax.f32 %v2312_v52, 0.0 }
 0x3f9   : > { %v3804_v44 = vmax.f32 %v3803_v9, %v3561_v8  ;;  %v7243_v11 = vpop.f32.mrf.mxu0  ;;  %v5760_v8 = vld [vmem:[%s8509_s5 + $0x114] sm:$0xf0] }
 0x3fa   : > { %v3723_v43 = vmax.f32 %v3722_v42, %v3512_v51  ;;  %v5205_v51 = vor.u32 %v5760_v8, %v5204_v3 }
 0x3fb   : > { %v2144_v53 = vpop.f32.mrf.mxu3  ;;  %2939 = vmatpush.bf16.msra.mxu0 %v5221_v31 }
 0x3fc   : > { %v2145_v39 = vadd.f32 %v2144_v53, %v7052_v13  ;;  %v2681_v55 = vpop.f32.mrf.mxu2  ;;  %v5124_v53 = vld [vmem:[%s8509_s5 + $0x68] sm:$0xf] }
 0x3fd   : > { %v2682_v9 = vadd.f32 %v2681_v55, %v2513_v34  ;;  %v2515_v54 = vpop.f32.mrf.mxu1  ;;  %v5125_v55 = vor.u32 %v5740_v62, %v5124_v53 }
 0x3fe   : > { %v2314_v42 = vadd.f32 %v6986_v15, %v2145_v39 }
 0x3ff   : > { %v3565_v52 = vmax.f32 %v2682_v9, 0.0  ;;  %2940 = vmatpush.bf16.msra.mxu0 %v5205_v51  ;;  %2768 = vmatpush.bf16.msrb.mxu3 %v5125_v55 }
 0x400   : > { %v3516_v56 = vmax.f32 %v2314_v42, 0.0  ;;  %2186 = vmatmul.bf16.gmra.mxu3 %v6687_v23  ;;  %2554 = vmatmul.bf16.gmra.mxu1 %v8727_v46 }
 0x401   : > { %v3805_v10 = vmax.f32 %v3804_v44, %v3565_v52  ;;  %2723 = vmatmul.bf16.gmra.mxu2 %v6839_v0  ;;  %v7263_v15 = vpop.f32.mrf.mxu0  ;;  %v2516_v44 = vadd.f32 %v2515_v54, %v6909_v22 }
 0x402   : > { %v3724_v34 = vmax.f32 %v3723_v43, %v3516_v56  ;;  %v5254_v43 = vld [vmem:[%s8509_s5 + $0x178] sm:$0xf0] }
 0x403   : > { %v2147_v39 = vpop.f32.mrf.mxu3  ;;  %v5257_v42 = vor.u32 %v5770_v26, %v5254_v43  ;;  %v5126_v26 = vld [vmem:[%s8509_s5 + $0x78] sm:$0xf0] }
 0x404   : > { %v2148_v31 = vadd.f32 %v2147_v39, %v7052_v13  ;;  %v2684_v9 = vpop.f32.mrf.mxu2  ;;  %2415 = vmatmul.bf16.gmra.mxu0 %v7029_v21  ;;  %v5738_v39 = vld [vmem:[%s8509_s5 + $0x6c] sm:$0xf] }
 0x405   : > { %v2685_v52 = vadd.f32 %v2684_v9, %v2516_v44  ;;  %v2517_v3 = vpop.f32.mrf.mxu1  ;;  %3275 = vmatpush.bf16.msra.mxu2 %v5257_v42  ;;  %v5129_v43 = vor.u32 %v5738_v39, %v5126_v26 }
 0x406   : > { %v2317_v8 = vadd.f32 %v6996_v47, %v2148_v31  ;;  %v2518_v44 = vadd.f32 %v2517_v3, %v6909_v22 }
 0x407   : > { %v3569_v56 = vmax.f32 %v2685_v52, 0.0  ;;  %3106 = vmatpush.bf16.msra.mxu1 %v5129_v43 }
 0x408   : > { %v3520_v54 = vmax.f32 %v2317_v8, 0.0  ;;  %v8728_v8 = vld [vmem:[#allocation53_spill] sm:$0xff] }
 0x409   : > { %v3806_v51 = vmax.f32 %v3805_v10, %v3569_v56  ;;  %v7281_v53 = vpop.f32.mrf.mxu0 }
 0x40a   : > { %v3725_v62 = vmax.f32 %v3724_v34, %v3520_v54 }
 0x40b   : > { %v2149_v55 = vpop.f32.mrf.mxu3 }
 0x40c   : > { %v2150_v47 = vadd.f32 %v2149_v55, %v7052_v13  ;;  %v2686_v31 = vpop.f32.mrf.mxu2 }
 0x40d   : > { %v2687_v9 = vadd.f32 %v2686_v31, %v2518_v44  ;;  %v2520_v10 = vpop.f32.mrf.mxu1 }
 0x40e   : > { %v2319_v34 = vadd.f32 %v7012_v20, %v2150_v47  ;;  %v2521_v39 = vadd.f32 %v2520_v10, %v6909_v22  ;;  %v8729_v47 = vld [vmem:[#allocation71_spill] sm:$0xff] }
 0x40f   : > { %v3573_v42 = vmax.f32 %v2687_v9, 0.0 }
 0x410   : > { %v3524_v52 = vmax.f32 %v2319_v34, 0.0  ;;  %2191 = vmatmul.bf16.gmra.mxu3 %v8714_v41  ;;  %2559 = vmatmul.bf16.gmra.mxu1 %v8728_v8 }
 0x411   : > { %v3807_v56 = vmax.f32 %v3806_v51, %v3573_v42  ;;  %2728 = vmatmul.bf16.gmra.mxu2 %v8715_v25  ;;  %v7295_v3 = vpop.f32.mrf.mxu0 }
 0x412   : > { %v3726_v54 = vmax.f32 %v3725_v62, %v3524_v52 }
 0x413   : > { %v2152_v26 = vpop.f32.mrf.mxu3 }
 0x414   : > { %v2153_v44 = vadd.f32 %v2152_v26, %v7052_v13  ;;  %v2689_v55 = vpop.f32.mrf.mxu2  ;;  %2420 = vmatmul.bf16.gmra.mxu0 %v7043_v36 }
 0x415   : > { %v2690_v20 = vadd.f32 %v2689_v55, %v2521_v39  ;;  %v2522_v43 = vpop.f32.mrf.mxu1 }
 0x416   : > { %v2322_v31 = vadd.f32 %v8729_v47, %v2153_v44  ;;  %v2523_v62 = vadd.f32 %v2522_v43, %v6909_v22  ;;  %v8730_v44 = vld [vmem:[#allocation55_spill] sm:$0xff] }
 0x417   : > { %v3577_v9 = vmax.f32 %v2690_v20, 0.0 }
 0x418   : > { %v3528_v34 = vmax.f32 %v2322_v31, 0.0 }
 0x419   : > { %v3808_v51 = vmax.f32 %v3807_v56, %v3577_v9  ;;  %v7301_v42 = vpop.f32.mrf.mxu0  ;;  %v8731_v9 = vld [vmem:[#allocation9_spill] sm:$0xff] }
 0x41a   : > { %v3727_v25 = vmax.f32 %v3726_v54, %v3528_v34 }
 0x41b   : > { %v2154_v52 = vpop.f32.mrf.mxu3 }
 0x41c   : > { %v2155_v10 = vadd.f32 %v2154_v52, %v7052_v13  ;;  %v2691_v41 = vpop.f32.mrf.mxu2 }
 0x41d   : > { %v2692_v26 = vadd.f32 %v2691_v41, %v2523_v62  ;;  %v2525_v0 = vpop.f32.mrf.mxu1 }
 0x41e   : > { %v2324_v23 = vadd.f32 %v7038_v57, %v2155_v10  ;;  %v2526_v43 = vadd.f32 %v2525_v0, %v6909_v22 }
 0x41f   : > { %v3581_v39 = vmax.f32 %v2692_v26, 0.0 }
 0x420   : > { %v3532_v55 = vmax.f32 %v2324_v23, 0.0  ;;  %2196 = vmatmul.bf16.gmra.mxu3 %v8718_v12  ;;  %2564 = vmatmul.bf16.gmra.mxu1 %v8730_v44 }
 0x421   : > { %v3809_v56 = vmax.f32 %v3808_v51, %v3581_v39  ;;  %2733 = vmatmul.bf16.gmra.mxu2 %v8719_v33  ;;  %v7309_v54 = vpop.f32.mrf.mxu0 }
 0x422   : > { %v3728_v20 = vmax.f32 %v3727_v25, %v3532_v55 }
 0x423   : > { %v2157_v47 = vpop.f32.mrf.mxu3 }
 0x424   : > { %v2158_v41 = vadd.f32 %v2157_v47, %v7052_v13  ;;  %v2694_v31 = vpop.f32.mrf.mxu2  ;;  %2941 = vmatmul.bf16.vlgmr.msra.gmra.mxu0 %v8731_v9 }
 0x425   : > { %v2695_v57 = vadd.f32 %v2694_v31, %v2526_v43  ;;  %v2527_v23 = vpop.f32.mrf.mxu1 }
 0x426   : > { %v2327_v34 = vadd.f32 %v7048_v40, %v2158_v41  ;;  %v2528_v25 = vadd.f32 %v2527_v23, %v6909_v22  ;;  %v8732_v40 = vld [vmem:[#allocation58_spill] sm:$0xff] }
 0x427   : > { %v3585_v62 = vmax.f32 %v2695_v57, 0.0 }
 0x428   : > { %v3536_v52 = vmax.f32 %v2327_v34, 0.0 }
 0x429   : > { %v3810_v51 = vmax.f32 %v3809_v56, %v3585_v62  ;;  %v7315_v10 = vpop.f32.mrf.mxu0 }
 0x42a   : > { %v3729_v26 = vmax.f32 %v3728_v20, %v3536_v52  ;;  %v8733_v52 = vld [vmem:[#allocation11_spill] sm:$0xff] }
 0x42b   : > { %v2159_v39 = vpop.f32.mrf.mxu3 }
 0x42c   : > { %v2160_v0 = vadd.f32 %v2159_v39, %v7052_v13  ;;  %v2696_v55 = vpop.f32.mrf.mxu2 }
 0x42d   : > { %v2697_v47 = vadd.f32 %v2696_v55, %v2528_v25  ;;  %v2530_v33 = vpop.f32.mrf.mxu1 }
 0x42e   : > { %v2329_v12 = vadd.f32 %v7056_v28, %v2160_v0  ;;  %v2531_v57 = vadd.f32 %v2530_v33, %v6909_v22 }
 0x42f   : > { %v3589_v43 = vmax.f32 %v2697_v47, 0.0 }
 0x430   : > { %v3540_v31 = vmax.f32 %v2329_v12, 0.0  ;;  %2201 = vmatmul.bf16.gmra.mxu3 %v8722_v14  ;;  %2569 = vmatmul.bf16.gmra.mxu1 %v8732_v40 }
 0x431   : > { %v3811_v56 = vmax.f32 %v3810_v51, %v3589_v43  ;;  %2738 = vmatmul.bf16.gmra.mxu2 %v8723_v37  ;;  %v7323_v20 = vpop.f32.mrf.mxu0 }
 0x432   : > { %v3730_v41 = vmax.f32 %v3729_v26, %v3540_v31 }
 0x433   : > { %v2162_v23 = vpop.f32.mrf.mxu3 }
 0x434   : > { %v2163_v34 = vadd.f32 %v2162_v23, %v7052_v13  ;;  %v2699_v62 = vpop.f32.mrf.mxu2  ;;  %2946 = vmatmul.bf16.gmra.mxu0 %v8733_v52 }
 0x435   : > { %v2700_v28 = vadd.f32 %v2699_v62, %v2531_v57  ;;  %v2532_v12 = vpop.f32.mrf.mxu1 }
 0x436   : > { %v2332_v25 = vadd.f32 %v7065_v18, %v2163_v34  ;;  %v2533_v26 = vadd.f32 %v2532_v12, %v6909_v22  ;;  %v8734_v18 = vld [vmem:[#allocation62_spill] sm:$0xff] }
 0x437   : > { %v3593_v39 = vmax.f32 %v2700_v28, 0.0  ;;  %v5108_v28 = vld [vmem:[%s8509_s5 + $0x48] sm:$0xf] }
 0x438   : > { %v3544_v0 = vmax.f32 %v2332_v25, 0.0 }
 0x439   : > { %v3812_v51 = vmax.f32 %v3811_v56, %v3593_v39  ;;  %v7329_v55 = vpop.f32.mrf.mxu0 }
 0x43a   : > { %v3731_v47 = vmax.f32 %v3730_v41, %v3544_v0  ;;  %v5238_v0 = vld [vmem:[%s8509_s5 + $0x158] sm:$0xf0] }
 0x43b   : > { %v2164_v43 = vpop.f32.mrf.mxu3 }
 0x43c   : > { %v2165_v33 = vadd.f32 %v2164_v43, %v7052_v13  ;;  %v2701_v31 = vpop.f32.mrf.mxu2 }
 0x43d   : > { %v2702_v23 = vadd.f32 %v2701_v31, %v2533_v26  ;;  %v2535_v37 = vpop.f32.mrf.mxu1  ;;  %v8735_v26 = vld [vmem:[#allocation13_spill] sm:$0xff] }
 0x43e   : > { %v2334_v14 = vadd.f32 %v7071_v5, %v2165_v33  ;;  %v5736_v5 = vld [vmem:[%s8509_s5 + $0x54] sm:$0xf0]  ;;  %v2536_v12 = vadd.f32 %v2535_v37, %v6909_v22 }
 0x43f   : > { %v3597_v57 = vmax.f32 %v2702_v23, 0.0  ;;  %v5109_v39 = vor.u32 %v5736_v5, %v5108_v28 }
 0x440   : > { %v3548_v62 = vmax.f32 %v2334_v14, 0.0  ;;  %2206 = vmatmul.bf16.gmra.mxu3 %v8724_v49  ;;  %2574 = vmatmul.bf16.gmra.mxu1 %v8734_v18  ;;  %v5766_v14 = vld [vmem:[%s8509_s5 + $0x14c] sm:$0xf] }
 0x441   : > { %v3813_v56 = vmax.f32 %v3812_v51, %v3597_v57  ;;  %2743 = vmatmul.bf16.gmra.mxu2 %v8725_v59  ;;  %v7337_v41 = vpop.f32.mrf.mxu0  ;;  %v5241_v43 = vor.u32 %v5766_v14, %v5238_v0  ;;  %2769 = vmatpush.bf16.msrb.mxu3 %v5109_v39  ;;  %v5110_v14 = vld [vmem:[%s8509_s5 + $0x58] sm:$0xf0] }
 0x442   : > { %v3732_v34 = vmax.f32 %v3731_v47, %v3548_v62 }
 0x443   : > { %v2167_v25 = vpop.f32.mrf.mxu3  ;;  %3276 = vmatpush.bf16.msra.mxu2 %v5241_v43 }
 0x444   : > { %v2168_v51 = vadd.f32 %v2167_v25, %v7052_v13  ;;  %v2704_v47 = vpop.f32.mrf.mxu2  ;;  %2951 = vmatmul.bf16.gmra.mxu0 %v8735_v26  ;;  %v5734_v25 = vld [vmem:[%s8509_s5 + $0x4c] sm:$0xf] }
 0x445   : > { %v2705_v33 = vadd.f32 %v2704_v47, %v2536_v12  ;;  %v2537_v31 = vpop.f32.mrf.mxu1  ;;  %v5113_v0 = vor.u32 %v5734_v25, %v5110_v14 }
 0x446   : > { %v2337_v23 = vadd.f32 %v7079_v17, %v2168_v51  ;;  %v2538_v12 = vadd.f32 %v2537_v31, %v6909_v22 }
 0x447   : > { %v3601_v57 = vmax.f32 %v2705_v33, 0.0  ;;  %3107 = vmatpush.bf16.msra.mxu1 %v5113_v0  ;;  %v8737_v0 = vld [vmem:[#allocation15_spill] sm:$0xff] }
 0x448   : > { %v3552_v37 = vmax.f32 %v2337_v23, 0.0  ;;  %v8736_v23 = vld [vmem:[#allocation66_spill] sm:$0xff] }
 0x449   : > { %v3814_v62 = vmax.f32 %v3813_v56, %v3601_v57  ;;  %v7355_v28 = vpop.f32.mrf.mxu0 }
 0x44a   : > { %v3733_v5 = vmax.f32 %v3732_v34, %v3552_v37 }
 0x44b   : > { %v2169_v39 = vpop.f32.mrf.mxu3 }
 0x44c   : > { %v2170_v17 = vadd.f32 %v2169_v39, %v7052_v13  ;;  %v2706_v51 = vpop.f32.mrf.mxu2 }
 0x44d   : > { %v2707_v47 = vadd.f32 %v2706_v51, %v2538_v12  ;;  %v2540_v56 = vpop.f32.mrf.mxu1 }
 0x44e   : > { %v2339_v34 = vadd.f32 %v7097_v27, %v2170_v17  ;;  %v2541_v25 = vadd.f32 %v2540_v56, %v6909_v22 }
 0x44f   : > { %v3605_v43 = vmax.f32 %v2707_v47, 0.0 }
 0x450   : > { %v3556_v33 = vmax.f32 %v2339_v34, 0.0  ;;  %2211 = vmatmul.bf16.gmra.mxu3 %v8726_v50  ;;  %2579 = vmatmul.bf16.gmra.mxu1 %v8736_v23  ;;  %v8738_v50 = vld [vmem:[#allocation67_spill] sm:$0xff] }
 0x451   : > { %v3815_v57 = vmax.f32 %v3814_v62, %v3605_v43  ;;  %2748 = vmatmul.bf16.gmra.mxu2 %v6991_v32  ;;  %v7369_v31 = vpop.f32.mrf.mxu0  ;;  %v5730_v62 = vld [vmem:[%s8509_s5 + $0x2c] sm:$0xf] }
 0x452   : > { %v3734_v37 = vmax.f32 %v3733_v5, %v3556_v33  ;;  %v5094_v5 = vld [vmem:[%s8509_s5 + $0x38] sm:$0xf0]  ;;  %v5762_v43 = vld [vmem:[%s8509_s5 + $0x12c] sm:$0xf] }
 0x453   : > { %v2172_v14 = vpop.f32.mrf.mxu3  ;;  %v5097_v34 = vor.u32 %v5730_v62, %v5094_v5  ;;  %v5222_v33 = vld [vmem:[%s8509_s5 + $0x138] sm:$0xf0] }
 0x454   : > { %v2173_v12 = vadd.f32 %v2172_v14, %v7052_v13  ;;  %v2709_v39 = vpop.f32.mrf.mxu2  ;;  %2956 = vmatmul.bf16.gmra.mxu0 %v8737_v0  ;;  %v5225_v14 = vor.u32 %v5762_v43, %v5222_v33  ;;  %v5078_v62 = vld [vmem:[%s8509_s5 + $0x18] sm:$0xf0] }
 0x455   : > { %v2710_v27 = vadd.f32 %v2709_v39, %v2541_v25  ;;  %v2542_v17 = vpop.f32.mrf.mxu1  ;;  %3108 = vmatpush.bf16.msra.mxu1 %v5097_v34 }
 0x456   : > { %v2342_v51 = vadd.f32 %v7117_v35, %v2173_v12  ;;  %v2543_v39 = vadd.f32 %v2542_v17, %v6909_v22  ;;  %3277 = vmatpush.bf16.msra.mxu2 %v5225_v14  ;;  %v5206_v17 = vld [vmem:[%s8509_s5 + $0x118] sm:$0xf0] }
 0x457   : > { %v3609_v47 = vmax.f32 %v2710_v27, 0.0 }
 0x458   : > { %v3560_v56 = vmax.f32 %v2342_v51, 0.0  ;;  %v5726_v51 = vld [vmem:[%s8509_s5 + $0xc] sm:$0xf] }
 0x459   : > { %v3816_v35 = vmax.f32 %v3815_v57, %v3609_v47  ;;  %v7387_v25 = vpop.f32.mrf.mxu0  ;;  %v5758_v57 = vld [vmem:[%s8509_s5 + $0x10c] sm:$0xf]  ;;  %v5081_v5 = vor.u32 %v5726_v51, %v5078_v62 }
 0x45a   : > { %v3735_v12 = vmax.f32 %v3734_v37, %v3560_v56  ;;  %v5209_v43 = vor.u32 %v5758_v57, %v5206_v17 }
 0x45b   : > { %v2174_v27 = vpop.f32.mrf.mxu3  ;;  %3109 = vmatpush.bf16.msra.mxu1 %v5081_v5 }
 0x45c   : > { %v2175_v47 = vadd.f32 %v2174_v27, %v7052_v13  ;;  %v2711_v37 = vpop.f32.mrf.mxu2  ;;  %3278 = vmatpush.bf16.msra.mxu2 %v5209_v43 }
 0x45d   : > { %v2712_v56 = vadd.f32 %v2711_v37, %v2543_v39  ;;  %v2545_v34 = vpop.f32.mrf.mxu1 }
 0x45e   : > { %v2344_v33 = vadd.f32 %v7123_v38, %v2175_v47  ;;  %v2546_v39 = vadd.f32 %v2545_v34, %v6909_v22  ;;  %v8739_v47 = vld [vmem:[#allocation17_spill] sm:$0xff] }
 0x45f   : > { %v3613_v14 = vmax.f32 %v2712_v56, 0.0 }
 0x460   : > { %v3564_v32 = vmax.f32 %v2344_v33, 0.0  ;;  %2216 = vmatmul.bf16.gmra.mxu3 %v8727_v46  ;;  %2584 = vmatmul.bf16.gmra.mxu1 %v8738_v50 }
 0x461   : > { %v3817_v27 = vmax.f32 %v3816_v35, %v3613_v14  ;;  %2753 = vmatmul.bf16.gmra.mxu2 %v7029_v21  ;;  %v7407_v51 = vpop.f32.mrf.mxu0 }
 0x462   : > { %v3736_v62 = vmax.f32 %v3735_v12, %v3564_v32 }
 0x463   : > { %v2177_v37 = vpop.f32.mrf.mxu3 }
 0x464   : > { %v2178_v57 = vadd.f32 %v2177_v37, %v7052_v13  ;;  %v2714_v38 = vpop.f32.mrf.mxu2  ;;  %2961 = vmatmul.bf16.gmra.mxu0 %v8739_v47 }
 0x465   : > { %v2715_v5 = vadd.f32 %v2714_v38, %v2546_v39  ;;  %v2547_v17 = vpop.f32.mrf.mxu1 }
 0x466   : > { %v2347_v56 = vadd.f32 %v7131_v29, %v2178_v57  ;;  %v2548_v32 = vadd.f32 %v2547_v17, %v6909_v22  ;;  %v8740_v29 = vld [vmem:[#allocation68_spill] sm:$0xff] }
 0x467   : > { %v3617_v43 = vmax.f32 %v2715_v5, 0.0 }
 0x468   : > { %v3568_v33 = vmax.f32 %v2347_v56, 0.0 }
 0x469   : > { %v3818_v35 = vmax.f32 %v3817_v27, %v3617_v43  ;;  %v7413_v14 = vpop.f32.mrf.mxu0  ;;  %v8741_v43 = vld [vmem:[#allocation19_spill] sm:$0xff] }
 0x46a   : > { %v3737_v21 = vmax.f32 %v3736_v62, %v3568_v33 }
 0x46b   : > { %v2179_v12 = vpop.f32.mrf.mxu3 }
 0x46c   : > { %v2180_v34 = vadd.f32 %v2179_v12, %v7052_v13  ;;  %v2716_v46 = vpop.f32.mrf.mxu2 }
 0x46d   : > { %v2717_v37 = vadd.f32 %v2716_v46, %v2548_v32  ;;  %v2550_v59 = vpop.f32.mrf.mxu1 }
 0x46e   : > { %v2349_v49 = vadd.f32 %v7137_v6, %v2180_v34  ;;  %v2551_v5 = vadd.f32 %v2550_v59, %v6909_v22 }
 0x46f   : > { %v3621_v39 = vmax.f32 %v2717_v37, 0.0 }
 0x470   : > { %v3572_v38 = vmax.f32 %v2349_v49, 0.0  ;;  %2221 = vmatmul.bf16.gmra.mxu3 %v8728_v8  ;;  %2589 = vmatmul.bf16.gmra.mxu1 %v8740_v29 }
 0x471   : > { %v3819_v27 = vmax.f32 %v3818_v35, %v3621_v39  ;;  %2758 = vmatmul.bf16.gmra.mxu2 %v7043_v36  ;;  %v7421_v62 = vpop.f32.mrf.mxu0 }
 0x472   : > { %v3738_v57 = vmax.f32 %v3737_v21, %v3572_v38 }
 0x473   : > { %v2182_v17 = vpop.f32.mrf.mxu3 }
 0x474   : > { %v2183_v46 = vadd.f32 %v2182_v17, %v7052_v13  ;;  %v2719_v56 = vpop.f32.mrf.mxu2  ;;  %2966 = vmatmul.bf16.gmra.mxu0 %v8741_v43 }
 0x475   : > { %v2720_v6 = vadd.f32 %v2719_v56, %v2551_v5  ;;  %v2552_v49 = vpop.f32.mrf.mxu1 }
 0x476   : > { %v2352_v33 = vadd.f32 %v7145_v2, %v2183_v46  ;;  %v2553_v21 = vadd.f32 %v2552_v49, %v6909_v22  ;;  %v8742_v2 = vld [vmem:[#allocation8_spill] sm:$0xff] }
 0x477   : > { %v3625_v32 = vmax.f32 %v2720_v6, 0.0  ;;  %v5092_v6 = vld [vmem:[%s8509_s5 + $0x28] sm:$0xf] }
 0x478   : > { %v3576_v12 = vmax.f32 %v2352_v33, 0.0 }
 0x479   : > { %v3820_v35 = vmax.f32 %v3819_v27, %v3625_v32  ;;  %v7427_v34 = vpop.f32.mrf.mxu0 }
 0x47a   : > { %v3739_v37 = vmax.f32 %v3738_v57, %v3576_v12 }
 0x47b   : > { %v2184_v39 = vpop.f32.mrf.mxu3 }
 0x47c   : > { %v2185_v59 = vadd.f32 %v2184_v39, %v7052_v13  ;;  %v2721_v38 = vpop.f32.mrf.mxu2 }
 0x47d   : > { %v2722_v17 = vadd.f32 %v2721_v38, %v2553_v21  ;;  %v2555_v36 = vpop.f32.mrf.mxu1 }
 0x47e   : > { %v2354_v8 = vadd.f32 %v7151_v24, %v2185_v59  ;;  %v5732_v24 = vld [vmem:[%s8509_s5 + $0x34] sm:$0xf0] }
 0x47f   : > { %v3629_v5 = vmax.f32 %v2722_v17, 0.0  ;;  %v5093_v33 = vor.u32 %v5732_v24, %v5092_v6 }
 0x480   : > { %v3580_v56 = vmax.f32 %v2354_v8, 0.0  ;;  %2226 = vmatmul.bf16.gmra.mxu3 %v8730_v44  ;;  %3110 = vmatmul.bf16.vlgmr.msra.gmra.mxu1 %v8742_v2  ;;  %v2556_v8 = vadd.f32 %v2555_v36, %v6909_v22 }
 0x481   : > { %v3821_v27 = vmax.f32 %v3820_v35, %v3629_v5  ;;  %3279 = vmatmul.bf16.vlgmr.msra.gmra.mxu2 %v8731_v9  ;;  %v7435_v57 = vpop.f32.mrf.mxu0  ;;  %v8743_v35 = vld [vmem:[#allocation21_spill] sm:$0xff]  ;;  %2770 = vmatpush.bf16.msrb.mxu3 %v5093_v33 }
 0x482   : > { %v3740_v46 = vmax.f32 %v3739_v37, %v3580_v56 }
 0x483   : > { %v2187_v49 = vpop.f32.mrf.mxu3 }
 0x484   : > { %v2188_v32 = vadd.f32 %v2187_v49, %v7052_v13  ;;  %v2724_v12 = vpop.f32.mrf.mxu2  ;;  %2971 = vmatmul.bf16.gmra.mxu0 %v8743_v35 }
 0x485   : > { %v2725_v9 = vadd.f32 %v2724_v12, %v2556_v8  ;;  %v2557_v21 = vpop.f32.mrf.mxu1 }
 0x486   : > { %v2357_v37 = vadd.f32 %v7159_v58, %v2188_v32  ;;  %v2558_v36 = vadd.f32 %v2557_v21, %v6909_v22  ;;  %v8744_v58 = vld [vmem:[#allocation10_spill] sm:$0xff] }
 0x487   : > { %v3633_v39 = vmax.f32 %v2725_v9, 0.0 }
 0x488   : > { %v3584_v59 = vmax.f32 %v2357_v37, 0.0 }
 0x489   : > { %v3822_v38 = vmax.f32 %v3821_v27, %v3633_v39  ;;  %v7447_v17 = vpop.f32.mrf.mxu0 }
 0x48a   : > { %v3741_v5 = vmax.f32 %v3740_v46, %v3584_v59  ;;  %v8745_v59 = vld [vmem:[#allocation23_spill] sm:$0xff] }
 0x48b   : > { %v2189_v56 = vpop.f32.mrf.mxu3 }
 0x48c   : > { %v2190_v6 = vadd.f32 %v2189_v56, %v7052_v13  ;;  %v2726_v24 = vpop.f32.mrf.mxu2 }
 0x48d   : > { %v2727_v49 = vadd.f32 %v2726_v24, %v2558_v36  ;;  %v2560_v44 = vpop.f32.mrf.mxu1 }
 0x48e   : > { %v2359_v8 = vadd.f32 %v7177_v61, %v2190_v6  ;;  %v2561_v9 = vadd.f32 %v2560_v44, %v6909_v22 }
 0x48f   : > { %v3637_v12 = vmax.f32 %v2727_v49, 0.0 }
 0x490   : > { %v3588_v33 = vmax.f32 %v2359_v8, 0.0  ;;  %2231 = vmatmul.bf16.gmra.mxu3 %v8732_v40  ;;  %3115 = vmatmul.bf16.gmra.mxu1 %v8744_v58 }
 0x491   : > { %v3823_v27 = vmax.f32 %v3822_v38, %v3637_v12  ;;  %3284 = vmatmul.bf16.gmra.mxu2 %v8733_v52  ;;  %v7455_v46 = vpop.f32.mrf.mxu0 }
 0x492   : > { %v3742_v32 = vmax.f32 %v3741_v5, %v3588_v33 }
 0x493   : > { %v2192_v21 = vpop.f32.mrf.mxu3 }
 0x494   : > { %v2193_v37 = vadd.f32 %v2192_v21, %v7052_v13  ;;  %v2729_v39 = vpop.f32.mrf.mxu2  ;;  %2976 = vmatmul.bf16.gmra.mxu0 %v8745_v59 }
 0x495   : > { %v2730_v61 = vadd.f32 %v2729_v39, %v2561_v9  ;;  %v2562_v36 = vpop.f32.mrf.mxu1 }
 0x496   : > { %v2362_v56 = vadd.f32 %v7197_v30, %v2193_v37  ;;  %v2563_v5 = vadd.f32 %v2562_v36, %v6909_v22  ;;  %v8746_v30 = vld [vmem:[#allocation12_spill] sm:$0xff] }
 0x497   : > { %v3641_v6 = vmax.f32 %v2730_v61, 0.0 }
 0x498   : > { %v3592_v24 = vmax.f32 %v2362_v56, 0.0 }
 0x499   : > { %v3824_v38 = vmax.f32 %v3823_v27, %v3641_v6  ;;  %v7461_v49 = vpop.f32.mrf.mxu0 }
 0x49a   : > { %v3743_v52 = vmax.f32 %v3742_v32, %v3592_v24  ;;  %v8747_v24 = vld [vmem:[#allocation24_spill] sm:$0xff] }
 0x49b   : > { %v2194_v8 = vpop.f32.mrf.mxu3 }
 0x49c   : > { %v2195_v44 = vadd.f32 %v2194_v8, %v7052_v13  ;;  %v2731_v12 = vpop.f32.mrf.mxu2 }
 0x49d   : > { %v2732_v33 = vadd.f32 %v2731_v12, %v2563_v5  ;;  %v2565_v21 = vpop.f32.mrf.mxu1 }
 0x49e   : > { %v2364_v40 = vadd.f32 %v7203_v16, %v2195_v44  ;;  %v2566_v61 = vadd.f32 %v2565_v21, %v6909_v22 }
 0x49f   : > { %v3645_v9 = vmax.f32 %v2732_v33, 0.0 }
 0x4a0   : > { %v3596_v39 = vmax.f32 %v2364_v40, 0.0  ;;  %2236 = vmatmul.bf16.gmra.mxu3 %v8734_v18  ;;  %3120 = vmatmul.bf16.gmra.mxu1 %v8746_v30 }
 0x4a1   : > { %v3825_v27 = vmax.f32 %v3824_v38, %v3645_v9  ;;  %3289 = vmatmul.bf16.gmra.mxu2 %v8735_v26  ;;  %v7469_v32 = vpop.f32.mrf.mxu0 }
 0x4a2   : > { %v3744_v37 = vmax.f32 %v3743_v52, %v3596_v39 }
 0x4a3   : > { %v2197_v36 = vpop.f32.mrf.mxu3 }
 0x4a4   : > { %v2198_v56 = vadd.f32 %v2197_v36, %v7052_v13  ;;  %v2734_v6 = vpop.f32.mrf.mxu2  ;;  %2981 = vmatmul.bf16.gmra.mxu0 %v8747_v24 }
 0x4a5   : > { %v2735_v16 = vadd.f32 %v2734_v6, %v2566_v61  ;;  %v2567_v40 = vpop.f32.mrf.mxu1 }
 0x4a6   : > { %v2367_v5 = vadd.f32 %v7211_v48, %v2198_v56  ;;  %v2568_v52 = vadd.f32 %v2567_v40, %v6909_v22  ;;  %v8748_v48 = vld [vmem:[#allocation14_spill] sm:$0xff] }
 0x4a7   : > { %v3649_v8 = vmax.f32 %v2735_v16, 0.0 }
 0x4a8   : > { %v3600_v44 = vmax.f32 %v2367_v5, 0.0 }
 0x4a9   : > { %v3826_v38 = vmax.f32 %v3825_v27, %v3649_v8  ;;  %v7475_v12 = vpop.f32.mrf.mxu0 }
 0x4aa   : > { %v3745_v26 = vmax.f32 %v3744_v37, %v3600_v44  ;;  %v8749_v44 = vld [vmem:[#allocation26_spill] sm:$0xff] }
 0x4ab   : > { %v2199_v33 = vpop.f32.mrf.mxu3 }
 0x4ac   : > { %v2200_v21 = vadd.f32 %v2199_v33, %v7052_v13  ;;  %v2736_v9 = vpop.f32.mrf.mxu2 }
 0x4ad   : > { %v2737_v39 = vadd.f32 %v2736_v9, %v2568_v52  ;;  %v2570_v36 = vpop.f32.mrf.mxu1 }
 0x4ae   : > { %v2369_v18 = vadd.f32 %v7217_v45, %v2200_v21  ;;  %v2571_v16 = vadd.f32 %v2570_v36, %v6909_v22  ;;  %v5076_v36 = vld [vmem:[%s8509_s5 + $0x8] sm:$0xf] }
 0x4af   : > { %v3653_v61 = vmax.f32 %v2737_v39, 0.0 }
 0x4b0   : > { %v3604_v6 = vmax.f32 %v2369_v18, 0.0  ;;  %2241 = vmatmul.bf16.gmra.mxu3 %v8736_v23  ;;  %3125 = vmatmul.bf16.gmra.mxu1 %v8748_v48 }
 0x4b1   : > { %v3827_v27 = vmax.f32 %v3826_v38, %v3653_v61  ;;  %3294 = vmatmul.bf16.gmra.mxu2 %v8737_v0  ;;  %v7483_v37 = vpop.f32.mrf.mxu0  ;;  %v5728_v61 = vld [vmem:[%s8509_s5 + $0x14] sm:$0xf0] }
 0x4b2   : > { %v3746_v56 = vmax.f32 %v3745_v26, %v3604_v6 }
 0x4b3   : > { %v2202_v40 = vpop.f32.mrf.mxu3 }
 0x4b4   : > { %v2203_v5 = vadd.f32 %v2202_v40, %v7052_v13  ;;  %v2739_v8 = vpop.f32.mrf.mxu2  ;;  %2986 = vmatmul.bf16.gmra.mxu0 %v8749_v44 }
 0x4b5   : > { %v2740_v45 = vadd.f32 %v2739_v8, %v2571_v16  ;;  %v2572_v18 = vpop.f32.mrf.mxu1  ;;  %v5077_v16 = vor.u32 %v5728_v61, %v5076_v36 }
 0x4b6   : > { %v2372_v52 = vadd.f32 %v7225_v63, %v2203_v5  ;;  %v2573_v26 = vadd.f32 %v2572_v18, %v6909_v22 }
 0x4b7   : > { %v3657_v33 = vmax.f32 %v2740_v45, 0.0  ;;  %2771 = vmatpush.bf16.msrb.mxu3 %v5077_v16  ;;  %v8750_v45 = vld [vmem:[#allocation16_spill] sm:$0xff] }
 0x4b8   : > { %v3608_v21 = vmax.f32 %v2372_v52, 0.0 }
 0x4b9   : > { %v3828_v38 = vmax.f32 %v3827_v27, %v3657_v33  ;;  %v7489_v9 = vpop.f32.mrf.mxu0 }
 0x4ba   : > { %v3747_v0 = vmax.f32 %v3746_v56, %v3608_v21 }
 0x4bb   : > { %v2204_v39 = vpop.f32.mrf.mxu3 }
 0x4bc   : > { %v2205_v6 = vadd.f32 %v2204_v39, %v7052_v13  ;;  %v2741_v63 = vpop.f32.mrf.mxu2 }
 0x4bd   : > { %v2742_v40 = vadd.f32 %v2741_v63, %v2573_v26  ;;  %v2575_v27 = vpop.f32.mrf.mxu1 }
 0x4be   : > { %v2374_v5 = vadd.f32 %v7243_v11, %v2205_v6  ;;  %v2576_v21 = vadd.f32 %v2575_v27, %v6909_v22  ;;  %v8751_v11 = vld [vmem:[#allocation27_spill] sm:$0xff] }
 0x4bf   : > { %v3661_v56 = vmax.f32 %v2742_v40, 0.0 }
 0x4c0   : > { %v3612_v8 = vmax.f32 %v2374_v5, 0.0  ;;  %2246 = vmatmul.bf16.gmra.mxu3 %v8738_v50  ;;  %3130 = vmatmul.bf16.gmra.mxu1 %v8750_v45 }
 0x4c1   : > { %v3829_v18 = vmax.f32 %v3828_v38, %v3661_v56  ;;  %3299 = vmatmul.bf16.gmra.mxu2 %v8739_v47  ;;  %v7503_v52 = vpop.f32.mrf.mxu0 }
 0x4c2   : > { %v3748_v33 = vmax.f32 %v3747_v0, %v3612_v8 }
 0x4c3   : > { %v2207_v39 = vpop.f32.mrf.mxu3 }
 0x4c4   : > { %v2208_v26 = vadd.f32 %v2207_v39, %v7052_v13  ;;  %v2744_v36 = vpop.f32.mrf.mxu2  ;;  %2991 = vmatmul.bf16.gmra.mxu0 %v8751_v11 }
 0x4c5   : > { %v2745_v61 = vadd.f32 %v2744_v36, %v2576_v21  ;;  %v2577_v6 = vpop.f32.mrf.mxu1 }
 0x4c6   : > { %v2377_v63 = vadd.f32 %v7263_v15, %v2208_v26  ;;  %v2578_v0 = vadd.f32 %v2577_v6, %v6909_v22  ;;  %v8752_v15 = vld [vmem:[#allocation18_spill] sm:$0xff] }
 0x4c7   : > { %v3665_v16 = vmax.f32 %v2745_v61, 0.0 }
 0x4c8   : > { %v3616_v40 = vmax.f32 %v2377_v63, 0.0 }
 0x4c9   : > { %v3830_v38 = vmax.f32 %v3829_v18, %v3665_v16  ;;  %v7509_v5 = vpop.f32.mrf.mxu0 }
 0x4ca   : > { %v3749_v47 = vmax.f32 %v3748_v33, %v3616_v40  ;;  %v8753_v40 = vld [vmem:[#allocation29_spill] sm:$0xff] }
 0x4cb   : > { %v2209_v56 = vpop.f32.mrf.mxu3 }
 0x4cc   : > { %v2210_v27 = vadd.f32 %v2209_v56, %v7052_v13  ;;  %v2746_v8 = vpop.f32.mrf.mxu2 }
 0x4cd   : > { %v2747_v39 = vadd.f32 %v2746_v8, %v2578_v0  ;;  %v2580_v50 = vpop.f32.mrf.mxu1 }
 0x4ce   : > { %v2379_v23 = vadd.f32 %v7281_v53, %v2210_v27  ;;  %v2581_v61 = vadd.f32 %v2580_v50, %v6909_v22 }
 0x4cf   : > { %v3669_v21 = vmax.f32 %v2747_v39, 0.0 }
 0x4d0   : > { %v3620_v36 = vmax.f32 %v2379_v23, 0.0  ;;  %2251 = vmatmul.bf16.gmra.mxu3 %v8740_v29  ;;  %3135 = vmatmul.bf16.gmra.mxu1 %v8752_v15 }
 0x4d1   : > { %v3831_v18 = vmax.f32 %v3830_v38, %v3669_v21  ;;  %3304 = vmatmul.bf16.gmra.mxu2 %v8741_v43  ;;  %v7517_v33 = vpop.f32.mrf.mxu0 }
 0x4d2   : > { %v3750_v26 = vmax.f32 %v3749_v47, %v3620_v36 }
 0x4d3   : > { %v2212_v6 = vpop.f32.mrf.mxu3 }
 0x4d4   : > { %v2213_v63 = vadd.f32 %v2212_v6, %v7052_v13  ;;  %v2749_v16 = vpop.f32.mrf.mxu2  ;;  %2996 = vmatmul.bf16.gmra.mxu0 %v8753_v40 }
 0x4d5   : > { %v2750_v53 = vadd.f32 %v2749_v16, %v2581_v61  ;;  %v2582_v23 = vpop.f32.mrf.mxu1 }
 0x4d6   : > { %v2382_v0 = vadd.f32 %v7295_v3, %v2213_v63  ;;  %v2583_v47 = vadd.f32 %v2582_v23, %v6909_v22  ;;  %v8754_v3 = vld [vmem:[#allocation20_spill] sm:$0xff] }
 0x4d7   : > { %v3673_v56 = vmax.f32 %v2750_v53, 0.0 }
 0x4d8   : > { %v3624_v27 = vmax.f32 %v2382_v0, 0.0 }
 0x4d9   : > { %v3832_v38 = vmax.f32 %v3831_v18, %v3673_v56  ;;  %v7523_v8 = vpop.f32.mrf.mxu0 }
 0x4da   : > { %v3751_v43 = vmax.f32 %v3750_v26, %v3624_v27  ;;  %v8755_v27 = vld [vmem:[#allocation31_spill] sm:$0xff] }
 0x4db   : > { %v2214_v39 = vpop.f32.mrf.mxu3 }
 0x4dc   : > { %v2215_v50 = vadd.f32 %v2214_v39, %v7052_v13  ;;  %v2751_v21 = vpop.f32.mrf.mxu2 }
 0x4dd   : > { %v2752_v36 = vadd.f32 %v2751_v21, %v2583_v47  ;;  %v2585_v6 = vpop.f32.mrf.mxu1 }
 0x4de   : > { %v2384_v29 = vadd.f32 %v7301_v42, %v2215_v50  ;;  %v2586_v53 = vadd.f32 %v2585_v6, %v6909_v22 }
 0x4df   : > { %v3677_v61 = vmax.f32 %v2752_v36, 0.0 }
 0x4e0   : > { %v3628_v16 = vmax.f32 %v2384_v29, 0.0  ;;  %2772 = vmatmul.bf16.vlgmr.msrb.gmra.mxu3 %v8742_v2  ;;  %3140 = vmatmul.bf16.gmra.mxu1 %v8754_v3 }
 0x4e1   : > { %v3833_v18 = vmax.f32 %v3832_v38, %v3677_v61  ;;  %3309 = vmatmul.bf16.gmra.mxu2 %v8743_v35  ;;  %v7531_v26 = vpop.f32.mrf.mxu0 }
 0x4e2   : > { %v3752_v63 = vmax.f32 %v3751_v43, %v3628_v16 }
 0x4e3   : > { %v2217_v23 = vpop.f32.mrf.mxu3 }
 0x4e4   : > { %v2218_v0 = vadd.f32 %v2217_v23, %v7052_v13  ;;  %v2754_v56 = vpop.f32.mrf.mxu2  ;;  %3001 = vmatmul.bf16.gmra.mxu0 %v8755_v27 }
 0x4e5   : > { %v2755_v42 = vadd.f32 %v2754_v56, %v2586_v53  ;;  %v2587_v29 = vpop.f32.mrf.mxu1 }
 0x4e6   : > { %v2387_v2 = vadd.f32 %v7309_v54, %v2218_v0  ;;  %v2588_v43 = vadd.f32 %v2587_v29, %v6909_v22  ;;  %v8756_v54 = vld [vmem:[#allocation22_spill] sm:$0xff] }
 0x4e7   : > { %v3681_v47 = vmax.f32 %v2755_v42, 0.0 }
 0x4e8   : > { %v3632_v39 = vmax.f32 %v2387_v2, 0.0 }
 0x4e9   : > { %v3834_v38 = vmax.f32 %v3833_v18, %v3681_v47  ;;  %v7537_v50 = vpop.f32.mrf.mxu0 }
 0x4ea   : > { %v3753_v35 = vmax.f32 %v3752_v63, %v3632_v39  ;;  %v8757_v39 = vld [vmem:[#allocation33_spill] sm:$0xff] }
 0x4eb   : > { %v2219_v21 = vpop.f32.mrf.mxu3 }
 0x4ec   : > { %v2220_v36 = vadd.f32 %v2219_v21, %v7052_v13  ;;  %v2756_v6 = vpop.f32.mrf.mxu2 }
 0x4ed   : > { %v2757_v61 = vadd.f32 %v2756_v6, %v2588_v43  ;;  %v2590_v16 = vpop.f32.mrf.mxu1 }
 0x4ee   : > { %v2389_v23 = vadd.f32 %v7315_v10, %v2220_v36  ;;  %v2591_v42 = vadd.f32 %v2590_v16, %v6909_v22 }
 0x4ef   : > { %v3685_v53 = vmax.f32 %v2757_v61, 0.0 }
 0x4f0   : > { %v3636_v56 = vmax.f32 %v2389_v23, 0.0  ;;  %2777 = vmatmul.bf16.gmra.mxu3 %v8744_v58  ;;  %3145 = vmatmul.bf16.gmra.mxu1 %v8756_v54 }
 0x4f1   : > { %v3835_v18 = vmax.f32 %v3834_v38, %v3685_v53  ;;  %3314 = vmatmul.bf16.gmra.mxu2 %v8745_v59  ;;  %v7545_v0 = vpop.f32.mrf.mxu0 }
 0x4f2   : > { %v3754_v63 = vmax.f32 %v3753_v35, %v3636_v56 }
 0x4f3   : > { %v2222_v29 = vpop.f32.mrf.mxu3 }
 0x4f4   : > { %v2223_v2 = vadd.f32 %v2222_v29, %v7052_v13  ;;  %v2759_v47 = vpop.f32.mrf.mxu2  ;;  %3006 = vmatmul.bf16.gmra.mxu0 %v8757_v39 }
 0x4f5   : > { %v2760_v10 = vadd.f32 %v2759_v47, %v2591_v42  ;;  %v2592_v43 = vpop.f32.mrf.mxu1 }
 0x4f6   : > { %v2392_v58 = vadd.f32 %v7323_v20, %v2223_v2  ;;  %v2593_v59 = vadd.f32 %v2592_v43, %v6909_v22  ;;  %v7559_v20 = vld [vmem:[%s8510_s6] sm:$0xf] }
 0x4f7   : > { %v3689_v21 = vmax.f32 %v2760_v10, 0.0 }
 0x4f8   : > { %v3640_v36 = vmax.f32 %v2392_v58, 0.0 }
 0x4f9   : > { %v3836_v38 = vmax.f32 %v3835_v18, %v3689_v21  ;;  %v7552_v61 = vpop.f32.mrf.mxu0  ;;  %v7562_v18 = vperm.slane %v7559_v20, 3 }
 0x4fa   : > { %v3755_v6 = vmax.f32 %v3754_v63, %v3640_v36 }
 0x4fb   : > { %v2224_v35 = vpop.f32.mrf.mxu3 }
 0x4fc   : > { %v2225_v16 = vadd.f32 %v2224_v35, %v7052_v13  ;;  %v2761_v23 = vpop.f32.mrf.mxu2 }
 0x4fd   : > { %v2762_v53 = vadd.f32 %v2761_v23, %v2593_v59  ;;  %v3111_v56 = vpop.f32.mrf.mxu1 }
 0x4fe   : > { %v2394_v29 = vadd.f32 %v7329_v55, %v2225_v16  ;;  %v3112_v55 = vadd.f32 %v3111_v56, %v7562_v18 }
 0x4ff   : > { %v3693_v42 = vmax.f32 %v2762_v53, 0.0 }
 0x500   : > { %v3644_v22 = vmax.f32 %v2394_v29, 0.0  ;;  %2782 = vmatmul.bf16.gmra.mxu3 %v8746_v30  ;;  %3150 = vmatmul.bf16.gmra.mxu1 %v6488_v1 }
 0x501   : > { %v7566_v63 = vmax.f32 %v3836_v38, %v3693_v42  ;;  %3319 = vmatmul.bf16.gmra.mxu2 %v8747_v24  ;;  %v7572_v36 = vpop.f32.mrf.mxu0 }
 0x502   : > { %v3756_v2 = vmax.f32 %v3755_v6, %v3644_v22 }
 0x503   : > { %v2227_v47 = vpop.f32.mrf.mxu3 }
 0x504   : > { %v2228_v10 = vadd.f32 %v2227_v47, %v7052_v13  ;;  %v3280_v43 = vpop.f32.mrf.mxu2  ;;  %3011 = vmatmul.bf16.gmra.mxu0 %v6617_v19 }
 0x505   : > { %v3281_v58 = vadd.f32 %v3280_v43, %v3112_v55  ;;  %v3113_v21 = vpop.f32.mrf.mxu1 }
 0x506   : > { %v2397_v30 = vadd.f32 %v7337_v41, %v2228_v10  ;;  %v3114_v35 = vadd.f32 %v3113_v21, %v7562_v18  ;;  %v8758_v41 = vld [vmem:[#allocation25_spill] sm:$0xff] }
 0x507   : > { %v3443_v29 = vmax.f32 %v3281_v58, 0.0 }
 0x508   : > { %v3648_v59 = vmax.f32 %v2397_v30, 0.0 }
 0x509   : > { %v7578_v22 = vpop.f32.mrf.mxu0 }
 0x50a   : > { %v3757_v38 = vmax.f32 %v3756_v2, %v3648_v59 }
 0x50b   : > { %v2229_v24 = vpop.f32.mrf.mxu3 }
 0x50c   : > { %v2230_v6 = vadd.f32 %v2229_v24, %v7052_v13  ;;  %v3282_v16 = vpop.f32.mrf.mxu2 }
 0x50d   : > { %v3283_v23 = vadd.f32 %v3282_v16, %v3114_v35  ;;  %v3116_v53 = vpop.f32.mrf.mxu1 }
 0x50e   : > { %v2399_v56 = vadd.f32 %v7355_v28, %v2230_v6  ;;  %v3117_v10 = vadd.f32 %v3116_v53, %v7562_v18  ;;  %v8759_v28 = vld [vmem:[#allocation36_spill] sm:$0xff] }
 0x50f   : > { %v3447_v42 = vmax.f32 %v3283_v23, 0.0 }
 0x510   : > { %v3652_v55 = vmax.f32 %v2399_v56, 0.0  ;;  %2787 = vmatmul.bf16.gmra.mxu3 %v8748_v48  ;;  %3155 = vmatmul.bf16.gmra.mxu1 %v8758_v41 }
 0x511   : > { %v3913_v2 = vmax.f32 %v3443_v29, %v3447_v42  ;;  %3324 = vmatmul.bf16.gmra.mxu2 %v8749_v44  ;;  %v7587_v16 = vpop.f32.mrf.mxu0 }
 0x512   : > { %v3758_v47 = vmax.f32 %v3757_v38, %v3652_v55 }
 0x513   : > { %v2232_v43 = vpop.f32.mrf.mxu3 }
 0x514   : > { %v2233_v21 = vadd.f32 %v2232_v43, %v7052_v13  ;;  %v3285_v30 = vpop.f32.mrf.mxu2  ;;  %3016 = vmatmul.bf16.gmra.mxu0 %v8759_v28 }
 0x515   : > { %v3286_v58 = vadd.f32 %v3285_v30, %v3117_v10  ;;  %v3118_v59 = vpop.f32.mrf.mxu1 }
 0x516   : > { %v2402_v35 = vadd.f32 %v7369_v31, %v2233_v21  ;;  %v3119_v44 = vadd.f32 %v3118_v59, %v7562_v18 }
 0x517   : > { %v3451_v24 = vmax.f32 %v3286_v58, 0.0 }
 0x518   : > { %v3656_v48 = vmax.f32 %v2402_v35, 0.0  ;;  %v8760_v35 = vld [vmem:[#allocation38_spill] sm:$0xff] }
 0x519   : > { %v3914_v6 = vmax.f32 %v3913_v2, %v3451_v24  ;;  %v7596_v30 = vpop.f32.mrf.mxu0 }
 0x51a   : > { %v3759_v23 = vmax.f32 %v3758_v47, %v3656_v48 }
 0x51b   : > { %v2234_v38 = vpop.f32.mrf.mxu3 }
 0x51c   : > { %v2235_v53 = vadd.f32 %v2234_v38, %v7052_v13  ;;  %v3287_v56 = vpop.f32.mrf.mxu2 }
 0x51d   : > { %v3288_v29 = vadd.f32 %v3287_v56, %v3119_v44  ;;  %v3121_v42 = vpop.f32.mrf.mxu1 }
 0x51e   : > { %v2404_v55 = vadd.f32 %v7387_v25, %v2235_v53  ;;  %v3122_v47 = vadd.f32 %v3121_v42, %v7562_v18 }
 0x51f   : > { %v3455_v10 = vmax.f32 %v3288_v29, 0.0 }
 0x520   : > { %v3660_v43 = vmax.f32 %v2404_v55, 0.0  ;;  %2792 = vmatmul.bf16.gmra.mxu3 %v8750_v45  ;;  %3160 = vmatmul.bf16.gmra.mxu1 %v6518_v4 }
 0x521   : > { %v3915_v31 = vmax.f32 %v3914_v6, %v3455_v10  ;;  %3329 = vmatmul.bf16.gmra.mxu2 %v8751_v11  ;;  %v7603_v55 = vpop.f32.mrf.mxu0 }
 0x522   : > { %v3760_v2 = vmax.f32 %v3759_v23, %v3660_v43 }
 0x523   : > { %v2237_v21 = vpop.f32.mrf.mxu3 }
 0x524   : > { %v2238_v58 = vadd.f32 %v2237_v21, %v7052_v13  ;;  %v3290_v59 = vpop.f32.mrf.mxu2  ;;  %3021 = vmatmul.bf16.gmra.mxu0 %v8760_v35 }
 0x525   : > { %v3291_v25 = vadd.f32 %v3290_v59, %v3122_v47  ;;  %v3123_v24 = vpop.f32.mrf.mxu1 }
 0x526   : > { %v2407_v45 = vadd.f32 %v7407_v51, %v2238_v58  ;;  %v3124_v11 = vadd.f32 %v3123_v24, %v7562_v18  ;;  %v8761_v51 = vld [vmem:[#allocation28_spill] sm:$0xff]  ;;  %v8762_v24 = vld [vmem:[#allocation39_spill] sm:$0xff] }
 0x527   : > { %v3459_v48 = vmax.f32 %v3291_v25, 0.0 }
 0x528   : > { %v3664_v44 = vmax.f32 %v2407_v45, 0.0 }
 0x529   : > { %v3916_v6 = vmax.f32 %v3915_v31, %v3459_v48 }
 0x52a   : > { %v3761_v38 = vmax.f32 %v3760_v2, %v3664_v44 }
 0x52b   : > { %v2239_v23 = vpop.f32.mrf.mxu3 }
 0x52c   : > { %v2240_v53 = vadd.f32 %v2239_v23, %v7052_v13  ;;  %v3292_v56 = vpop.f32.mrf.mxu2 }
 0x52d   : > { %v3293_v29 = vadd.f32 %v3292_v56, %v3124_v11  ;;  %v3126_v42 = vpop.f32.mrf.mxu1 }
 0x52e   : > { %v2409_v10 = vadd.f32 %v7413_v14, %v2240_v53  ;;  %v3127_v21 = vadd.f32 %v3126_v42, %v7562_v18 }
 0x52f   : > { %v3463_v43 = vmax.f32 %v3293_v29, 0.0 }
 0x530   : > { %v3668_v47 = vmax.f32 %v2409_v10, 0.0  ;;  %2797 = vmatmul.bf16.gmra.mxu3 %v8752_v15  ;;  %3165 = vmatmul.bf16.gmra.mxu1 %v8761_v51  ;;  %v7613_v15 = vpop.f32.mrf.mxu0 }
 0x531   : > { %v3917_v31 = vmax.f32 %v3916_v6, %v3463_v43  ;;  %3334 = vmatmul.bf16.gmra.mxu2 %v8753_v40 }
 0x532   : > { %v3762_v2 = vmax.f32 %v3761_v38, %v3668_v47 }
 0x533   : > { %v2242_v58 = vpop.f32.mrf.mxu3 }
 0x534   : > { %v2243_v59 = vadd.f32 %v2242_v58, %v7052_v13  ;;  %v3295_v25 = vpop.f32.mrf.mxu2  ;;  %3026 = vmatmul.bf16.gmra.mxu0 %v8762_v24 }
 0x535   : > { %v3296_v45 = vadd.f32 %v3295_v25, %v3127_v21  ;;  %v3128_v14 = vpop.f32.mrf.mxu1 }
 0x536   : > { %v2412_v48 = vadd.f32 %v7421_v62, %v2243_v59  ;;  %v3129_v40 = vadd.f32 %v3128_v14, %v7562_v18  ;;  %v8763_v62 = vld [vmem:[#allocation30_spill] sm:$0xff]  ;;  %v8764_v14 = vld [vmem:[#allocation41_spill] sm:$0xff] }
 0x537   : > { %v3467_v44 = vmax.f32 %v3296_v45, 0.0 }
 0x538   : > { %v3672_v11 = vmax.f32 %v2412_v48, 0.0 }
 0x539   : > { %v3918_v6 = vmax.f32 %v3917_v31, %v3467_v44  ;;  %v7621_v31 = vpop.f32.mrf.mxu0 }
 0x53a   : > { %v3763_v23 = vmax.f32 %v3762_v2, %v3672_v11 }
 0x53b   : > { %v2244_v38 = vpop.f32.mrf.mxu3 }
 0x53c   : > { %v2245_v53 = vadd.f32 %v2244_v38, %v7052_v13  ;;  %v3297_v56 = vpop.f32.mrf.mxu2 }
 0x53d   : > { %v3298_v29 = vadd.f32 %v3297_v56, %v3129_v40  ;;  %v3131_v42 = vpop.f32.mrf.mxu1 }
 0x53e   : > { %v2414_v10 = vadd.f32 %v7427_v34, %v2245_v53  ;;  %v3132_v58 = vadd.f32 %v3131_v42, %v7562_v18 }
 0x53f   : > { %v3471_v43 = vmax.f32 %v3298_v29, 0.0 }
 0x540   : > { %v3676_v47 = vmax.f32 %v2414_v10, 0.0  ;;  %2802 = vmatmul.bf16.gmra.mxu3 %v8754_v3  ;;  %3170 = vmatmul.bf16.gmra.mxu1 %v8763_v62 }
 0x541   : > { %v3919_v21 = vmax.f32 %v3918_v6, %v3471_v43  ;;  %3339 = vmatmul.bf16.gmra.mxu2 %v8755_v27 }
 0x542   : > { %v3764_v2 = vmax.f32 %v3763_v23, %v3676_v47  ;;  %v7628_v23 = vpop.f32.mrf.mxu0 }
 0x543   : > { %v2247_v59 = vpop.f32.mrf.mxu3 }
 0x544   : > { %v2248_v25 = vadd.f32 %v2247_v59, %v7052_v13  ;;  %v3300_v45 = vpop.f32.mrf.mxu2  ;;  %3031 = vmatmul.bf16.gmra.mxu0 %v8764_v14 }
 0x545   : > { %v3301_v34 = vadd.f32 %v3300_v45, %v3132_v58  ;;  %v3133_v48 = vpop.f32.mrf.mxu1 }
 0x546   : > { %v2417_v3 = vadd.f32 %v7435_v57, %v2248_v25  ;;  %v3134_v27 = vadd.f32 %v3133_v48, %v7562_v18  ;;  %v8765_v57 = vld [vmem:[#allocation32_spill] sm:$0xff] }
 0x547   : > { %v3475_v44 = vmax.f32 %v3301_v34, 0.0  ;;  %v8766_v34 = vld [vmem:[#allocation43_spill] sm:$0xff] }
 0x548   : > { %v3680_v11 = vmax.f32 %v2417_v3, 0.0  ;;  %v3838_v3 = vrot.slane %v7566_v63, 4 }
 0x549   : > { %v3920_v6 = vmax.f32 %v3919_v21, %v3475_v44 }
 0x54a   : > { %v3765_v40 = vmax.f32 %v3764_v2, %v3680_v11  ;;  %v7639_v44 = vpop.f32.mrf.mxu0 }
 0x54b   : > { %v2249_v38 = vpop.f32.mrf.mxu3 }
 0x54c   : > { %v2250_v53 = vadd.f32 %v2249_v38, %v7052_v13  ;;  %v3302_v56 = vpop.f32.mrf.mxu2 }
 0x54d   : > { %v3303_v29 = vadd.f32 %v3302_v56, %v3134_v27  ;;  %v3136_v42 = vpop.f32.mrf.mxu1 }
 0x54e   : > { %v2419_v10 = vadd.f32 %v7447_v17, %v2250_v53  ;;  %v3137_v58 = vadd.f32 %v3136_v42, %v7562_v18 }
 0x54f   : > { %v3479_v43 = vmax.f32 %v3303_v29, 0.0 }
 0x550   : > { %v3684_v47 = vmax.f32 %v2419_v10, 0.0  ;;  %2807 = vmatmul.bf16.gmra.mxu3 %v8756_v54  ;;  %3175 = vmatmul.bf16.gmra.mxu1 %v8765_v57 }
 0x551   : > { %v3921_v21 = vmax.f32 %v3920_v6, %v3479_v43  ;;  %3344 = vmatmul.bf16.gmra.mxu2 %v8757_v39 }
 0x552   : > { %v3766_v2 = vmax.f32 %v3765_v40, %v3684_v47  ;;  %v3839_v40 = vmax.f32 %v7566_v63, %v3838_v3  ;;  %v8768_v3 = vld [vmem:[#allocation45_spill] sm:$0xff] }
 0x553   : > { %v2252_v59 = vpop.f32.mrf.mxu3 }
 0x554   : > { %v2253_v25 = vadd.f32 %v2252_v59, %v7052_v13  ;;  %v3305_v45 = vpop.f32.mrf.mxu2  ;;  %3036 = vmatmul.bf16.gmra.mxu0 %v8766_v34  ;;  %v3840_v43 = vrot.slane %v3839_v40, 2  ;;  %v7646_v59 = vpop.f32.mrf.mxu0 }
 0x555   : > { %v3306_v48 = vadd.f32 %v3305_v45, %v3137_v58  ;;  %v3138_v17 = vpop.f32.mrf.mxu1 }
 0x556   : > { %v2422_v54 = vadd.f32 %v7455_v46, %v2253_v25  ;;  %v3139_v38 = vadd.f32 %v3138_v17, %v7562_v18  ;;  %v7653_v17 = vperm.slane %v7559_v20, 2 }
 0x557   : > { %v3483_v11 = vmax.f32 %v3306_v48, 0.0 }
 0x558   : > { %v3688_v6 = vmax.f32 %v2422_v54, 0.0 }
 0x559   : > { %v3922_v39 = vmax.f32 %v3921_v21, %v3483_v11  ;;  %v8767_v21 = vld [vmem:[#allocation34_spill] sm:$0xff] }
 0x55a   : > { %v3767_v27 = vmax.f32 %v3766_v2, %v3688_v6  ;;  %v3841_v2 = vmax.f32 %v3839_v40, %v3840_v43 }
 0x55b   : > { %v2254_v53 = vpop.f32.mrf.mxu3 }
 0x55c   : > { %v2255_v56 = vadd.f32 %v2254_v53, %v7052_v13  ;;  %v3307_v29 = vpop.f32.mrf.mxu2  ;;  %v7657_v53 = vpop.f32.mrf.mxu0 }
 0x55d   : > { %v3308_v42 = vadd.f32 %v3307_v29, %v3139_v38  ;;  %v3141_v10 = vpop.f32.mrf.mxu1 }
 0x55e   : > { %v2424_v47 = vadd.f32 %v7461_v49, %v2255_v56  ;;  %v3142_v13 = vadd.f32 %v3141_v10, %v7562_v18 }
 0x55f   : > { %v3487_v58 = vmax.f32 %v3308_v42, 0.0 }
 0x560   : > { %v3692_v46 = vmax.f32 %v2424_v47, 0.0  ;;  %2812 = vmatmul.bf16.gmra.mxu3 %v6488_v1  ;;  %3180 = vmatmul.bf16.gmra.mxu1 %v8767_v21  ;;  %v3842_v1 = vrot.slane %v3841_v2, 1 }
 0x561   : > { %v3923_v63 = vmax.f32 %v3922_v39, %v3487_v58  ;;  %3349 = vmatmul.bf16.gmra.mxu2 %v6617_v19 }
 0x562   : > { %v3768_v25 = vmax.f32 %v3767_v27, %v3692_v46  ;;  %v3843_v27 = vmax.f32 %v3841_v2, %v3842_v1 }
 0x563   : > { %v2773_v45 = vpop.f32.mrf.mxu3 }
 0x564   : > { %v3769_v48 = vrot.slane %v3768_v25, 4  ;;  %v3310_v49 = vpop.f32.mrf.mxu2  ;;  %3041 = vmatmul.bf16.gmra.mxu0 %v8768_v3  ;;  %v2774_v19 = vadd.f32 %v2773_v45, %v7653_v17 }
 0x565   : > { %v3311_v54 = vadd.f32 %v3310_v49, %v3142_v13  ;;  %v3143_v11 = vpop.f32.mrf.mxu1 }
 0x566   : > { %v3770_v6 = vmax.f32 %v3768_v25, %v3769_v48  ;;  %v3144_v29 = vadd.f32 %v3143_v11, %v7562_v18  ;;  %v2943_v10 = vadd.f32 %v7469_v32, %v2774_v19  ;;  %v3986_v25 = vrot.slane %v3843_v27, 7  ;;  %v8770_v19 = vld [vmem:[#allocation47_spill] sm:$0xff] }
 0x567   : > { %v3491_v38 = vmax.f32 %v3311_v54, 0.0  ;;  %v8769_v54 = vld [vmem:[#allocation35_spill] sm:$0xff] }
 0x568   : > { %v3771_v39 = vrot.slane %v3770_v6, 2  ;;  %v3442_v48 = vmax.f32 %v2943_v10, 0.0 }
 0x569   : > { %v3924_v40 = vmax.f32 %v3923_v63, %v3491_v38  ;;  %v7669_v38 = vpop.f32.mrf.mxu0 }
 0x56a   : > { %v3772_v56 = vmax.f32 %v3770_v6, %v3771_v39 }
 0x56b   : > { %v2775_v20 = vpop.f32.mrf.mxu3 }
 0x56c   : > { %v3773_v42 = vrot.slane %v3772_v56, 1  ;;  %v2776_v43 = vadd.f32 %v2775_v20, %v7653_v17  ;;  %v3312_v47 = vpop.f32.mrf.mxu2 }
 0x56d   : > { %v3313_v58 = vadd.f32 %v3312_v47, %v3144_v29  ;;  %v3146_v46 = vpop.f32.mrf.mxu1 }
 0x56e   : > { %v3774_v13 = vmax.f32 %v3772_v56, %v3773_v42  ;;  %v2945_v63 = vadd.f32 %v7475_v12, %v2776_v43  ;;  %v3147_v1 = vadd.f32 %v3146_v46, %v7562_v18 }
 0x56f   : > { %v3495_v2 = vmax.f32 %v3313_v58, 0.0 }
 0x570   : > { %v7663_v45 = vsel %vm3989_vm2, %v3774_v13, %v3986_v25  ;;  %v3446_v49 = vmax.f32 %v2945_v63, 0.0  ;;  %2817 = vmatmul.bf16.gmra.mxu3 %v8758_v41  ;;  %3185 = vmatmul.bf16.gmra.mxu1 %v8769_v54 }
 0x571   : > { %v3925_v32 = vmax.f32 %v3924_v40, %v3495_v2  ;;  %3354 = vmatmul.bf16.gmra.mxu2 %v8759_v28  ;;  %v7676_v25 = vpop.f32.mrf.mxu0 }
 0x572   : > { %v3844_v11 = vmax.f32 %v3442_v48, %v3446_v49 }
 0x573   : > { %v2778_v6 = vpop.f32.mrf.mxu3 }
 0x574   : > { %v2779_v12 = vadd.f32 %v2778_v6, %v7653_v17  ;;  %v3315_v39 = vpop.f32.mrf.mxu2  ;;  %3046 = vmatmul.bf16.gmra.mxu0 %v8770_v19 }
 0x575   : > { %v3316_v27 = vadd.f32 %v3315_v39, %v3147_v1  ;;  %v3148_v56 = vpop.f32.mrf.mxu1 }
 0x576   : > { %v2948_v41 = vadd.f32 %v7483_v37, %v2779_v12  ;;  %v3149_v28 = vadd.f32 %v3148_v56, %v7562_v18  ;;  %v8771_v37 = vld [vmem:[#allocation37_spill] sm:$0xff] }
 0x577   : > { %v3499_v29 = vmax.f32 %v3316_v27, 0.0  ;;  %v8772_v12 = vld [vmem:[#allocation49_spill] sm:$0xff] }
 0x578   : > { %v3450_v20 = vmax.f32 %v2948_v41, 0.0 }
 0x579   : > { %v3926_v40 = vmax.f32 %v3925_v32, %v3499_v29 }
 0x57a   : > { %v3845_v42 = vmax.f32 %v3844_v11, %v3450_v20 }
 0x57b   : > { %v2780_v10 = vpop.f32.mrf.mxu3 }
 0x57c   : > { %v2781_v43 = vadd.f32 %v2780_v10, %v7653_v17  ;;  %v3317_v47 = vpop.f32.mrf.mxu2 }
 0x57d   : > { %v3318_v58 = vadd.f32 %v3317_v47, %v3149_v28  ;;  %v3151_v46 = vpop.f32.mrf.mxu1 }
 0x57e   : > { %v2950_v13 = vadd.f32 %v7489_v9, %v2781_v43  ;;  %v3152_v32 = vadd.f32 %v3151_v46, %v7562_v18 }
 0x57f   : > { %v3503_v63 = vmax.f32 %v3318_v58, 0.0 }
 0x580   : > { %v3454_v2 = vmax.f32 %v2950_v13, 0.0  ;;  %2822 = vmatmul.bf16.gmra.mxu3 %v6518_v4  ;;  %3190 = vmatmul.bf16.gmra.mxu1 %v8771_v37  ;;  %v7686_v4 = vpop.f32.mrf.mxu0 }
 0x581   : > { %v3927_v48 = vmax.f32 %v3926_v40, %v3503_v63  ;;  %3359 = vmatmul.bf16.gmra.mxu2 %v8760_v35 }
 0x582   : > { %v3846_v49 = vmax.f32 %v3845_v42, %v3454_v2 }
 0x583   : > { %v2783_v11 = vpop.f32.mrf.mxu3 }
 0x584   : > { %v2784_v1 = vadd.f32 %v2783_v11, %v7653_v17  ;;  %v3320_v6 = vpop.f32.mrf.mxu2  ;;  %3051 = vmatmul.bf16.gmra.mxu0 %v8772_v12 }
 0x585   : > { %v3321_v39 = vadd.f32 %v3320_v6, %v3152_v32  ;;  %v3153_v9 = vpop.f32.mrf.mxu1 }
 0x586   : > { %v2953_v27 = vadd.f32 %v7503_v52, %v2784_v1  ;;  %v3154_v35 = vadd.f32 %v3153_v9, %v7562_v18 }
 0x587   : > { %v3507_v56 = vmax.f32 %v3321_v39, 0.0 }
 0x588   : > { %v3458_v41 = vmax.f32 %v2953_v27, 0.0  ;;  %v7694_v13 = vpop.f32.mrf.mxu0 }
 0x589   : > { %v3928_v29 = vmax.f32 %v3927_v48, %v3507_v56 }
 0x58a   : > { %v3847_v20 = vmax.f32 %v3846_v49, %v3458_v41 }
 0x58b   : > { %v2785_v40 = vpop.f32.mrf.mxu3 }
 0x58c   : > { %v2786_v42 = vadd.f32 %v2785_v40, %v7653_v17  ;;  %v3322_v28 = vpop.f32.mrf.mxu2 }
 0x58d   : > { %v3323_v10 = vadd.f32 %v3322_v28, %v3154_v35  ;;  %v3156_v43 = vpop.f32.mrf.mxu1 }
 0x58e   : > { %v2955_v47 = vadd.f32 %v7509_v5, %v2786_v42  ;;  %v3157_v2 = vadd.f32 %v3156_v43, %v7562_v18 }
 0x58f   : > { %v3511_v58 = vmax.f32 %v3323_v10, 0.0 }
 0x590   : > { %v3462_v46 = vmax.f32 %v2955_v47, 0.0  ;;  %2827 = vmatmul.bf16.gmra.mxu3 %v8761_v51  ;;  %3195 = vmatmul.bf16.gmra.mxu1 %v6652_v7  ;;  %v7701_v56 = vpop.f32.mrf.mxu0  ;;  %v5380_v47 = vld [vmem:[%s8511_s7 + $0x70] sm:$0xf] }
 0x591   : > { %v3929_v52 = vmax.f32 %v3928_v29, %v3511_v58  ;;  %3364 = vmatmul.bf16.gmra.mxu2 %v8762_v24  ;;  %v5804_v58 = vld [vmem:[%s8511_s7 + $0x74] sm:$0xf0] }
 0x592   : > { %v3848_v63 = vmax.f32 %v3847_v20, %v3462_v46 }
 0x593   : > { %v2788_v48 = vpop.f32.mrf.mxu3 }
 0x594   : > { %v2789_v49 = vadd.f32 %v2788_v48, %v7653_v17  ;;  %v3325_v32 = vpop.f32.mrf.mxu2  ;;  %3056 = vmatmul.bf16.gmra.mxu0 %v6805_v60 }
 0x595   : > { %v3326_v5 = vadd.f32 %v3325_v32, %v3157_v2  ;;  %v3158_v11 = vpop.f32.mrf.mxu1  ;;  %v8774_v2 = vld [vmem:[#allocation52_spill] sm:$0xff] }
 0x596   : > { %v2958_v51 = vadd.f32 %v7517_v33, %v2789_v49  ;;  %v3159_v24 = vadd.f32 %v3158_v11, %v7562_v18  ;;  %v8773_v33 = vld [vmem:[#allocation40_spill] sm:$0xff] }
 0x597   : > { %v3515_v1 = vmax.f32 %v3326_v5, 0.0 }
 0x598   : > { %v3466_v6 = vmax.f32 %v2958_v51, 0.0  ;;  %v7717_v49 = vpop.f32.mrf.mxu0 }
 0x599   : > { %v3930_v39 = vmax.f32 %v3929_v52, %v3515_v1  ;;  %v5381_v52 = vor.u32 %v5804_v58, %v5380_v47 }
 0x59a   : > { %v3849_v9 = vmax.f32 %v3848_v63, %v3466_v6 }
 0x59b   : > { %v2790_v27 = vpop.f32.mrf.mxu3  ;;  %4409 = vmatpush.bf16.msra.mxu3 %v5381_v52 }
 0x59c   : > { %v2791_v41 = vadd.f32 %v2790_v27, %v7653_v17  ;;  %v3327_v29 = vpop.f32.mrf.mxu2 }
 0x59d   : > { %v3328_v20 = vadd.f32 %v3327_v29, %v3159_v24  ;;  %v3161_v35 = vpop.f32.mrf.mxu1 }
 0x59e   : > { %v2960_v40 = vadd.f32 %v7523_v8, %v2791_v41  ;;  %v3162_v8 = vadd.f32 %v3161_v35, %v7562_v18 }
 0x59f   : > { %v3519_v42 = vmax.f32 %v3328_v20, 0.0 }
 0x5a0   : > { %v3470_v28 = vmax.f32 %v2960_v40, 0.0  ;;  %2832 = vmatmul.bf16.gmra.mxu3 %v8763_v62  ;;  %3200 = vmatmul.bf16.gmra.mxu1 %v8773_v33  ;;  %v7723_v35 = vpop.f32.mrf.mxu0 }
 0x5a1   : > { %v3931_v10 = vmax.f32 %v3930_v39, %v3519_v42  ;;  %3369 = vmatmul.bf16.gmra.mxu2 %v8764_v14 }
 0x5a2   : > { %v3850_v43 = vmax.f32 %v3849_v9, %v3470_v28 }
 0x5a3   : > { %v2793_v46 = vpop.f32.mrf.mxu3 }
 0x5a4   : > { %v2794_v62 = vadd.f32 %v2793_v46, %v7653_v17  ;;  %v3330_v63 = vpop.f32.mrf.mxu2  ;;  %3061 = vmatmul.bf16.gmra.mxu0 %v8774_v2 }
 0x5a5   : > { %v3331_v48 = vadd.f32 %v3330_v63, %v3162_v8  ;;  %v3163_v14 = vpop.f32.mrf.mxu1  ;;  %v8776_v8 = vld [vmem:[#allocation54_spill] sm:$0xff] }
 0x5a6   : > { %v2963_v32 = vadd.f32 %v7531_v26, %v2794_v62  ;;  %v3164_v6 = vadd.f32 %v3163_v14, %v7562_v18  ;;  %v8775_v26 = vld [vmem:[#allocation42_spill] sm:$0xff] }
 0x5a7   : > { %v3523_v5 = vmax.f32 %v3331_v48, 0.0 }
 0x5a8   : > { %v3474_v11 = vmax.f32 %v2963_v32, 0.0  ;;  %v7732_v48 = vpop.f32.mrf.mxu0 }
 0x5a9   : > { %v3932_v51 = vmax.f32 %v3931_v10, %v3523_v5 }
 0x5aa   : > { %v3851_v1 = vmax.f32 %v3850_v43, %v3474_v11 }
 0x5ab   : > { %v2795_v39 = vpop.f32.mrf.mxu3 }
 0x5ac   : > { %v2796_v9 = vadd.f32 %v2795_v39, %v7653_v17  ;;  %v3332_v24 = vpop.f32.mrf.mxu2 }
 0x5ad   : > { %v3333_v27 = vadd.f32 %v3332_v24, %v3164_v6  ;;  %v3166_v41 = vpop.f32.mrf.mxu1 }
 0x5ae   : > { %v2965_v29 = vadd.f32 %v7537_v50, %v2796_v9  ;;  %v3167_v10 = vadd.f32 %v3166_v41, %v7562_v18 }
 0x5af   : > { %v3527_v20 = vmax.f32 %v3333_v27, 0.0 }
 0x5b0   : > { %v3478_v40 = vmax.f32 %v2965_v29, 0.0  ;;  %2837 = vmatmul.bf16.gmra.mxu3 %v8765_v57  ;;  %3205 = vmatmul.bf16.gmra.mxu1 %v8775_v26 }
 0x5b1   : > { %v3933_v42 = vmax.f32 %v3932_v51, %v3527_v20  ;;  %3374 = vmatmul.bf16.gmra.mxu2 %v8766_v34  ;;  %v7741_v20 = vpop.f32.mrf.mxu0 }
 0x5b2   : > { %v3852_v28 = vmax.f32 %v3851_v1, %v3478_v40 }
 0x5b3   : > { %v2798_v43 = vpop.f32.mrf.mxu3 }
 0x5b4   : > { %v2799_v47 = vadd.f32 %v2798_v43, %v7653_v17  ;;  %v3335_v58 = vpop.f32.mrf.mxu2  ;;  %3066 = vmatmul.bf16.gmra.mxu0 %v8776_v8 }
 0x5b5   : > { %v3336_v50 = vadd.f32 %v3335_v58, %v3167_v10  ;;  %v3168_v46 = vpop.f32.mrf.mxu1 }
 0x5b6   : > { %v2968_v52 = vadd.f32 %v7545_v0, %v2799_v47  ;;  %v3169_v34 = vadd.f32 %v3168_v46, %v7562_v18  ;;  %v8777_v0 = vld [vmem:[#allocation44_spill] sm:$0xff] }
 0x5b7   : > { %v3531_v62 = vmax.f32 %v3336_v50, 0.0 }
 0x5b8   : > { %v3482_v57 = vmax.f32 %v2968_v52, 0.0 }
 0x5b9   : > { %v3934_v63 = vmax.f32 %v3933_v42, %v3531_v62 }
 0x5ba   : > { %v3853_v14 = vmax.f32 %v3852_v28, %v3482_v57  ;;  %v8778_v28 = vld [vmem:[#allocation56_spill] sm:$0xff] }
 0x5bb   : > { %v2800_v32 = vpop.f32.mrf.mxu3 }
 0x5bc   : > { %v2801_v5 = vadd.f32 %v2800_v32, %v7653_v17  ;;  %v3337_v11 = vpop.f32.mrf.mxu2 }
 0x5bd   : > { %v3338_v51 = vadd.f32 %v3337_v11, %v3169_v34  ;;  %v3171_v1 = vpop.f32.mrf.mxu1 }
 0x5be   : > { %v2970_v6 = vadd.f32 %v7552_v61, %v2801_v5  ;;  %v3172_v41 = vadd.f32 %v3171_v1, %v7562_v18 }
 0x5bf   : > { %v3535_v39 = vmax.f32 %v3338_v51, 0.0 }
 0x5c0   : > { %v3486_v9 = vmax.f32 %v2970_v6, 0.0  ;;  %2842 = vmatmul.bf16.gmra.mxu3 %v8767_v21  ;;  %3210 = vmatmul.bf16.gmra.mxu1 %v8777_v0 }
 0x5c1   : > { %v3935_v24 = vmax.f32 %v3934_v63, %v3535_v39  ;;  %3379 = vmatmul.bf16.gmra.mxu2 %v8768_v3 }
 0x5c2   : > { %v3854_v27 = vmax.f32 %v3853_v14, %v3486_v9  ;;  %v7748_v14 = vpop.f32.mrf.mxu0 }
 0x5c3   : > { %v2803_v29 = vpop.f32.mrf.mxu3 }
 0x5c4   : > { %v2804_v40 = vadd.f32 %v2803_v29, %v7653_v17  ;;  %v3340_v42 = vpop.f32.mrf.mxu2  ;;  %3071 = vmatmul.bf16.gmra.mxu0 %v8778_v28 }
 0x5c5   : > { %v3341_v61 = vadd.f32 %v3340_v42, %v3172_v41  ;;  %v3173_v10 = vpop.f32.mrf.mxu1 }
 0x5c6   : > { %v2973_v21 = vadd.f32 %v7572_v36, %v2804_v40  ;;  %v3174_v3 = vadd.f32 %v3173_v10, %v7562_v18  ;;  %v8779_v36 = vld [vmem:[#allocation46_spill] sm:$0xff] }
 0x5c7   : > { %v3539_v43 = vmax.f32 %v3341_v61, 0.0 }
 0x5c8   : > { %v3490_v47 = vmax.f32 %v2973_v21, 0.0 }
 0x5c9   : > { %v3936_v58 = vmax.f32 %v3935_v24, %v3539_v43  ;;  %v8780_v24 = vld [vmem:[#allocation59_spill] sm:$0xff] }
 0x5ca   : > { %v3855_v50 = vmax.f32 %v3854_v27, %v3490_v47 }
 0x5cb   : > { %v2805_v46 = vpop.f32.mrf.mxu3 }
 0x5cc   : > { %v2806_v52 = vadd.f32 %v2805_v46, %v7653_v17  ;;  %v3342_v62 = vpop.f32.mrf.mxu2 }
 0x5cd   : > { %v3343_v57 = vadd.f32 %v3342_v62, %v3174_v3  ;;  %v3176_v63 = vpop.f32.mrf.mxu1 }
 0x5ce   : > { %v2975_v34 = vadd.f32 %v7578_v22, %v2806_v52  ;;  %v3177_v1 = vadd.f32 %v3176_v63, %v7562_v18  ;;  %v5372_v63 = vld [vmem:[%s8511_s7 + $0x60] sm:$0xf] }
 0x5cf   : > { %v3543_v32 = vmax.f32 %v3343_v57, 0.0 }
 0x5d0   : > { %v3494_v5 = vmax.f32 %v2975_v34, 0.0  ;;  %2847 = vmatmul.bf16.gmra.mxu3 %v8769_v54  ;;  %3215 = vmatmul.bf16.gmra.mxu1 %v8779_v36  ;;  %v7758_v54 = vpop.f32.mrf.mxu0 }
 0x5d1   : > { %v3937_v11 = vmax.f32 %v3936_v58, %v3543_v32  ;;  %3384 = vmatmul.bf16.gmra.mxu2 %v8770_v19 }
 0x5d2   : > { %v3856_v51 = vmax.f32 %v3855_v50, %v3494_v5 }
 0x5d3   : > { %v2808_v6 = vpop.f32.mrf.mxu3 }
 0x5d4   : > { %v2809_v39 = vadd.f32 %v2808_v6, %v7653_v17  ;;  %v3345_v9 = vpop.f32.mrf.mxu2  ;;  %3076 = vmatmul.bf16.gmra.mxu0 %v8780_v24 }
 0x5d5   : > { %v3346_v27 = vadd.f32 %v3345_v9, %v3177_v1  ;;  %v3178_v22 = vpop.f32.mrf.mxu1 }
 0x5d6   : > { %v2978_v41 = vadd.f32 %v7587_v16, %v2809_v39  ;;  %v3179_v19 = vadd.f32 %v3178_v22, %v7562_v18  ;;  %v8781_v16 = vld [vmem:[#allocation48_spill] sm:$0xff] }
 0x5d7   : > { %v3547_v29 = vmax.f32 %v3346_v27, 0.0 }
 0x5d8   : > { %v3498_v40 = vmax.f32 %v2978_v41, 0.0  ;;  %v7766_v62 = vpop.f32.mrf.mxu0 }
 0x5d9   : > { %v3938_v42 = vmax.f32 %v3937_v11, %v3547_v29 }
 0x5da   : > { %v3857_v61 = vmax.f32 %v3856_v51, %v3498_v40  ;;  %v8782_v51 = vld [vmem:[#allocation63_spill] sm:$0xff] }
 0x5db   : > { %v2810_v10 = vpop.f32.mrf.mxu3 }
 0x5dc   : > { %v2811_v21 = vadd.f32 %v2810_v10, %v7653_v17  ;;  %v3347_v43 = vpop.f32.mrf.mxu2 }
 0x5dd   : > { %v3348_v47 = vadd.f32 %v3347_v43, %v3179_v19  ;;  %v3181_v58 = vpop.f32.mrf.mxu1 }
 0x5de   : > { %v2980_v50 = vadd.f32 %v7596_v30, %v2811_v21  ;;  %v5802_v30 = vld [vmem:[%s8511_s7 + $0x64] sm:$0xf0]  ;;  %v3182_v34 = vadd.f32 %v3181_v58, %v7562_v18 }
 0x5df   : > { %v3551_v3 = vmax.f32 %v3348_v47, 0.0 }
 0x5e0   : > { %v3502_v46 = vmax.f32 %v2980_v50, 0.0  ;;  %2852 = vmatmul.bf16.gmra.mxu3 %v8771_v37  ;;  %3220 = vmatmul.bf16.gmra.mxu1 %v8781_v16  ;;  %v5373_v37 = vor.u32 %v5802_v30, %v5372_v63  ;;  %v7779_v40 = vpop.f32.mrf.mxu0  ;;  %v8784_v63 = vld [vmem:[#allocation69_spill] sm:$0xff] }
 0x5e1   : > { %v3939_v52 = vmax.f32 %v3938_v42, %v3551_v3  ;;  %3389 = vmatmul.bf16.gmra.mxu2 %v8772_v12 }
 0x5e2   : > { %v3858_v57 = vmax.f32 %v3857_v61, %v3502_v46  ;;  %4410 = vmatpush.bf16.msra.mxu3 %v5373_v37 }
 0x5e3   : > { %v2813_v32 = vpop.f32.mrf.mxu3 }
 0x5e4   : > { %v2814_v5 = vadd.f32 %v2813_v32, %v7653_v17  ;;  %v3350_v11 = vpop.f32.mrf.mxu2  ;;  %3081 = vmatmul.bf16.gmra.mxu0 %v8782_v51 }
 0x5e5   : > { %v3351_v12 = vadd.f32 %v3350_v11, %v3182_v34  ;;  %v3183_v1 = vpop.f32.mrf.mxu1 }
 0x5e6   : > { %v2983_v6 = vadd.f32 %v7603_v55, %v2814_v5  ;;  %v3184_v41 = vadd.f32 %v3183_v1, %v7562_v18  ;;  %v8783_v55 = vld [vmem:[#allocation50_spill] sm:$0xff] }
 0x5e7   : > { %v3555_v39 = vmax.f32 %v3351_v12, 0.0 }
 0x5e8   : > { %v3506_v9 = vmax.f32 %v2983_v6, 0.0  ;;  %v7789_v34 = vpop.f32.mrf.mxu0 }
 0x5e9   : > { %v3940_v27 = vmax.f32 %v3939_v52, %v3555_v39 }
 0x5ea   : > { %v3859_v22 = vmax.f32 %v3858_v57, %v3506_v9 }
 0x5eb   : > { %v2815_v29 = vpop.f32.mrf.mxu3 }
 0x5ec   : > { %v2816_v42 = vadd.f32 %v2815_v29, %v7653_v17  ;;  %v3352_v61 = vpop.f32.mrf.mxu2 }
 0x5ed   : > { %v3353_v19 = vadd.f32 %v3352_v61, %v3184_v41  ;;  %v3186_v10 = vpop.f32.mrf.mxu1 }
 0x5ee   : > { %v2985_v21 = vadd.f32 %v7613_v15, %v2816_v42  ;;  %v3187_v3 = vadd.f32 %v3186_v10, %v7562_v18 }
 0x5ef   : > { %v3559_v43 = vmax.f32 %v3353_v19, 0.0 }
 0x5f0   : > { %v3510_v47 = vmax.f32 %v2985_v21, 0.0  ;;  %2857 = vmatmul.bf16.gmra.mxu3 %v6652_v7  ;;  %3225 = vmatmul.bf16.gmra.mxu1 %v8783_v55  ;;  %v7795_v41 = vpop.f32.mrf.mxu0 }
 0x5f1   : > { %v3941_v58 = vmax.f32 %v3940_v27, %v3559_v43  ;;  %3394 = vmatmul.bf16.gmra.mxu2 %v6805_v60 }
 0x5f2   : > { %v3860_v50 = vmax.f32 %v3859_v22, %v3510_v47  ;;  %v8786_v47 = vld [vmem:[#allocation70_spill] sm:$0xff] }
 0x5f3   : > { %v2818_v46 = vpop.f32.mrf.mxu3 }
 0x5f4   : > { %v2819_v52 = vadd.f32 %v2818_v46, %v7653_v17  ;;  %v3355_v57 = vpop.f32.mrf.mxu2  ;;  %3086 = vmatmul.bf16.gmra.mxu0 %v8784_v63 }
 0x5f5   : > { %v3356_v30 = vadd.f32 %v3355_v57, %v3187_v3  ;;  %v3188_v15 = vpop.f32.mrf.mxu1 }
 0x5f6   : > { %v2988_v7 = vadd.f32 %v7621_v31, %v2819_v52  ;;  %v3189_v60 = vadd.f32 %v3188_v15, %v7562_v18  ;;  %v8785_v31 = vld [vmem:[#allocation51_spill] sm:$0xff] }
 0x5f7   : > { %v3563_v32 = vmax.f32 %v3356_v30, 0.0 }
 0x5f8   : > { %v3514_v37 = vmax.f32 %v2988_v7, 0.0  ;;  %v7804_v52 = vpop.f32.mrf.mxu0 }
 0x5f9   : > { %v3942_v5 = vmax.f32 %v3941_v58, %v3563_v32 }
 0x5fa   : > { %v3861_v11 = vmax.f32 %v3860_v50, %v3514_v37 }
 0x5fb   : > { %v2820_v12 = vpop.f32.mrf.mxu3 }
 0x5fc   : > { %v2821_v1 = vadd.f32 %v2820_v12, %v7653_v17  ;;  %v3357_v6 = vpop.f32.mrf.mxu2 }
 0x5fd   : > { %v3358_v39 = vadd.f32 %v3357_v6, %v3189_v60  ;;  %v3191_v9 = vpop.f32.mrf.mxu1 }
 0x5fe   : > { %v2990_v27 = vadd.f32 %v7628_v23, %v2821_v1  ;;  %v3192_v19 = vadd.f32 %v3191_v9, %v7562_v18 }
 0x5ff   : > { %v3567_v22 = vmax.f32 %v3358_v39, 0.0 }
 0x600   : > { %v3518_v29 = vmax.f32 %v2990_v27, 0.0  ;;  %2862 = vmatmul.bf16.gmra.mxu3 %v8773_v33  ;;  %3230 = vmatmul.bf16.gmra.mxu1 %v8785_v31  ;;  %v7813_v9 = vpop.f32.mrf.mxu0 }
 0x601   : > { %v3943_v42 = vmax.f32 %v3942_v5, %v3567_v22  ;;  %3399 = vmatmul.bf16.gmra.mxu2 %v8774_v2 }
 0x602   : > { %v3862_v61 = vmax.f32 %v3861_v11, %v3518_v29  ;;  %v8788_v29 = vld [vmem:[#allocation72_spill] sm:$0xff] }
 0x603   : > { %v2823_v10 = vpop.f32.mrf.mxu3 }
 0x604   : > { %v2824_v21 = vadd.f32 %v2823_v10, %v7653_v17  ;;  %v3360_v43 = vpop.f32.mrf.mxu2  ;;  %3091 = vmatmul.bf16.gmra.mxu0 %v8786_v47 }
 0x605   : > { %v3361_v23 = vadd.f32 %v3360_v43, %v3192_v19  ;;  %v3193_v58 = vpop.f32.mrf.mxu1 }
 0x606   : > { %v2993_v50 = vadd.f32 %v7639_v44, %v2824_v21  ;;  %v3194_v2 = vadd.f32 %v3193_v58, %v7562_v18  ;;  %v8787_v44 = vld [vmem:[#allocation53_spill] sm:$0xff] }
 0x607   : > { %v3571_v3 = vmax.f32 %v3361_v23, 0.0 }
 0x608   : > { %v3522_v33 = vmax.f32 %v2993_v50, 0.0 }
 0x609   : > { %v3944_v46 = vmax.f32 %v3943_v42, %v3571_v3 }
 0x60a   : > { %v3863_v57 = vmax.f32 %v3862_v61, %v3522_v33 }
 0x60b   : > { %v2825_v30 = vpop.f32.mrf.mxu3 }
 0x60c   : > { %v2826_v15 = vadd.f32 %v2825_v30, %v7653_v17  ;;  %v3362_v7 = vpop.f32.mrf.mxu2 }
 0x60d   : > { %v3363_v32 = vadd.f32 %v3362_v7, %v3194_v2  ;;  %v3196_v37 = vpop.f32.mrf.mxu1  ;;  %v8789_v2 = vld [vmem:[#allocation55_spill] sm:$0xff]  ;;  %v5800_v7 = vld [vmem:[%s8511_s7 + $0x54] sm:$0xf0] }
 0x60e   : > { %v2995_v5 = vadd.f32 %v7646_v59, %v2826_v15  ;;  %v3197_v6 = vadd.f32 %v3196_v37, %v7562_v18  ;;  %v5364_v15 = vld [vmem:[%s8511_s7 + $0x50] sm:$0xf] }
 0x60f   : > { %v3575_v11 = vmax.f32 %v3363_v32, 0.0  ;;  %v5365_v37 = vor.u32 %v5800_v7, %v5364_v15 }
 0x610   : > { %v3526_v60 = vmax.f32 %v2995_v5, 0.0  ;;  %2867 = vmatmul.bf16.gmra.mxu3 %v8775_v26  ;;  %3235 = vmatmul.bf16.gmra.mxu1 %v8787_v44 }
 0x611   : > { %v3945_v12 = vmax.f32 %v3944_v46, %v3575_v11  ;;  %3404 = vmatmul.bf16.gmra.mxu2 %v8776_v8  ;;  %4411 = vmatpush.bf16.msra.mxu3 %v5365_v37 }
 0x612   : > { %v3864_v1 = vmax.f32 %v3863_v57, %v3526_v60 }
 0x613   : > { %v2828_v39 = vpop.f32.mrf.mxu3 }
 0x614   : > { %v2829_v27 = vadd.f32 %v2828_v39, %v7653_v17  ;;  %v3365_v22 = vpop.f32.mrf.mxu2  ;;  %3096 = vmatmul.bf16.gmra.mxu0 %v8788_v29 }
 0x615   : > { %v3366_v59 = vadd.f32 %v3365_v22, %v3197_v6  ;;  %v3198_v42 = vpop.f32.mrf.mxu1 }
 0x616   : > { %v2998_v26 = vadd.f32 %v7657_v53, %v2829_v27  ;;  %v3199_v8 = vadd.f32 %v3198_v42, %v7562_v18 }
 0x617   : > { %v3579_v61 = vmax.f32 %v3366_v59, 0.0 }
 0x618   : > { %v3530_v19 = vmax.f32 %v2998_v26, 0.0 }
 0x619   : > { %v3946_v10 = vmax.f32 %v3945_v12, %v3579_v61 }
 0x61a   : > { %v3865_v21 = vmax.f32 %v3864_v1, %v3530_v19 }
 0x61b   : > { %v2830_v43 = vpop.f32.mrf.mxu3 }
 0x61c   : > { %v2831_v23 = vadd.f32 %v2830_v43, %v7653_v17  ;;  %v3367_v58 = vpop.f32.mrf.mxu2 }
 0x61d   : > { %v3368_v50 = vadd.f32 %v3367_v58, %v3199_v8  ;;  %v3201_v3 = vpop.f32.mrf.mxu1  ;;  %v8790_v8 = vld [vmem:[#allocation58_spill] sm:$0xff] }
 0x61e   : > { %v3000_v33 = vadd.f32 %v7669_v38, %v2831_v23  ;;  %v3202_v38 = vadd.f32 %v3201_v3, %v7562_v18 }
 0x61f   : > { %v3583_v46 = vmax.f32 %v3368_v50, 0.0 }
 0x620   : > { %v3534_v57 = vmax.f32 %v3000_v33, 0.0  ;;  %2872 = vmatmul.bf16.gmra.mxu3 %v8777_v0  ;;  %3240 = vmatmul.bf16.gmra.mxu1 %v8789_v2 }
 0x621   : > { %v3947_v53 = vmax.f32 %v3946_v10, %v3583_v46  ;;  %3409 = vmatmul.bf16.gmra.mxu2 %v8778_v28 }
 0x622   : > { %v3866_v30 = vmax.f32 %v3865_v21, %v3534_v57 }
 0x623   : > { %v2833_v32 = vpop.f32.mrf.mxu3 }
 0x624   : > { %v2834_v0 = vadd.f32 %v2833_v32, %v7653_v17  ;;  %v3370_v5 = vpop.f32.mrf.mxu2 }
 0x625   : > { %v3371_v11 = vadd.f32 %v3370_v5, %v3202_v38  ;;  %v3203_v60 = vpop.f32.mrf.mxu1 }
 0x626   : > { %v3003_v28 = vadd.f32 %v7676_v25, %v2834_v0  ;;  %v3204_v27 = vadd.f32 %v3203_v60, %v7562_v18  ;;  %v8791_v60 = vld [vmem:[#allocation62_spill] sm:$0xff] }
 0x627   : > { %v3587_v12 = vmax.f32 %v3371_v11, 0.0 }
 0x628   : > { %v3538_v1 = vmax.f32 %v3003_v28, 0.0 }
 0x629   : > { %v3948_v6 = vmax.f32 %v3947_v53, %v3587_v12 }
 0x62a   : > { %v3867_v39 = vmax.f32 %v3866_v30, %v3538_v1 }
 0x62b   : > { %v2835_v22 = vpop.f32.mrf.mxu3 }
 0x62c   : > { %v2836_v59 = vadd.f32 %v2835_v22, %v7653_v17  ;;  %v3372_v42 = vpop.f32.mrf.mxu2 }
 0x62d   : > { %v3373_v26 = vadd.f32 %v3372_v42, %v3204_v27  ;;  %v3206_v61 = vpop.f32.mrf.mxu1 }
 0x62e   : > { %v3005_v19 = vadd.f32 %v7686_v4, %v2836_v59  ;;  %v3207_v23 = vadd.f32 %v3206_v61, %v7562_v18 }
 0x62f   : > { %v3591_v10 = vmax.f32 %v3373_v26, 0.0 }
 0x630   : > { %v3542_v21 = vmax.f32 %v3005_v19, 0.0  ;;  %2877 = vmatmul.bf16.gmra.mxu3 %v8779_v36  ;;  %3245 = vmatmul.bf16.gmra.mxu1 %v8790_v8 }
 0x631   : > { %v3949_v25 = vmax.f32 %v3948_v6, %v3591_v10  ;;  %3414 = vmatmul.bf16.gmra.mxu2 %v8780_v24 }
 0x632   : > { %v3868_v43 = vmax.f32 %v3867_v39, %v3542_v21 }
 0x633   : > { %v2838_v58 = vpop.f32.mrf.mxu3 }
 0x634   : > { %v2839_v50 = vadd.f32 %v2838_v58, %v7653_v17  ;;  %v3375_v3 = vpop.f32.mrf.mxu2 }
 0x635   : > { %v3376_v33 = vadd.f32 %v3375_v3, %v3207_v23  ;;  %v3208_v46 = vpop.f32.mrf.mxu1 }
 0x636   : > { %v3008_v4 = vadd.f32 %v7694_v13, %v2839_v50  ;;  %v3209_v15 = vadd.f32 %v3208_v46, %v7562_v18  ;;  %v8792_v50 = vld [vmem:[#allocation66_spill] sm:$0xff] }
 0x637   : > { %v3595_v57 = vmax.f32 %v3376_v33, 0.0 }
 0x638   : > { %v3546_v53 = vmax.f32 %v3008_v4, 0.0 }
 0x639   : > { %v3950_v30 = vmax.f32 %v3949_v25, %v3595_v57 }
 0x63a   : > { %v3869_v36 = vmax.f32 %v3868_v43, %v3546_v53 }
 0x63b   : > { %v2840_v7 = vpop.f32.mrf.mxu3 }
 0x63c   : > { %v2841_v24 = vadd.f32 %v2840_v7, %v7653_v17  ;;  %v3377_v38 = vpop.f32.mrf.mxu2 }
 0x63d   : > { %v3378_v32 = vadd.f32 %v3377_v38, %v3209_v15  ;;  %v3211_v37 = vpop.f32.mrf.mxu1 }
 0x63e   : > { %v3010_v0 = vadd.f32 %v7701_v56, %v2841_v24  ;;  %v3212_v12 = vadd.f32 %v3211_v37, %v7562_v18 }
 0x63f   : > { %v3599_v5 = vmax.f32 %v3378_v32, 0.0 }
 0x640   : > { %v3550_v11 = vmax.f32 %v3010_v0, 0.0  ;;  %2882 = vmatmul.bf16.gmra.mxu3 %v8781_v16  ;;  %3250 = vmatmul.bf16.gmra.mxu1 %v8791_v60 }
 0x641   : > { %v3951_v13 = vmax.f32 %v3950_v30, %v3599_v5  ;;  %3419 = vmatmul.bf16.gmra.mxu2 %v8782_v51 }
 0x642   : > { %v3870_v28 = vmax.f32 %v3869_v36, %v3550_v11 }
 0x643   : > { %v2843_v1 = vpop.f32.mrf.mxu3 }
 0x644   : > { %v2844_v6 = vadd.f32 %v2843_v1, %v7653_v17  ;;  %v3380_v39 = vpop.f32.mrf.mxu2  ;;  %v5356_v1 = vld [vmem:[%s8511_s7 + $0x40] sm:$0xf] }
 0x645   : > { %v3381_v27 = vadd.f32 %v3380_v39, %v3212_v12  ;;  %v3213_v22 = vpop.f32.mrf.mxu1 }
 0x646   : > { %v3013_v56 = vadd.f32 %v7717_v49, %v2844_v6  ;;  %v3214_v61 = vadd.f32 %v3213_v22, %v7562_v18  ;;  %v5798_v6 = vld [vmem:[%s8511_s7 + $0x44] sm:$0xf0] }
 0x647   : > { %v3603_v59 = vmax.f32 %v3381_v27, 0.0  ;;  %v5357_v27 = vor.u32 %v5798_v6, %v5356_v1 }
 0x648   : > { %v3554_v42 = vmax.f32 %v3013_v56, 0.0 }
 0x649   : > { %v3952_v26 = vmax.f32 %v3951_v13, %v3603_v59  ;;  %4412 = vmatpush.bf16.msra.mxu3 %v5357_v27 }
 0x64a   : > { %v3871_v16 = vmax.f32 %v3870_v28, %v3554_v42  ;;  %v8793_v28 = vld [vmem:[#allocation67_spill] sm:$0xff] }
 0x64b   : > { %v2845_v19 = vpop.f32.mrf.mxu3 }
 0x64c   : > { %v2846_v51 = vadd.f32 %v2845_v19, %v7653_v17  ;;  %v3382_v10 = vpop.f32.mrf.mxu2 }
 0x64d   : > { %v3383_v21 = vadd.f32 %v3382_v10, %v3214_v61  ;;  %v3216_v25 = vpop.f32.mrf.mxu1 }
 0x64e   : > { %v3015_v43 = vadd.f32 %v7723_v35, %v2846_v51  ;;  %v3217_v33 = vadd.f32 %v3216_v25, %v7562_v18 }
 0x64f   : > { %v3607_v23 = vmax.f32 %v3383_v21, 0.0 }
 0x650   : > { %v3558_v58 = vmax.f32 %v3015_v43, 0.0  ;;  %2887 = vmatmul.bf16.gmra.mxu3 %v8783_v55  ;;  %3255 = vmatmul.bf16.gmra.mxu1 %v8792_v50 }
 0x651   : > { %v3953_v49 = vmax.f32 %v3952_v26, %v3607_v23  ;;  %3424 = vmatmul.bf16.gmra.mxu2 %v8784_v63 }
 0x652   : > { %v3872_v3 = vmax.f32 %v3871_v16, %v3558_v58 }
 0x653   : > { %v2848_v46 = vpop.f32.mrf.mxu3 }
 0x654   : > { %v2849_v4 = vadd.f32 %v2848_v46, %v7653_v17  ;;  %v3385_v57 = vpop.f32.mrf.mxu2 }
 0x655   : > { %v3386_v53 = vadd.f32 %v3385_v57, %v3217_v33  ;;  %v3218_v30 = vpop.f32.mrf.mxu1 }
 0x656   : > { %v3018_v35 = vadd.f32 %v7732_v48, %v2849_v4  ;;  %v3219_v24 = vadd.f32 %v3218_v30, %v7562_v18 }
 0x657   : > { %v3611_v36 = vmax.f32 %v3386_v53, 0.0 }
 0x658   : > { %v3562_v15 = vmax.f32 %v3018_v35, 0.0 }
 0x659   : > { %v3954_v7 = vmax.f32 %v3953_v49, %v3611_v36  ;;  %v7884_v36 = vpop.f32.mrf.mxu0 }
 0x65a   : > { %v3873_v55 = vmax.f32 %v3872_v3, %v3562_v15  ;;  %v8794_v3 = vld [vmem:[#allocation68_spill] sm:$0xff] }
 0x65b   : > { %v2850_v38 = vpop.f32.mrf.mxu3 }
 0x65c   : > { %v2851_v63 = vadd.f32 %v2850_v38, %v7653_v17  ;;  %v3387_v32 = vpop.f32.mrf.mxu2 }
 0x65d   : > { %v3388_v37 = vadd.f32 %v3387_v32, %v3219_v24  ;;  %v3221_v0 = vpop.f32.mrf.mxu1 }
 0x65e   : > { %v3020_v5 = vadd.f32 %v7741_v20, %v2851_v63  ;;  %v3222_v20 = vadd.f32 %v3221_v0, %v7562_v18 }
 0x65f   : > { %v3615_v11 = vmax.f32 %v3388_v37, 0.0 }
 0x660   : > { %v3566_v13 = vmax.f32 %v3020_v5, 0.0  ;;  %2892 = vmatmul.bf16.gmra.mxu3 %v8785_v31  ;;  %3260 = vmatmul.bf16.gmra.mxu1 %v8793_v28 }
 0x661   : > { %v3955_v48 = vmax.f32 %v3954_v7, %v3615_v11  ;;  %3429 = vmatmul.bf16.gmra.mxu2 %v8786_v47 }
 0x662   : > { %v3874_v12 = vmax.f32 %v3873_v55, %v3566_v13 }
 0x663   : > { %v2853_v39 = vpop.f32.mrf.mxu3 }
 0x664   : > { %v2854_v31 = vadd.f32 %v2853_v39, %v7653_v17  ;;  %v3390_v22 = vpop.f32.mrf.mxu2 }
 0x665   : > { %v3391_v56 = vadd.f32 %v3390_v22, %v3222_v20  ;;  %v3223_v59 = vpop.f32.mrf.mxu1 }
 0x666   : > { %v3023_v47 = vadd.f32 %v7748_v14, %v2854_v31  ;;  %v3224_v19 = vadd.f32 %v3223_v59, %v7562_v18 }
 0x667   : > { %v3619_v42 = vmax.f32 %v3391_v56, 0.0 }
 0x668   : > { %v3570_v26 = vmax.f32 %v3023_v47, 0.0 }
 0x669   : > { %v3956_v16 = vmax.f32 %v3955_v48, %v3619_v42 }
 0x66a   : > { %v3875_v61 = vmax.f32 %v3874_v12, %v3570_v26 }
 0x66b   : > { %v2855_v51 = vpop.f32.mrf.mxu3 }
 0x66c   : > { %v2856_v10 = vadd.f32 %v2855_v51, %v7653_v17  ;;  %v3392_v21 = vpop.f32.mrf.mxu2 }
 0x66d   : > { %v3393_v25 = vadd.f32 %v3392_v21, %v3224_v19  ;;  %v3226_v43 = vpop.f32.mrf.mxu1 }
 0x66e   : > { %v3025_v23 = vadd.f32 %v7758_v54, %v2856_v10  ;;  %v3227_v46 = vadd.f32 %v3226_v43, %v7562_v18 }
 0x66f   : > { %v3623_v58 = vmax.f32 %v3393_v25, 0.0 }
 0x670   : > { %v3574_v49 = vmax.f32 %v3025_v23, 0.0  ;;  %2897 = vmatmul.bf16.gmra.mxu3 %v8787_v44  ;;  %3265 = vmatmul.bf16.gmra.mxu1 %v8794_v3 }
 0x671   : > { %v3957_v14 = vmax.f32 %v3956_v16, %v3623_v58  ;;  %3434 = vmatmul.bf16.gmra.mxu2 %v8788_v29 }
 0x672   : > { %v3876_v33 = vmax.f32 %v3875_v61, %v3574_v49 }
 0x673   : > { %v2858_v4 = vpop.f32.mrf.mxu3 }
 0x674   : > { %v2859_v57 = vadd.f32 %v2858_v4, %v7653_v17  ;;  %v3395_v53 = vpop.f32.mrf.mxu2 }
 0x675   : > { %v3396_v30 = vadd.f32 %v3395_v53, %v3227_v46  ;;  %v3228_v35 = vpop.f32.mrf.mxu1 }
 0x676   : > { %v3028_v54 = vadd.f32 %v7766_v62, %v2859_v57  ;;  %v3229_v24 = vadd.f32 %v3228_v35, %v7562_v18  ;;  %v7890_v62 = vpop.f32.mrf.mxu0 }
 0x677   : > { %v3627_v15 = vmax.f32 %v3396_v30, 0.0 }
 0x678   : > { %v3578_v44 = vmax.f32 %v3028_v54, 0.0 }
 0x679   : > { %v3958_v7 = vmax.f32 %v3957_v14, %v3627_v15 }
 0x67a   : > { %v3877_v55 = vmax.f32 %v3876_v33, %v3578_v44 }
 0x67b   : > { %v2860_v29 = vpop.f32.mrf.mxu3 }
 0x67c   : > { %v2861_v38 = vadd.f32 %v2860_v29, %v7653_v17  ;;  %v3397_v63 = vpop.f32.mrf.mxu2 }
 0x67d   : > { %v3398_v32 = vadd.f32 %v3397_v63, %v3229_v24  ;;  %v3231_v37 = vpop.f32.mrf.mxu1 }
 0x67e   : > { %v3030_v0 = vadd.f32 %v7779_v40, %v2861_v38  ;;  %v3232_v12 = vadd.f32 %v3231_v37, %v7562_v18  ;;  %v3047_v47 = vpop.f32.mrf.mxu0  ;;  %v5796_v37 = vld [vmem:[%s8511_s7 + $0x34] sm:$0xf0] }
 0x67f   : > { %v3631_v5 = vmax.f32 %v3398_v32, 0.0  ;;  %v5348_v32 = vld [vmem:[%s8511_s7 + $0x30] sm:$0xf] }
 0x680   : > { %v3582_v11 = vmax.f32 %v3030_v0, 0.0  ;;  %2902 = vmatmul.bf16.gmra.mxu3 %v8789_v2 }
 0x681   : > { %v3959_v13 = vmax.f32 %v3958_v7, %v3631_v5 }
 0x682   : > { %v3878_v48 = vmax.f32 %v3877_v55, %v3582_v11 }
 0x683   : > { %v2863_v1 = vpop.f32.mrf.mxu3 }
 0x684   : > { %v2864_v6 = vadd.f32 %v2863_v1, %v7653_v17  ;;  %v3400_v20 = vpop.f32.mrf.mxu2 }
 0x685   : > { %v3401_v39 = vadd.f32 %v3400_v20, %v3232_v12  ;;  %v3233_v27 = vpop.f32.mrf.mxu1 }
 0x686   : > { %v3033_v31 = vadd.f32 %v7789_v34, %v2864_v6  ;;  %v3234_v2 = vadd.f32 %v3233_v27, %v7562_v18  ;;  %v3049_v14 = vpop.f32.mrf.mxu0 }
 0x687   : > { %v3635_v22 = vmax.f32 %v3401_v39, 0.0 }
 0x688   : > { %v3586_v40 = vmax.f32 %v3033_v31, 0.0 }
 0x689   : > { %v3960_v56 = vmax.f32 %v3959_v13, %v3635_v22 }
 0x68a   : > { %v3879_v59 = vmax.f32 %v3878_v48, %v3586_v40 }
 0x68b   : > { %v2865_v42 = vpop.f32.mrf.mxu3 }
 0x68c   : > { %v2866_v26 = vadd.f32 %v2865_v42, %v7653_v17  ;;  %v3402_v16 = vpop.f32.mrf.mxu2 }
 0x68d   : > { %v3403_v61 = vadd.f32 %v3402_v16, %v3234_v2  ;;  %v3236_v19 = vpop.f32.mrf.mxu1 }
 0x68e   : > { %v3035_v51 = vadd.f32 %v7795_v41, %v2866_v26  ;;  %v3237_v43 = vadd.f32 %v3236_v19, %v7562_v18  ;;  %v3052_v55 = vpop.f32.mrf.mxu0 }
 0x68f   : > { %v3639_v10 = vmax.f32 %v3403_v61, 0.0 }
 0x690   : > { %v3590_v21 = vmax.f32 %v3035_v51, 0.0  ;;  %2907 = vmatmul.bf16.gmra.mxu3 %v8790_v8 }
 0x691   : > { %v3961_v34 = vmax.f32 %v3960_v56, %v3639_v10 }
 0x692   : > { %v3880_v25 = vmax.f32 %v3879_v59, %v3590_v21 }
 0x693   : > { %v2868_v23 = vpop.f32.mrf.mxu3 }
 0x694   : > { %v2869_v58 = vadd.f32 %v2868_v23, %v7653_v17  ;;  %v3405_v49 = vpop.f32.mrf.mxu2 }
 0x695   : > { %v3406_v33 = vadd.f32 %v3405_v49, %v3237_v43  ;;  %v3238_v4 = vpop.f32.mrf.mxu1 }
 0x696   : > { %v3038_v46 = vadd.f32 %v7804_v52, %v2869_v58  ;;  %v3239_v35 = vadd.f32 %v3238_v4, %v7562_v18  ;;  %v3054_v6 = vpop.f32.mrf.mxu0 }
 0x697   : > { %v3643_v57 = vmax.f32 %v3406_v33, 0.0 }
 0x698   : > { %v3594_v53 = vmax.f32 %v3038_v46, 0.0 }
 0x699   : > { %v3962_v41 = vmax.f32 %v3961_v34, %v3643_v57 }
 0x69a   : > { %v3881_v30 = vmax.f32 %v3880_v25, %v3594_v53 }
 0x69b   : > { %v2870_v8 = vpop.f32.mrf.mxu3 }
 0x69c   : > { %v2871_v54 = vadd.f32 %v2870_v8, %v7653_v17  ;;  %v3407_v15 = vpop.f32.mrf.mxu2 }
 0x69d   : > { %v3408_v44 = vadd.f32 %v3407_v15, %v3239_v35  ;;  %v3241_v38 = vpop.f32.mrf.mxu1 }
 0x69e   : > { %v3040_v7 = vadd.f32 %v7813_v9, %v2871_v54  ;;  %v3242_v0 = vadd.f32 %v3241_v38, %v7562_v18  ;;  %v5349_v9 = vor.u32 %v5796_v37, %v5348_v32  ;;  %v3057_v40 = vpop.f32.mrf.mxu0 }
 0x69f   : > { %v3647_v24 = vmax.f32 %v3408_v44, 0.0 }
 0x6a0   : > { %v3598_v29 = vmax.f32 %v3040_v7, 0.0  ;;  %2912 = vmatmul.bf16.gmra.mxu3 %v8791_v60 }
 0x6a1   : > { %v3963_v52 = vmax.f32 %v3962_v41, %v3647_v24  ;;  %4413 = vmatpush.bf16.msra.mxu3 %v5349_v9 }
 0x6a2   : > { %v3882_v63 = vmax.f32 %v3881_v30, %v3598_v29 }
 0x6a3   : > { %v2873_v5 = vpop.f32.mrf.mxu3 }
 0x6a4   : > { %v2874_v11 = vadd.f32 %v2873_v5, %v7653_v17  ;;  %v3410_v13 = vpop.f32.mrf.mxu2 }
 0x6a5   : > { %v3411_v48 = vadd.f32 %v3410_v13, %v3242_v0  ;;  %v7928_v44 = vpop.f32.mrf.mxu1  ;;  %v5340_v13 = vld [vmem:[%s8511_s7 + $0x20] sm:$0xf] }
 0x6a6   : > { %v3043_v60 = vadd.f32 %v7884_v36, %v2874_v11  ;;  %v3059_v51 = vpop.f32.mrf.mxu0 }
 0x6a7   : > { %v3651_v12 = vmax.f32 %v3411_v48, 0.0  ;;  %v5794_v48 = vld [vmem:[%s8511_s7 + $0x24] sm:$0xf0] }
 0x6a8   : > { %v3602_v1 = vmax.f32 %v3043_v60, 0.0 }
 0x6a9   : > { %v7915_v20 = vmax.f32 %v3963_v52, %v3651_v12  ;;  %v5341_v12 = vor.u32 %v5794_v48, %v5340_v13 }
 0x6aa   : > { %v3883_v39 = vmax.f32 %v3882_v63, %v3602_v1 }
 0x6ab   : > { %v2875_v27 = vpop.f32.mrf.mxu3  ;;  %4414 = vmatpush.bf16.msra.mxu3 %v5341_v12 }
 0x6ac   : > { %v2876_v31 = vadd.f32 %v2875_v27, %v7653_v17 }
 0x6ad   : > { %v3246_v0 = vpop.f32.mrf.mxu1 }
 0x6ae   : > { %v3045_v22 = vadd.f32 %v7890_v62, %v2876_v31  ;;  %v3062_v25 = vpop.f32.mrf.mxu0 }
 0x6b0   : > { %2917 = vmatmul.bf16.gmra.mxu3 %v8792_v50  ;;  %v3606_v59 = vmax.f32 %v3045_v22, 0.0 }
 0x6b2   : > { %v3884_v36 = vmax.f32 %v3883_v39, %v3606_v59 }
 0x6b3   : > { %v2878_v56 = vpop.f32.mrf.mxu3 }
 0x6b4   : > { %v2879_v2 = vadd.f32 %v2878_v56, %v7653_v17 }
 0x6b5   : > { %v3248_v27 = vpop.f32.mrf.mxu1 }
 0x6b6   : > { %v3048_v42 = vadd.f32 %v3047_v47, %v2879_v2  ;;  %v3064_v46 = vpop.f32.mrf.mxu0 }
 0x6b8   : > { %v3610_v26 = vmax.f32 %v3048_v42, 0.0 }
 0x6ba   : > { %v3885_v16 = vmax.f32 %v3884_v36, %v3610_v26 }
 0x6bb   : > { %v2880_v61 = vpop.f32.mrf.mxu3 }
 0x6bc   : > { %v2881_v19 = vadd.f32 %v2880_v61, %v7653_v17 }
 0x6bd   : > { %v3251_v26 = vpop.f32.mrf.mxu1 }
 0x6be   : > { %v3050_v10 = vadd.f32 %v3049_v14, %v2881_v19  ;;  %v3067_v35 = vpop.f32.mrf.mxu0 }
 0x6c0   : > { %2922 = vmatmul.bf16.gmra.mxu3 %v8793_v28  ;;  %v3614_v62 = vmax.f32 %v3050_v10, 0.0 }
 0x6c2   : > { %v3886_v43 = vmax.f32 %v3885_v16, %v3614_v62 }
 0x6c3   : > { %v2883_v21 = vpop.f32.mrf.mxu3 }
 0x6c4   : > { %v2884_v50 = vadd.f32 %v2883_v21, %v7653_v17 }
 0x6c6   : > { %v3053_v34 = vadd.f32 %v3052_v55, %v2884_v50  ;;  %v7930_v55 = vpop.f32.mrf.mxu2  ;;  %v3069_v29 = vpop.f32.mrf.mxu0 }
 0x6c8   : > { %v3618_v23 = vmax.f32 %v3053_v34, 0.0 }
 0x6ca   : > { %v3887_v58 = vmax.f32 %v3886_v43, %v3618_v23 }
 0x6cb   : > { %v2885_v47 = vpop.f32.mrf.mxu3 }
 0x6cc   : > { %v2886_v49 = vadd.f32 %v2885_v47, %v7653_v17 }
 0x6ce   : > { %v3055_v33 = vadd.f32 %v3054_v6, %v2886_v49  ;;  %v3415_v9 = vpop.f32.mrf.mxu2  ;;  %v3072_v11 = vpop.f32.mrf.mxu0 }
 0x6d0   : > { %2927 = vmatmul.bf16.gmra.mxu3 %v8794_v3  ;;  %v3622_v14 = vmax.f32 %v3055_v33, 0.0 }
 0x6d2   : > { %v3888_v53 = vmax.f32 %v3887_v58, %v3622_v14 }
 0x6d3   : > { %v2888_v4 = vpop.f32.mrf.mxu3 }
 0x6d4   : > { %v2889_v28 = vadd.f32 %v2888_v4, %v7653_v17 }
 0x6d6   : > { %v3058_v57 = vadd.f32 %v3057_v40, %v2889_v28  ;;  %v3417_v22 = vpop.f32.mrf.mxu2  ;;  %v7941_v59 = vpop.f32.mrf.mxu0 }
 0x6d8   : > { %v3626_v41 = vmax.f32 %v3058_v57, 0.0 }
 0x6da   : > { %v3889_v30 = vmax.f32 %v3888_v53, %v3626_v41  ;;  %v5332_v41 = vld [vmem:[%s8511_s7 + $0x10] sm:$0xf] }
 0x6db   : > { %v2890_v8 = vpop.f32.mrf.mxu3 }
 0x6dc   : > { %v2891_v54 = vadd.f32 %v2890_v8, %v7653_v17 }
 0x6de   : > { %v3060_v15 = vadd.f32 %v3059_v51, %v2891_v54  ;;  %v3420_v61 = vpop.f32.mrf.mxu2  ;;  %v7944_v19 = vpop.f32.mrf.mxu0 }
 0x6e0   : > { %v3630_v3 = vmax.f32 %v3060_v15, 0.0 }
 0x6e2   : > { %v3890_v52 = vmax.f32 %v3889_v30, %v3630_v3  ;;  %v5792_v30 = vld [vmem:[%s8511_s7 + $0x14] sm:$0xf0] }
 0x6e3   : > { %v2893_v7 = vpop.f32.mrf.mxu3  ;;  %v5333_v8 = vor.u32 %v5792_v30, %v5332_v41 }
 0x6e4   : > { %v2894_v24 = vadd.f32 %v2893_v7, %v7653_v17 }
 0x6e5   : > { %4415 = vmatpush.bf16.msra.mxu3 %v5333_v8 }
 0x6e6   : > { %v3063_v38 = vadd.f32 %v3062_v25, %v2894_v24  ;;  %v3253_v25 = vpop.f32.mrf.mxu1  ;;  %v3422_v58 = vpop.f32.mrf.mxu2 }
 0x6e7   : > { %v7949_v47 = vpop.f32.mrf.mxu0 }
 0x6e8   : > { %v3634_v63 = vmax.f32 %v3063_v38, 0.0 }
 0x6ea   : > { %v3891_v32 = vmax.f32 %v3890_v52, %v3634_v63 }
 0x6eb   : > { %v2895_v37 = vpop.f32.mrf.mxu3 }
 0x6ec   : > { %v2896_v5 = vadd.f32 %v2895_v37, %v7653_v17  ;;  %v3247_v37 = vadd.f32 %v3246_v0, %v7562_v18 }
 0x6ee   : > { %v3065_v60 = vadd.f32 %v3064_v46, %v2896_v5  ;;  %v3256_v33 = vpop.f32.mrf.mxu1  ;;  %v3425_v46 = vpop.f32.mrf.mxu2  ;;  %v3416_v5 = vadd.f32 %v3415_v9, %v3247_v37 }
 0x6ef   : > { %v7951_v4 = vpop.f32.mrf.mxu0  ;;  %v3257_v0 = vadd.f32 %v3256_v33, %v7562_v18  ;;  %v5820_v33 = vld [vmem:[%s8511_s7 + $0xf4] sm:$0xf0] }
 0x6f0   : > { %v3638_v6 = vmax.f32 %v3065_v60, 0.0  ;;  %v3252_v60 = vadd.f32 %v3251_v26, %v7562_v18  ;;  %v3659_v12 = vmax.f32 %v3416_v5, 0.0 }
 0x6f2   : > { %v3892_v40 = vmax.f32 %v3891_v32, %v3638_v6 }
 0x6f3   : > { %v2898_v1 = vpop.f32.mrf.mxu3 }
 0x6f4   : > { %v2899_v39 = vadd.f32 %v2898_v1, %v7653_v17  ;;  %v3421_v1 = vadd.f32 %v3420_v61, %v3252_v60 }
 0x6f6   : > { %v3068_v31 = vadd.f32 %v3067_v35, %v2899_v39  ;;  %v3258_v28 = vpop.f32.mrf.mxu1  ;;  %v3427_v57 = vpop.f32.mrf.mxu2 }
 0x6f7   : > { %v7953_v53 = vpop.f32.mrf.mxu0 }
 0x6f8   : > { %v3642_v56 = vmax.f32 %v3068_v31, 0.0 }
 0x6fa   : > { %v3893_v2 = vmax.f32 %v3892_v40, %v3642_v56 }
 0x6fb   : > { %v2900_v42 = vpop.f32.mrf.mxu3 }
 0x6fc   : > { %v2901_v36 = vadd.f32 %v2900_v42, %v7653_v17  ;;  %v3259_v42 = vadd.f32 %v3258_v28, %v7562_v18 }
 0x6fe   : > { %v3070_v16 = vadd.f32 %v3069_v29, %v2901_v36  ;;  %v3261_v54 = vpop.f32.mrf.mxu1  ;;  %v3430_v15 = vpop.f32.mrf.mxu2  ;;  %v3244_v29 = vadd.f32 %v7928_v44, %v7562_v18  ;;  %v3254_v44 = vadd.f32 %v3253_v25, %v7562_v18  ;;  %v3700_v36 = vlaneseq }
 0x6ff   : > { %v7963_v7 = vpop.f32.mrf.mxu0  ;;  %v6032_v25 = vmov -inf  }
 0x700   : > { %v3646_v10 = vmax.f32 %v3070_v16, 0.0  ;;  %v3413_v32 = vadd.f32 %v7930_v55, %v3244_v29  ;;  %v3423_v55 = vadd.f32 %v3422_v58, %v3254_v44  ;;  %vm7987_vm3 = vcmp.lt.s32.totalorder %v3700_v36, 512  ;;  %v5444_v58 = vld [vmem:[%s8511_s7 + $0xf0] sm:$0xf] }
 0x701   : > { %3704 = vst.msk [vmem:[#allocation2] sm:$0xf] %vm7987_vm3, %v6032_v25  ;;  %v5445_v41 = vor.u32 %v5820_v33, %v5444_v58 }
 0x702   : > { %v3894_v50 = vmax.f32 %v3893_v2, %v3646_v10  ;;  %v3655_v13 = vmax.f32 %v3413_v32, 0.0  ;;  %v3426_v2 = vadd.f32 %v3425_v46, %v3257_v0  ;;  %v3671_v61 = vmax.f32 %v3423_v55, 0.0  ;;  %v5834_v10 = vld [vmem:[%s8511_s7 + $0x164] sm:$0xf0] }
 0x703   : > { %v2903_v51 = vpop.f32.mrf.mxu3 }
 0x704   : > { %v2904_v21 = vadd.f32 %v2903_v51, %v7653_v17  ;;  %v3965_v31 = vmax.f32 %v7915_v20, %v3655_v13  ;;  %v3428_v51 = vadd.f32 %v3427_v57, %v3259_v42  ;;  %v3262_v20 = vadd.f32 %v3261_v54, %v7562_v18 }
 0x705   : > { %v3675_v28 = vmax.f32 %v3426_v2, 0.0 }
 0x706   : > { %v3073_v62 = vadd.f32 %v3072_v11, %v2904_v21  ;;  %v3263_v24 = vpop.f32.mrf.mxu1  ;;  %v3432_v52 = vpop.f32.mrf.mxu2  ;;  %v3249_v11 = vadd.f32 %v3248_v27, %v7562_v18  ;;  %v3966_v27 = vmax.f32 %v3965_v31, %v3659_v12  ;;  %v5324_v21 = vld [vmem:[%s8511_s7] sm:$0xf]  ;;  %v3431_v57 = vadd.f32 %v3430_v15, %v3262_v20 }
 0x707   : > { %v7971_v63 = vpop.f32.mrf.mxu0  ;;  %v3679_v29 = vmax.f32 %v3428_v51, 0.0 }
 0x708   : > { %v3650_v34 = vmax.f32 %v3073_v62, 0.0  ;;  %v3418_v48 = vadd.f32 %v3417_v22, %v3249_v11  ;;  %v3667_v22 = vmax.f32 %v3421_v1, 0.0  ;;  %v5790_v62 = vld [vmem:[%s8511_s7 + $0x4] sm:$0xf0]  ;;  %v3683_v13 = vmax.f32 %v3431_v57, 0.0 }
 0x70a   : > { %v7947_v43 = vmax.f32 %v3894_v50, %v3650_v34  ;;  %v3663_v40 = vmax.f32 %v3418_v48, 0.0 }
 0x70b   : > { %v2905_v23 = vpop.f32.mrf.mxu3 }
 0x70c   : > { %v3967_v26 = vmax.f32 %v3966_v27, %v3663_v40  ;;  %v2906_v16 = vadd.f32 %v2905_v23, %v7653_v17  ;;  %v5325_v23 = vor.u32 %v5790_v62, %v5324_v21  ;;  %v5814_v21 = vld [vmem:[%s8511_s7 + $0xc4] sm:$0xf0] }
 0x70e   : > { %v3266_v39 = vpop.f32.mrf.mxu1  ;;  %v3435_v9 = vpop.f32.mrf.mxu2  ;;  %v3968_v46 = vmax.f32 %v3967_v26, %v3667_v22  ;;  %v3075_v30 = vadd.f32 %v7941_v59, %v2906_v16  ;;  %4416 = vmatpush.bf16.msra.mxu3 %v5325_v23  ;;  %v5818_v59 = vld [vmem:[%s8511_s7 + $0xe4] sm:$0xf0] }
 0x70f   : > { %v7982_v56 = vpop.f32.mrf.mxu0  ;;  %v3267_v5 = vadd.f32 %v3266_v39, %v7562_v18 }
 0x710   : > { %v3969_v54 = vmax.f32 %v3968_v46, %v3671_v61 }
 0x711   : > { %v3436_v12 = vadd.f32 %v3435_v9, %v3267_v5  ;;  %v5428_v9 = vld [vmem:[%s8511_s7 + $0xd0] sm:$0xf] }
 0x712   : > { %4422 = vmatpush.bf16.msrb.mxu3 %v5445_v41  ;;  %v5412_v41 = vld [vmem:[%s8511_s7 + $0xb0] sm:$0xf] }
 0x713   : > { %v2908_v49 = vpop.f32.mrf.mxu3  ;;  %v3691_v2 = vmax.f32 %v3436_v12, 0.0  ;;  %v5388_v12 = vld [vmem:[%s8511_s7 + $0x80] sm:$0xf] }
 0x714   : > { %v2909_v50 = vadd.f32 %v2908_v49, %v7653_v17  ;;  %v3264_v49 = vadd.f32 %v3263_v24, %v7562_v18  ;;  %v5436_v24 = vld [vmem:[%s8511_s7 + $0xe0] sm:$0xf] }
 0x715   : > { %v5437_v60 = vor.u32 %v5818_v59, %v5436_v24 }
 0x716   : > { %v3268_v32 = vpop.f32.mrf.mxu1  ;;  %v3433_v37 = vadd.f32 %v3432_v52, %v3264_v49  ;;  %v3078_v11 = vadd.f32 %v7944_v19, %v2909_v50  ;;  %v3437_v48 = vpop.f32.mrf.mxu2  ;;  %v3654_v19 = vmax.f32 %v3075_v30, 0.0 }
 0x717   : > { %v3094_v52 = vpop.f32.mrf.mxu0  ;;  %v3269_v1 = vadd.f32 %v3268_v32, %v7562_v18  ;;  %4423 = vmatpush.bf16.msrb.mxu3 %v5437_v60  ;;  %v5816_v18 = vld [vmem:[%s8511_s7 + $0xd4] sm:$0xf0]  ;;  %v5404_v32 = vld [vmem:[%s8511_s7 + $0xa0] sm:$0xf] }
 0x718   : > { %v3687_v31 = vmax.f32 %v3433_v37, 0.0  ;;  %v3658_v55 = vmax.f32 %v3078_v11, 0.0  ;;  %v5429_v22 = vor.u32 %v5816_v18, %v5428_v9  ;;  %v3896_v42 = vmax.f32 %v7947_v43, %v3654_v19  ;;  %v5810_v37 = vld [vmem:[%s8511_s7 + $0xa4] sm:$0xf0]  ;;  %v5808_v11 = vld [vmem:[%s8511_s7 + $0x94] sm:$0xf0] }
 0x719   : > { %v3438_v40 = vadd.f32 %v3437_v48, %v3269_v1  ;;  %v5405_v5 = vor.u32 %v5810_v37, %v5404_v32  ;;  %v5806_v1 = vld [vmem:[%s8511_s7 + $0x84] sm:$0xf0]  ;;  %v5460_v37 = vld [vmem:[%s8511_s7 + $0x110] sm:$0xf] }
 0x71a   : > { %v3897_v51 = vmax.f32 %v3896_v42, %v3658_v55 }
 0x71b   : > { %v2910_v14 = vpop.f32.mrf.mxu3  ;;  %4424 = vmatpush.bf16.msrb.mxu3 %v5429_v22  ;;  %v3695_v61 = vmax.f32 %v3438_v40, 0.0 }
 0x71c   : > { %v2911_v8 = vadd.f32 %v2910_v14, %v7653_v17  ;;  %v3970_v14 = vmax.f32 %v3969_v54, %v3675_v28 }
 0x71e   : > { %v3080_v44 = vadd.f32 %v7949_v47, %v2911_v8 }
 0x71f   : > { %v3097_v33 = vpop.f32.mrf.mxu0 }
 0x720   : > { %v3662_v36 = vmax.f32 %v3080_v44, 0.0 }
 0x723   : > { %v7961_v35 = vpop.f32.mrf.mxu3 }
 0x724   : > { %v2914_v15 = vadd.f32 %v7961_v35, %v7653_v17  ;;  %v3971_v35 = vmax.f32 %v3970_v14, %v3679_v29 }
 0x726   : > { %v3083_v0 = vadd.f32 %v7951_v4, %v2914_v15 }
 0x728   : > { %v3666_v20 = vmax.f32 %v3083_v0, 0.0  ;;  %v5389_v0 = vor.u32 %v5806_v1, %v5388_v12 }
 0x72b   : > { %v7965_v3 = vpop.f32.mrf.mxu3 }
 0x72c   : > { %v2916_v39 = vadd.f32 %v7965_v3, %v7653_v17  ;;  %v3972_v3 = vmax.f32 %v3971_v35, %v3683_v13 }
 0x72e   : > { %v3085_v4 = vadd.f32 %v7953_v53, %v2916_v39  ;;  %v3973_v16 = vmax.f32 %v3972_v3, %v3687_v31  ;;  %v3099_v31 = vpop.f32.mrf.mxu0 }
 0x730   : > { %v3974_v50 = vmax.f32 %v3973_v16, %v3691_v2  ;;  %v3670_v25 = vmax.f32 %v3085_v4, 0.0 }
 0x732   : > { %v3975_v46 = vmax.f32 %v3974_v50, %v3695_v61 }
 0x733   : > { %v7969_v38 = vpop.f32.mrf.mxu3 }
 0x734   : > { %v2919_v47 = vadd.f32 %v7969_v38, %v7653_v17  ;;  %v5420_v38 = vld [vmem:[%s8511_s7 + $0xc0] sm:$0xf]  ;;  %v3976_v15 = vrot.slane %v3975_v46, 4 }
 0x735   : > { %v5421_v62 = vor.u32 %v5814_v21, %v5420_v38 }
 0x736   : > { %v3088_v43 = vadd.f32 %v7963_v7, %v2919_v47  ;;  %v5812_v7 = vld [vmem:[%s8511_s7 + $0xb4] sm:$0xf0]  ;;  %v3977_v19 = vmax.f32 %v3975_v46, %v3976_v15  ;;  %v5822_v15 = vld [vmem:[%s8511_s7 + $0x104] sm:$0xf0] }
 0x737   : > { %4425 = vmatpush.bf16.msrb.mxu3 %v5421_v62  ;;  %v5413_v30 = vor.u32 %v5812_v7, %v5412_v41  ;;  %v5836_v62 = vld [vmem:[%s8511_s7 + $0x174] sm:$0xf0]  ;;  %v5830_v41 = vld [vmem:[%s8511_s7 + $0x144] sm:$0xf0] }
 0x738   : > { %v5832_v46 = vld [vmem:[%s8511_s7 + $0x154] sm:$0xf0] }
 0x73b   : > { %v7977_v6 = vpop.f32.mrf.mxu3  ;;  %4426 = vmatpush.bf16.msrb.mxu3 %v5413_v30 }
 0x73c   : > { %v2921_v26 = vadd.f32 %v7977_v6, %v7653_v17  ;;  %v3898_v6 = vmax.f32 %v3897_v51, %v3662_v36 }
 0x73e   : > { %v3090_v23 = vadd.f32 %v7971_v63, %v2921_v26  ;;  %v3899_v28 = vmax.f32 %v3898_v6, %v3666_v20  ;;  %v3705_v20 = vld [vmem:[#allocation2] sm:$0xf] }
 0x73f   : > { %4427 = vmatpush.bf16.msrb.mxu3 %v5405_v5  ;;  %v5824_v5 = vld [vmem:[%s8511_s7 + $0x114] sm:$0xf0] }
 0x740   : > { %v3900_v8 = vmax.f32 %v3899_v28, %v3670_v25  ;;  %v3678_v54 = vmax.f32 %v3090_v23, 0.0 }
 0x743   : > { %v2923_v34 = vpop.f32.mrf.mxu3 }
 0x744   : > { %v2924_v53 = vadd.f32 %v2923_v34, %v7653_v17  ;;  %v3674_v34 = vmax.f32 %v3088_v43, 0.0 }
 0x746   : > { %v3093_v49 = vadd.f32 %v7982_v56, %v2924_v53  ;;  %v5396_v56 = vld [vmem:[%s8511_s7 + $0x90] sm:$0xf]  ;;  %v3901_v24 = vmax.f32 %v3900_v8, %v3674_v34 }
 0x747   : > { %v5397_v60 = vor.u32 %v5808_v11, %v5396_v56  ;;  %v5508_v53 = vld [vmem:[%s8511_s7 + $0x170] sm:$0xf]  ;;  %v5461_v56 = vor.u32 %v5824_v5, %v5460_v37  ;;  %v5452_v11 = vld [vmem:[%s8511_s7 + $0x100] sm:$0xf]  ;;  %v5438_v37 = vld [vmem:[%s8511_s7 + $0xe8] sm:$0xf0] }
 0x748   : > { %v3682_v59 = vmax.f32 %v3093_v49, 0.0  ;;  %v3902_v13 = vmax.f32 %v3901_v24, %v3678_v54  ;;  %v5509_v25 = vor.u32 %v5836_v62, %v5508_v53  ;;  %v5476_v49 = vld [vmem:[%s8511_s7 + $0x130] sm:$0xf]  ;;  %v5468_v54 = vld [vmem:[%s8511_s7 + $0x120] sm:$0xf] }
 0x749   : > { %4428 = vmatpush.bf16.msrb.mxu3 %v5397_v60  ;;  %v5572_v24 = vld [vmem:[%s8511_s7 + $0x1f0] sm:$0xf]  ;;  %v5564_v60 = vld [vmem:[%s8511_s7 + $0x1e0] sm:$0xf]  ;;  %v5366_v53 = vld [vmem:[%s8511_s7 + $0x58] sm:$0xf0] }
 0x74a   : > { %v3903_v44 = vmax.f32 %v3902_v13, %v3682_v59  ;;  %v5852_v59 = vld [vmem:[%s8511_s7 + $0x1f4] sm:$0xf0] }
 0x74b   : > { %v2925_v27 = vpop.f32.mrf.mxu3  ;;  %v5573_v13 = vor.u32 %v5852_v59, %v5572_v24  ;;  %v5813_v24 = vld [vmem:[%s8511_s7 + $0xc4] sm:$0xf]  ;;  %v5422_v59 = vld [vmem:[%s8511_s7 + $0xc8] sm:$0xf0] }
 0x74c   : > { %v2926_v58 = vadd.f32 %v2925_v27, %v7653_v17  ;;  %v3978_v27 = vrot.slane %v3977_v19, 2 }
 0x74d   : > { %4429 = vmatpush.bf16.msrb.mxu3 %v5389_v0  ;;  %v5844_v0 = vld [vmem:[%s8511_s7 + $0x1b4] sm:$0xf0] }
 0x74e   : > { %v3095_v29 = vadd.f32 %v3094_v52, %v2926_v58  ;;  %v3979_v22 = vmax.f32 %v3977_v19, %v3978_v27  ;;  %v5556_v19 = vld [vmem:[%s8511_s7 + $0x1d0] sm:$0xf] }
 0x750   : > { %v3686_v48 = vmax.f32 %v3095_v29, 0.0  ;;  %v3980_v42 = vrot.slane %v3979_v22, 1  ;;  %v5826_v29 = vld [vmem:[%s8511_s7 + $0x124] sm:$0xf0] }
 0x751   : > { %v5469_v32 = vor.u32 %v5826_v29, %v5468_v54 }
 0x752   : > { %v3904_v40 = vmax.f32 %v3903_v44, %v3686_v48  ;;  %v3981_v26 = vmax.f32 %v3979_v22, %v3980_v42  ;;  %v5848_v44 = vld [vmem:[%s8511_s7 + $0x1d4] sm:$0xf0]  ;;  %v5524_v22 = vld [vmem:[%s8511_s7 + $0x190] sm:$0xf]  ;;  %v5516_v42 = vld [vmem:[%s8511_s7 + $0x180] sm:$0xf] }
 0x753   : > { %v2928_v57 = vpop.f32.mrf.mxu3 }
 0x754   : > { %v2929_v63 = vadd.f32 %v2928_v57, %v7653_v17  ;;  %v5484_v57 = vld [vmem:[%s8511_s7 + $0x140] sm:$0xf] }
 0x755   : > { %v5485_v7 = vor.u32 %v5830_v41, %v5484_v57  ;;  %v5791_v57 = vld [vmem:[%s8511_s7 + $0x14] sm:$0xf]  ;;  %v5334_v41 = vld [vmem:[%s8511_s7 + $0x18] sm:$0xf0] }
 0x756   : > { %v3098_v14 = vadd.f32 %v3097_v33, %v2929_v63  ;;  %v5492_v33 = vld [vmem:[%s8511_s7 + $0x150] sm:$0xf]  ;;  %v5828_v63 = vld [vmem:[%s8511_s7 + $0x134] sm:$0xf0] }
 0x757   : > { %v5493_v28 = vor.u32 %v5832_v46, %v5492_v33  ;;  %v5477_v30 = vor.u32 %v5828_v63, %v5476_v49  ;;  %v5793_v33 = vld [vmem:[%s8511_s7 + $0x24] sm:$0xf]  ;;  %v5342_v46 = vld [vmem:[%s8511_s7 + $0x28] sm:$0xf0]  ;;  %v5819_v63 = vld [vmem:[%s8511_s7 + $0xf4] sm:$0xf] }
 0x758   : > { %v3690_v35 = vmax.f32 %v3098_v14, 0.0  ;;  %v5453_v14 = vor.u32 %v5822_v15, %v5452_v11  ;;  %v5326_v49 = vld [vmem:[%s8511_s7 + $0x8] sm:$0xf0]  ;;  %v5430_v11 = vld [vmem:[%s8511_s7 + $0xd8] sm:$0xf0] }
 0x75a   : > { %v3905_v9 = vmax.f32 %v3904_v40, %v3690_v35  ;;  %v5557_v35 = vor.u32 %v5848_v44, %v5556_v19  ;;  %v5807_v19 = vld [vmem:[%s8511_s7 + $0x94] sm:$0xf]  ;;  %v5398_v44 = vld [vmem:[%s8511_s7 + $0x98] sm:$0xf0] }
 0x75b   : > { %v2930_v52 = vpop.f32.mrf.mxu3 }
 0x75c   : > { %v2931_v39 = vadd.f32 %v2930_v52, %v7653_v17  ;;  %v3988_v17 = vrot.slane %v3981_v26, 5  ;;  %v5850_v52 = vld [vmem:[%s8511_s7 + $0x1e4] sm:$0xf0]  ;;  %v5382_v26 = vld [vmem:[%s8511_s7 + $0x78] sm:$0xf0] }
 0x75d   : > { %v5565_v1 = vor.u32 %v5850_v52, %v5564_v60  ;;  %v5809_v60 = vld [vmem:[%s8511_s7 + $0xa4] sm:$0xf]  ;;  %v5406_v52 = vld [vmem:[%s8511_s7 + $0xa8] sm:$0xf0] }
 0x75e   : > { %v3100_v55 = vadd.f32 %v3099_v31, %v2931_v39  ;;  %v5548_v39 = vld [vmem:[%s8511_s7 + $0x1c0] sm:$0xf]  ;;  %v5846_v31 = vld [vmem:[%s8511_s7 + $0x1c4] sm:$0xf0] }
 0x75f   : > { %v5549_v40 = vor.u32 %v5846_v31, %v5548_v39  ;;  %v5805_v39 = vld [vmem:[%s8511_s7 + $0x84] sm:$0xf]  ;;  %v5390_v31 = vld [vmem:[%s8511_s7 + $0x88] sm:$0xf0] }
 0x760   : > { %v3694_v18 = vmax.f32 %v3100_v55, 0.0  ;;  %v5540_v55 = vld [vmem:[%s8511_s7 + $0x1b0] sm:$0xf] }
 0x761   : > { %v5541_v27 = vor.u32 %v5844_v0, %v5540_v55  ;;  %v5510_v55 = vld [vmem:[%s8511_s7 + $0x178] sm:$0xf0]  ;;  %v5393_v0 = vor.u32 %v5805_v39, %v5390_v31  ;;  %v5855_v31 = vld [vmem:[%s8513_s9 + $0x10] sm:$0xff] }
 0x762   : > { %v3906_v47 = vmax.f32 %v3905_v9, %v3694_v18  ;;  %v5532_v9 = vld [vmem:[%s8511_s7 + $0x1a0] sm:$0xf]  ;;  %v5842_v18 = vld [vmem:[%s8511_s7 + $0x1a4] sm:$0xf0] }
 0x764   : > { %v3907_v3 = vrot.slane %v3906_v47, 4 }
 0x766   : > { %v3908_v2 = vmax.f32 %v3906_v47, %v3907_v3  ;;  %v5533_v47 = vor.u32 %v5842_v18, %v5532_v9  ;;  %v5840_v3 = vld [vmem:[%s8511_s7 + $0x194] sm:$0xf0]  ;;  %v5833_v9 = vld [vmem:[%s8511_s7 + $0x164] sm:$0xf]  ;;  %v5502_v18 = vld [vmem:[%s8511_s7 + $0x168] sm:$0xf0] }
 0x768   : > { %v3909_v36 = vrot.slane %v3908_v2, 2 }
 0x76a   : > { %v3910_v4 = vmax.f32 %v3908_v2, %v3909_v36  ;;  %v5525_v2 = vor.u32 %v5840_v3, %v5524_v22  ;;  %v5838_v36 = vld [vmem:[%s8511_s7 + $0x184] sm:$0xf0]  ;;  %v5831_v22 = vld [vmem:[%s8511_s7 + $0x154] sm:$0xf]  ;;  %v5494_v3 = vld [vmem:[%s8511_s7 + $0x158] sm:$0xf0] }
 0x76c   : > { %v3911_v16 = vrot.slane %v3910_v4, 1 }
 0x76e   : > { %v3912_v61 = vmax.f32 %v3910_v4, %v3911_v16  ;;  %v5803_v4 = vld [vmem:[%s8511_s7 + $0x74] sm:$0xf]  ;;  %v5517_v16 = vor.u32 %v5838_v36, %v5516_v42  ;;  %v5829_v42 = vld [vmem:[%s8511_s7 + $0x144] sm:$0xf]  ;;  %v5486_v36 = vld [vmem:[%s8511_s7 + $0x148] sm:$0xf0] }
 0x770   : > { %v3987_v51 = vrot.slane %v3912_v61, 6  ;;  %v5385_v61 = vor.u32 %v5803_v4, %v5382_v26  ;;  %v5489_v4 = vor.u32 %v5829_v42, %v5486_v36  ;;  %v5827_v26 = vld [vmem:[%s8511_s7 + $0x134] sm:$0xf]  ;;  %v5868_v36 = vld [vmem:[%s8513_s9 + $0x78] sm:$0xff] }
 0x772   : > { %v3992_v38 = vsel %vm3991_vm4, %v3987_v51, %v3988_v17  ;;  %v5801_v51 = vld [vmem:[%s8511_s7 + $0x64] sm:$0xf] }
 0x773   : > { %v3994_v21 = vsel %vm3993_vm5, %v7663_v45, %v3992_v38  ;;  %v5500_v45 = vld [vmem:[%s8511_s7 + $0x160] sm:$0xf] }
 0x774   : > { %v3996_v43 = vmax.f32 %v3705_v20, %v3994_v21  ;;  %v5501_v58 = vor.u32 %v5834_v10, %v5500_v45  ;;  %v5374_v20 = vld [vmem:[%s8511_s7 + $0x68] sm:$0xf0]  ;;  %v5795_v45 = vld [vmem:[%s8511_s7 + $0x34] sm:$0xf]  ;;  %v5350_v10 = vld [vmem:[%s8511_s7 + $0x38] sm:$0xf0] }
 0x775   : > { %v5377_v21 = vor.u32 %v5801_v51, %v5374_v20 }
 0x776   : > { %4001 = vst.msk [vmem:[#allocation2] sm:$0xf] %vm7987_vm3, %v3996_v43  ;;  %v5799_v43 = vld [vmem:[%s8511_s7 + $0x54] sm:$0xf] }
 0x777   : > { %v5369_v62 = vor.u32 %v5799_v43, %v5366_v53  ;;  %v5462_v43 = vld [vmem:[%s8511_s7 + $0x118] sm:$0xf0] }
 0x77d   : > { %v8082_v50 = vld [vmem:[#allocation2] sm:$0xf] }
 0x77e   : > { %v4007_v6 = vperm.slane %v8082_v50, 0  ;;  %v4008_v34 = vperm.slane %v8082_v50, 1  ;;  %v4009_v48 = vperm.slane %v8082_v50, 2  ;;  %v4010_v17 = vperm.slane %v8082_v50, 3  ;;  %v5797_v50 = vld [vmem:[%s8511_s7 + $0x44] sm:$0xf] }
 0x780   : > { %v8085_v23 = vpack.c.bf16 %v4007_v6, %v4007_v6  ;;  %v8113_v8 = vpack.c.bf16 %v4008_v34, %v4008_v34  ;;  %v8147_v12 = vpack.c.bf16 %v4009_v48, %v4009_v48  ;;  %v8199_v38 = vpack.c.bf16 %v4010_v17, %v4010_v17  ;;  %v5358_v6 = vld [vmem:[%s8511_s7 + $0x48] sm:$0xf0]  ;;  %v5789_v34 = vld [vmem:[%s8511_s7 + $0x4] sm:$0xf] }
 0x781   : > { %v5329_v54 = vor.u32 %v5789_v34, %v5326_v49  ;;  %v5470_v17 = vld [vmem:[%s8511_s7 + $0x128] sm:$0xf0]  ;;  %v5845_v49 = vld [vmem:[%s8511_s7 + $0x1c4] sm:$0xf] }
 0x782   : > { %4417 = vmatmul.bf16.vlgmr.msra.gmra.mxu3 %v8085_v23 }
 0x783   : > { %4435 = vmatpush.bf16.msra.mxu3 %v5509_v25  ;;  %v5361_v25 = vor.u32 %v5797_v50, %v5358_v6  ;;  %v5454_v50 = vld [vmem:[%s8511_s7 + $0x108] sm:$0xf0] }
 0x787   : > { %4436 = vmatpush.bf16.msra.mxu3 %v5501_v58  ;;  %v5353_v58 = vor.u32 %v5795_v45, %v5350_v10  ;;  %v5574_v45 = vld [vmem:[%s8511_s7 + $0x1f8] sm:$0xf0] }
 0x78b   : > { %4437 = vmatpush.bf16.msra.mxu3 %v5493_v28  ;;  %v5345_v28 = vor.u32 %v5793_v33, %v5342_v46  ;;  %v5849_v33 = vld [vmem:[%s8511_s7 + $0x1e4] sm:$0xf]  ;;  %v5566_v46 = vld [vmem:[%s8511_s7 + $0x1e8] sm:$0xf0] }
 0x78f   : > { %4438 = vmatpush.bf16.msra.mxu3 %v5485_v7  ;;  %v5337_v7 = vor.u32 %v5791_v57, %v5334_v41  ;;  %v5847_v41 = vld [vmem:[%s8511_s7 + $0x1d4] sm:$0xf] }
 0x792   : > { %4430 = vmatmul.bf16.vlgmr.msrb.gmra.mxu3 %v8113_v8 }
 0x793   : > { %4439 = vmatpush.bf16.msra.mxu3 %v5477_v30  ;;  %v5446_v30 = vld [vmem:[%s8511_s7 + $0xf8] sm:$0xf0] }
 0x794   : > { %v5449_v29 = vor.u32 %v5819_v63, %v5446_v30  ;;  %v5550_v63 = vld [vmem:[%s8511_s7 + $0x1c8] sm:$0xf0] }
 0x795   : > { %v5553_v30 = vor.u32 %v5845_v49, %v5550_v63  ;;  %v5871_v49 = vld [vmem:[%s8515_s11 + $0x10] sm:$0xff] }
 0x797   : > { %4440 = vmatpush.bf16.msra.mxu3 %v5469_v32  ;;  %v5817_v32 = vld [vmem:[%s8511_s7 + $0xe4] sm:$0xf] }
 0x798   : > { %v5441_v5 = vor.u32 %v5817_v32, %v5438_v37  ;;  %v5841_v37 = vld [vmem:[%s8511_s7 + $0x1a4] sm:$0xf] }
 0x79b   : > { %4441 = vmatpush.bf16.msra.mxu3 %v5461_v56  ;;  %v5815_v56 = vld [vmem:[%s8511_s7 + $0xd4] sm:$0xf] }
 0x79c   : > { %v5433_v15 = vor.u32 %v5815_v56, %v5430_v11 }
 0x79f   : > { %4442 = vmatpush.bf16.msra.mxu3 %v5453_v14  ;;  %v5425_v14 = vor.u32 %v5813_v24, %v5422_v59  ;;  %v5526_v24 = vld [vmem:[%s8511_s7 + $0x198] sm:$0xf0] }
 0x7a2   : > { %4443 = vmatmul.bf16.vlgmr.msra.gmra.mxu3 %v8147_v12 }
 0x7a3   : > { %4448 = vmatpush.bf16.msrb.mxu3 %v5573_v13  ;;  %v5811_v13 = vld [vmem:[%s8511_s7 + $0xb4] sm:$0xf] }
 0x7a7   : > { %4449 = vmatpush.bf16.msrb.mxu3 %v5565_v1  ;;  %v5409_v1 = vor.u32 %v5809_v60, %v5406_v52  ;;  %v5860_v60 = vld [vmem:[%s8513_s9 + $0x38] sm:$0xff]  ;;  %v5859_v52 = vld [vmem:[%s8513_s9 + $0x30] sm:$0xff] }
 0x7ab   : > { %4450 = vmatpush.bf16.msrb.mxu3 %v5557_v35  ;;  %v5401_v35 = vor.u32 %v5807_v19, %v5398_v44  ;;  %v4083_v19 = vld [vmem:[%s8512_s8] sm:$0x3] }
 0x7ac   : > { %v5857_v44 = vld [vmem:[%s8513_s9 + $0x20] sm:$0xff] }
 0x7af   : > { %4451 = vmatpush.bf16.msrb.mxu3 %v5549_v40  ;;  %v5835_v40 = vld [vmem:[%s8511_s7 + $0x174] sm:$0xf] }
 0x7b3   : > { %4452 = vmatpush.bf16.msrb.mxu3 %v5541_v27  ;;  %v5513_v27 = vor.u32 %v5835_v40, %v5510_v55 }
 0x7b7   : > { %4453 = vmatpush.bf16.msrb.mxu3 %v5533_v47  ;;  %v5505_v47 = vor.u32 %v5833_v9, %v5502_v18  ;;  %v5853_v18 = vld [vmem:[%s8513_s9] sm:$0xff] }
 0x7bb   : > { %4454 = vmatpush.bf16.msrb.mxu3 %v5525_v2  ;;  %v5497_v2 = vor.u32 %v5831_v22, %v5494_v3 }
 0x7bf   : > { %4455 = vmatpush.bf16.msrb.mxu3 %v5517_v16 }
 0x7c2   : > { %4456 = vmatmul.bf16.vlgmr.msrb.gmra.mxu3 %v8199_v38 }
 0x7c3   : > { %4461 = vmatpush.bf16.msra.mxu3 %v5385_v61  ;;  %v5825_v61 = vld [vmem:[%s8511_s7 + $0x124] sm:$0xf] }
 0x7c4   : > { %v5473_v20 = vor.u32 %v5825_v61, %v5470_v17  ;;  %v5865_v61 = vld [vmem:[%s8513_s9 + $0x60] sm:$0xff]  ;;  %v5864_v17 = vld [vmem:[%s8513_s9 + $0x58] sm:$0xff] }
 0x7c7   : > { %4462 = vmatpush.bf16.msra.mxu3 %v5377_v21  ;;  %v5823_v21 = vld [vmem:[%s8511_s7 + $0x114] sm:$0xf] }
 0x7c8   : > { %v5465_v53 = vor.u32 %v5823_v21, %v5462_v43  ;;  %v5861_v21 = vld [vmem:[%s8513_s9 + $0x40] sm:$0xff] }
 0x7cb   : > { %4463 = vmatpush.bf16.msra.mxu3 %v5369_v62  ;;  %v5821_v62 = vld [vmem:[%s8511_s7 + $0x104] sm:$0xf] }
 0x7cc   : > { %v5457_v10 = vor.u32 %v5821_v62, %v5454_v50  ;;  %v4406_v62 = vperm.slane %v4083_v19, 1 }
 0x7cf   : > { %4464 = vmatpush.bf16.msra.mxu3 %v5361_v25  ;;  %v5851_v25 = vld [vmem:[%s8511_s7 + $0x1f4] sm:$0xf] }
 0x7d3   : > { %4465 = vmatpush.bf16.msra.mxu3 %v5353_v58  ;;  %v5577_v58 = vor.u32 %v5851_v25, %v5574_v45 }
 0x7d7   : > { %4466 = vmatpush.bf16.msra.mxu3 %v5345_v28  ;;  %v5569_v28 = vor.u32 %v5849_v33, %v5566_v46  ;;  %v5876_v46 = vld [vmem:[%s8515_s11 + $0x38] sm:$0xff] }
 0x7db   : > { %4467 = vmatpush.bf16.msra.mxu3 %v5337_v7  ;;  %v5558_v7 = vld [vmem:[%s8511_s7 + $0x1d8] sm:$0xf0] }
 0x7dc   : > { %v5561_v34 = vor.u32 %v5847_v41, %v5558_v7  ;;  %v5874_v41 = vld [vmem:[%s8515_s11 + $0x28] sm:$0xff]  ;;  %v5873_v7 = vld [vmem:[%s8515_s11 + $0x20] sm:$0xff] }
 0x7df   : > { %4468 = vmatpush.bf16.msra.mxu3 %v5329_v54 }
 0x7e2   : > { %4469 = vmatmul.bf16.vlgmr.msra.gmra.mxu3 %v8085_v23  ;;  %v5414_v23 = vld [vmem:[%s8511_s7 + $0xb8] sm:$0xf0] }
 0x7e3   : > { %4474 = vmatpush.bf16.msrb.mxu3 %v5449_v29  ;;  %v5417_v48 = vor.u32 %v5811_v13, %v5414_v23  ;;  %v5843_v29 = vld [vmem:[%s8511_s7 + $0x1b4] sm:$0xf]  ;;  %v5518_v13 = vld [vmem:[%s8511_s7 + $0x188] sm:$0xf0] }
 0x7e7   : > { %4475 = vmatpush.bf16.msrb.mxu3 %v5441_v5  ;;  %v5534_v5 = vld [vmem:[%s8511_s7 + $0x1a8] sm:$0xf0] }
 0x7e8   : > { %v5537_v56 = vor.u32 %v5841_v37, %v5534_v5 }
 0x7eb   : > { %4476 = vmatpush.bf16.msrb.mxu3 %v5433_v15  ;;  %v5839_v15 = vld [vmem:[%s8511_s7 + $0x194] sm:$0xf] }
 0x7ec   : > { %v5529_v59 = vor.u32 %v5839_v15, %v5526_v24  ;;  %v4690_v24 = vld [vmem:[%s8516_s12] sm:$0x1] }
 0x7ef   : > { %4477 = vmatpush.bf16.msrb.mxu3 %v5425_v14  ;;  %v5837_v14 = vld [vmem:[%s8511_s7 + $0x184] sm:$0xf] }
 0x7f0   : > { %v5521_v23 = vor.u32 %v5837_v14, %v5518_v13 }
 0x7f3   : > { %4478 = vmatpush.bf16.msrb.mxu3 %v5417_v48 }
 0x7f7   : > { %4479 = vmatpush.bf16.msrb.mxu3 %v5409_v1  ;;  %v5858_v1 = vld [vmem:[%s8513_s9 + $0x28] sm:$0xff] }
 0x7fb   : > { %4480 = vmatpush.bf16.msrb.mxu3 %v5401_v35  ;;  %v4405_v35 = vperm.slane %v4083_v19, 0 }
 0x7ff   : > { %4481 = vmatpush.bf16.msrb.mxu3 %v5393_v0 }
 0x802   : > { %4482 = vmatmul.bf16.vlgmr.msrb.gmra.mxu3 %v8113_v8  ;;  %v5478_v8 = vld [vmem:[%s8511_s7 + $0x138] sm:$0xf0] }
 0x803   : > { %4487 = vmatpush.bf16.msra.mxu3 %v5513_v27  ;;  %v5481_v16 = vor.u32 %v5827_v26, %v5478_v8  ;;  %v5854_v27 = vld [vmem:[%s8513_s9 + $0x8] sm:$0xff]  ;;  %v5867_v26 = vld [vmem:[%s8513_s9 + $0x70] sm:$0xff] }
 0x804   : > { %v5866_v8 = vld [vmem:[%s8513_s9 + $0x68] sm:$0xff] }
 0x805   : > { %v4418_v51 = vpop.f32.mrf.mxu3 }
 0x806   : > { %v4419_v39 = vadd.f32 %v4418_v51, %v4405_v35  ;;  %v5863_v51 = vld [vmem:[%s8513_s9 + $0x50] sm:$0xff] }
 0x807   : > { %4488 = vmatpush.bf16.msra.mxu3 %v5505_v47 }
 0x80b   : > { %4489 = vmatpush.bf16.msra.mxu3 %v5497_v2 }
 0x80d   : > { %v4420_v6 = vpop.f32.mrf.mxu3 }
 0x80f   : > { %4490 = vmatpush.bf16.msra.mxu3 %v5489_v4 }
 0x813   : > { %4491 = vmatpush.bf16.msra.mxu3 %v5481_v16 }
 0x815   : > { %v4431_v57 = vpop.f32.mrf.mxu3 }
 0x816   : > { %v4432_v40 = vadd.f32 %v4431_v57, %v4419_v39  ;;  %v5875_v57 = vld [vmem:[%s8515_s11 + $0x30] sm:$0xff] }
 0x817   : > { %4492 = vmatpush.bf16.msra.mxu3 %v5473_v20  ;;  %v5862_v20 = vld [vmem:[%s8513_s9 + $0x48] sm:$0xff] }
 0x81b   : > { %4493 = vmatpush.bf16.msra.mxu3 %v5465_v53 }
 0x81d   : > { %v4433_v54 = vpop.f32.mrf.mxu3 }
 0x81e   : > { %v5870_v54 = vld [vmem:[%s8515_s11 + $0x8] sm:$0xff] }
 0x81f   : > { %4494 = vmatpush.bf16.msra.mxu3 %v5457_v10 }
 0x822   : > { %4495 = vmatmul.bf16.vlgmr.msra.gmra.mxu3 %v8147_v12  ;;  %v5542_v12 = vld [vmem:[%s8511_s7 + $0x1b8] sm:$0xf0] }
 0x823   : > { %4500 = vmatpush.bf16.msrb.mxu3 %v5577_v58  ;;  %v5545_v32 = vor.u32 %v5843_v29, %v5542_v12  ;;  %v5869_v29 = vld [vmem:[%s8515_s11] sm:$0xff] }
 0x824   : > { %v4549_v12 = vld [vmem:[%s8514_s10] sm:$0x1] }
 0x825   : > { %v4444_v11 = vpop.f32.mrf.mxu3 }
 0x826   : > { %v4445_v0 = vadd.f32 %v4444_v11, %v4432_v40 }
 0x827   : > { %4501 = vmatpush.bf16.msrb.mxu3 %v5569_v28 }
 0x82b   : > { %4502 = vmatpush.bf16.msrb.mxu3 %v5561_v34  ;;  %v5872_v34 = vld [vmem:[%s8515_s11 + $0x18] sm:$0xff] }
 0x82d   : > { %v4446_v48 = vpop.f32.mrf.mxu3 }
 0x82f   : > { %4503 = vmatpush.bf16.msrb.mxu3 %v5553_v30 }
 0x833   : > { %4504 = vmatpush.bf16.msrb.mxu3 %v5545_v32 }
 0x837   : > { %4505 = vmatpush.bf16.msrb.mxu3 %v5537_v56 }
 0x83b   : > { %4506 = vmatpush.bf16.msrb.mxu3 %v5529_v59 }
 0x83f   : > { %4507 = vmatpush.bf16.msrb.mxu3 %v5521_v23 }
 0x842   : > { %4508 = vmatmul.bf16.vlgmr.msrb.gmra.mxu3 %v8199_v38  ;;  %v5856_v38 = vld [vmem:[%s8513_s9 + $0x18] sm:$0xff] }
 0x843   : > { %4646 = vmatpush.bf16.msra.mxu3 %v5860_v60 }
 0x845   : > { %v4457_v55 = vpop.f32.mrf.mxu3 }
 0x846   : > { %v4458_v9 = vadd.f32 %v4457_v55, %v4445_v0 }
 0x847   : > { %4647 = vmatpush.bf16.msra.mxu3 %v5859_v52 }
 0x848   : > { %v4513_v47 = vmax.f32 %v4458_v9, 0.0 }
 0x84a   : > { %v4515_v3 = vpack.c.bf16 %v4513_v47, %v4513_v47 }
 0x84b   : > { %4648 = vmatpush.bf16.msra.mxu3 %v5858_v1 }
 0x84d   : > { %v4459_v22 = vpop.f32.mrf.mxu3 }
 0x84f   : > { %4649 = vmatpush.bf16.msra.mxu3 %v5857_v44 }
 0x853   : > { %4650 = vmatpush.bf16.msra.mxu3 %v5856_v38 }
 0x857   : > { %4651 = vmatpush.bf16.msra.mxu3 %v5855_v31 }
 0x85b   : > { %4652 = vmatpush.bf16.msra.mxu3 %v5854_v27 }
 0x85f   : > { %4653 = vmatpush.bf16.msra.mxu3 %v5853_v18 }
 0x862   : > { %4654 = vmatmul.bf16.vlgmr.msra.gmra.mxu3 %v4515_v3 }
 0x863   : > { %4659 = vmatpush.bf16.msrb.mxu3 %v5868_v36 }
 0x865   : > { %v4470_v2 = vpop.f32.mrf.mxu3 }
 0x866   : > { %v4471_v50 = vadd.f32 %v4470_v2, %v4406_v62 }
 0x867   : > { %4660 = vmatpush.bf16.msrb.mxu3 %v5867_v26 }
 0x86b   : > { %4661 = vmatpush.bf16.msrb.mxu3 %v5866_v8 }
 0x86d   : > { %v4472_v42 = vpop.f32.mrf.mxu3 }
 0x86f   : > { %4662 = vmatpush.bf16.msrb.mxu3 %v5865_v61 }
 0x873   : > { %4663 = vmatpush.bf16.msrb.mxu3 %v5864_v17 }
 0x877   : > { %4664 = vmatpush.bf16.msrb.mxu3 %v5863_v51 }
 0x87b   : > { %4665 = vmatpush.bf16.msrb.mxu3 %v5862_v20 }
 0x87f   : > { %4666 = vmatpush.bf16.msrb.mxu3 %v5861_v21 }
 0x883   : > { %4739 = vmatpush.bf16.msra.mxu3 %v5876_v46 }
 0x885   : > { %v4483_v4 = vpop.f32.mrf.mxu3 }
 0x886   : > { %v4484_v6 = vadd.f32 %v4483_v4, %v4471_v50 }
 0x887   : > { %4740 = vmatpush.bf16.msra.mxu3 %v5875_v57 }
 0x88b   : > { %4741 = vmatpush.bf16.msra.mxu3 %v5874_v41 }
 0x88d   : > { %v4485_v16 = vpop.f32.mrf.mxu3 }
 0x88f   : > { %4742 = vmatpush.bf16.msra.mxu3 %v5873_v7 }
 0x893   : > { %4743 = vmatpush.bf16.msra.mxu3 %v5872_v34 }
 0x897   : > { %4744 = vmatpush.bf16.msra.mxu3 %v5871_v49 }
 0x89b   : > { %4745 = vmatpush.bf16.msra.mxu3 %v5870_v54 }
 0x89f   : > { %4746 = vmatpush.bf16.msra.mxu3 %v5869_v29 }
 0x8a5   : > { %v4496_v43 = vpop.f32.mrf.mxu3 }
 0x8a6   : > { %v4497_v25 = vadd.f32 %v4496_v43, %v4484_v6 }
 0x8ad   : > { %v4498_v53 = vpop.f32.mrf.mxu3 }
 0x8c5   : > { %v4509_v45 = vpop.f32.mrf.mxu3 }
 0x8c6   : > { %v4510_v10 = vadd.f32 %v4509_v45, %v4497_v25 }
 0x8c8   : > { %v4514_v58 = vmax.f32 %v4510_v10, 0.0 }
 0x8ca   : > { %v4516_v33 = vpack.c.bf16 %v4514_v58, %v4514_v58 }
 0x8cc   : > { %4667 = vmatmul.bf16.vlgmr.msrb.gmra.mxu3 %v4516_v33 }
 0x8cd   : > { %v4511_v28 = vpop.f32.mrf.mxu3 }
 0x8e5   : > { %v4655_v63 = vpop.f32.mrf.mxu3 }
 0x8e6   : > { %v4656_v32 = vadd.f32 %v4655_v63, %v4549_v12 }
 0x8ed   : > { %v4657_v30 = vpop.f32.mrf.mxu3 }
 0x94f   : > { %v4668_v37 = vpop.f32.mrf.mxu3 }
 0x950   : > { %v4669_v5 = vadd.f32 %v4668_v37, %v4656_v32 }
 0x952   : > { %v4672_v56 = vmax.f32 %v4669_v5, 0.0 }
 0x954   : > { %v4673_v11 = vpack.c.bf16 %v4672_v56, %v4672_v56 }
 0x956   : > { %4747 = vmatmul.bf16.vlgmr.msra.gmra.mxu3 %v4673_v11 }
 0x957   : > { %v4670_v15 = vpop.f32.mrf.mxu3 }
 0x9d9   : > { %v4748_v59 = vpop.f32.mrf.mxu3 }
 0x9da   : > { %v4749_v14 = vadd.f32 %v4748_v59, %v4690_v24 }
 0x9dc   : > { %4752 = vst [vmem:[%s455_s19] sm:$0x1] %v4749_v14 }
 0x9dd   : > { %5979 = shalt.err (!%p5976_p5)
}
 0x9de   : > { %5893 = dma.vmem_to_hbm [thread:$0]  (%p6143_p4), %s4765_s17, 16, %s4767_s22, %s4754_s23  }
 0x9e1   : > { %v4750_v13 = vpop.f32.mrf.mxu3 }
 0x9e2 PF: > { %p5899_p6 = scmp.ge.s32.totalorder %s6030_s30, 2  ;;  %s4778_s14 = sand.u32 1, %s6010_s25  }
 0x9e3   : > { %s4779_s0 = scalar_lea.sflag [#allocation4], %s4778_s14 }
 0x9e4   : > { %p5896_p7 = pnand %p5899_p6, %p6150_p8 }
 0x9e6   : > { %p5897_p9 = pneg %p5896_p7 }
 0x9e8   : > { %6005 = dma.done.wait (%p5897_p9), %s4779_s0, 16  }
 0x9e9   : > { %6007 = vsyncadd (%p5897_p9), %s4779_s0, 4294967280  ;;  %s26_s30 = sadd.s32 1, %s6030_s30   ;;  %s8797_s28 = sld [smem:[#allocation6_spill]] }
 0x9ea   : > { %p23_p10 = scmp.ge.s32.totalorder %s26_s30, 4   ;;  %s8798_s29 = sld [smem:[#allocation7_spill]] }
 0x9eb   : > { %s8799_s25 = smov %s6014_s26  ;;  %s8800_s26 = smov %s6018_s27 }
 0x9ec   : > { %s8801_s27 = smov %s6156_s21  ;;  %25 = sbr.rel (!%p23_p10) target bundleno = 8 (0x8), region = 115 }
 0x9f1   :  { %4784 = vsyncpa [#allocation4], 1 }
 0x9f2   :  { %4786 = vsyncpa [#allocation4 + $0x1], 1 }

</bundles_post_ra>
